<compile_context>
chip_gen: v7x
topology: tpu7x:2x2x1
jax: 0.10.0
libtpu: 0.0.40
codegen_flags: <defaults>
</compile_context>

<pallas_src>
import functools

import jax
import jax.numpy as jnp
from jax.experimental import pallas as pl
from jax.experimental.pallas import tpu as pltpu

LANE = 128


# ----------------------------------------------------------------------------
# small helpers
# ----------------------------------------------------------------------------
def _round_up(x, m):
    return ((x + m - 1) // m) * m


@functools.lru_cache(maxsize=None)
def _vmem_capacity_bytes():
    try:
        info_fn = getattr(pltpu, "get_tpu_info", None)
        if info_fn is not None:
            v = getattr(info_fn(), "vmem_capacity_bytes", None)
            if v:
                return int(v)
    except Exception:
        pass
    return 64 * 1024 * 1024  # conservative (v7x-sized) fallback


def _vmem_limit_bytes():
    # <=~38 MiB on 64 MiB parts (v7x), 64 MiB on 128 MiB parts (v5e/v6e).
    return int(min(64 * 1024 * 1024, _vmem_capacity_bytes() * 6 // 10))


def _row_tile():
    # 128 MiB VMEM parts afford a 1024-row tile; stay at 512 on v7x.
    return 1024 if _vmem_capacity_bytes() > 96 * 1024 * 1024 else 512


def _pad_rows(a, m_pad):
    if a.shape[0] == m_pad:
        return a
    pad = [(0, m_pad - a.shape[0])] + [(0, 0)] * (a.ndim - 1)
    return jnp.pad(a, pad)


def _pad_cols(a, n_pad):
    if a.shape[-1] == n_pad:
        return a
    pad = [(0, 0)] * (a.ndim - 1) + [(0, n_pad - a.shape[-1])]
    return jnp.pad(a, pad)


def _pad_vec(v, n_pad):
    if v.shape[0] == n_pad:
        return v
    return jnp.pad(v, (0, n_pad - v.shape[0]))


def _pad_matrix(w, rows, cols):
    r, c = w.shape
    if r == rows and c == cols:
        return w
    return jnp.pad(w, ((0, rows - r), (0, cols - c)))


def fold_bn(gamma, beta, mean, var, eps=1e-5):
    scale = gamma / jnp.sqrt(var + eps)
    shift = beta - mean * scale
    return scale, shift


# ----------------------------------------------------------------------------
# Kernel B: conv3 (1x1) + bn3 + residual / downsample + relu
# ----------------------------------------------------------------------------
def _mm_bn_relu_kernel(x_ref, w_ref, s_ref, b_ref, o_ref):
    acc = jnp.dot(x_ref[...], w_ref[...], preferred_element_type=jnp.float32)
    acc = acc * s_ref[...] + b_ref[...]
    o_ref[...] = jnp.maximum(acc, 0.0).astype(o_ref.dtype)


def _mm_bn_add_res_relu_kernel(x_ref, w_ref, s_ref, b_ref, r_ref, o_ref):
    acc = jnp.dot(x_ref[...], w_ref[...], preferred_element_type=jnp.float32)
    acc = acc * s_ref[...] + b_ref[...] + r_ref[...].astype(jnp.float32)
    o_ref[...] = jnp.maximum(acc, 0.0).astype(o_ref.dtype)


def _mm_bn_add_ds_relu_kernel(x_ref, w_ref, s_ref, b_ref,
                              xd_ref, wd_ref, sd_ref, bd_ref, o_ref):
    # conv3 + bn3 fused with the downsample 1x1 conv + bn (identity path).
    acc = jnp.dot(x_ref[...], w_ref[...], preferred_element_type=jnp.float32)
    acc = acc * s_ref[...] + b_ref[...]
    acc_d = jnp.dot(xd_ref[...], wd_ref[...], preferred_element_type=jnp.float32)
    acc = acc + acc_d * sd_ref[...] + bd_ref[...]
    o_ref[...] = jnp.maximum(acc, 0.0).astype(o_ref.dtype)


def fused_matmul_bn_relu(x2d, w, scale, shift, *, residual=None,
                         ds_x=None, ds_w=None, ds_scale=None, ds_shift=None,
                         out_dtype=jnp.float32):
    """relu((x@w)*scale + shift [+ residual | + (ds_x@ds_w)*ds_scale + ds_shift])."""
    M, K = x2d.shape
    K2, Np = w.shape
    assert K == K2 and K % LANE == 0 and Np % LANE == 0

    tm = min(_row_tile(), _round_up(M, LANE))
    m_pad = _round_up(M, tm)
    tn = 256 if Np % 256 == 0 else 128
    grid = (m_pad // tm, Np // tn)
    out_itemsize = 4 if out_dtype == jnp.float32 else 2

    x2d = _pad_rows(x2d.astype(jnp.bfloat16), m_pad)
    w = w.astype(jnp.bfloat16)
    scale2 = scale.reshape(1, Np).astype(jnp.float32)
    shift2 = shift.reshape(1, Np).astype(jnp.float32)

    in_specs = [
        pl.BlockSpec((tm, K), lambda i, j: (i, 0)),
        pl.BlockSpec((K, tn), lambda i, j: (0, j)),
        pl.BlockSpec((1, tn), lambda i, j: (0, j)),
        pl.BlockSpec((1, tn), lambda i, j: (0, j)),
    ]
    args = [x2d, w, scale2, shift2]
    flops = 2 * M * K * Np
    bytes_accessed = (m_pad * K + K * Np) * 2 + 2 * Np * 4 + m_pad * Np * out_itemsize

    if ds_x is not None:
        Kd = ds_x.shape[1]
        assert Kd % LANE == 0
        in_specs += [
            pl.BlockSpec((tm, Kd), lambda i, j: (i, 0)),
            pl.BlockSpec((Kd, tn), lambda i, j: (0, j)),
            pl.BlockSpec((1, tn), lambda i, j: (0, j)),
            pl.BlockSpec((1, tn), lambda i, j: (0, j)),
        ]
        args += [
            _pad_rows(ds_x.astype(jnp.bfloat16), m_pad),
            ds_w.astype(jnp.bfloat16),
            ds_scale.reshape(1, Np).astype(jnp.float32),
            ds_shift.reshape(1, Np).astype(jnp.float32),
        ]
        kernel = _mm_bn_add_ds_relu_kernel
        flops += 2 * M * Kd * Np
        bytes_accessed += (m_pad * Kd + Kd * Np) * 2 + 2 * Np * 4
    elif residual is not None:
        in_specs.append(pl.BlockSpec((tm, tn), lambda i, j: (i, j)))
        args.append(_pad_rows(residual.astype(jnp.bfloat16), m_pad))  # bf16 residual
        kernel = _mm_bn_add_res_relu_kernel
        bytes_accessed += m_pad * Np * 2
    else:
        kernel = _mm_bn_relu_kernel

    out = pl.pallas_call(
        kernel,
        out_shape=jax.ShapeDtypeStruct((m_pad, Np), out_dtype),
        grid=grid,
        in_specs=in_specs,
        out_specs=pl.BlockSpec((tm, tn), lambda i, j: (i, j)),
        compiler_params=pltpu.CompilerParams(
            dimension_semantics=("parallel", "parallel"),
            vmem_limit_bytes=_vmem_limit_bytes()),
        cost_estimate=pl.CostEstimate(flops=int(flops), transcendentals=0,
                                      bytes_accessed=int(bytes_accessed)),
    )(*args)
    return out[:M] if m_pad != M else out


# ----------------------------------------------------------------------------
# Kernel A: conv1 (1x1) + bn1 + relu + conv2 (3x3, stride, pad=1) + bn2 + relu
# ----------------------------------------------------------------------------
def _make_conv12_kernel(stride, phase_shapes, Ho, Wo, Hph, Wph, Cinp, Cpm):
    s = stride
    n_ph = s * s

    def kernel(*refs):
        x_refs = refs[:n_ph]
        (w1_ref, s1_ref, b1_ref, w2_ref, s2_ref, b2_ref, o_ref) = refs[n_ph:n_ph + 7]
        pad_ref, acc_ref = refs[n_ph + 7], refs[n_ph + 8]

        # ---- conv1 + bn1 + relu, written straight into the phase-split,
        #      spatially padded VMEM buffer (h1 never round-trips HBM) ----
        for p in range(n_ph):
            py, px = p // s, p % s
            qy, qx = (py - 1) % s, (px - 1) % s
            oy = 1 if py == 0 else 0
            ox = 1 if px == 0 else 0
            ny, nx = phase_shapes[qy * s + qx]
            xq = x_refs[qy * s + qx][0].reshape(ny * nx, Cinp)
            h1 = jnp.dot(xq, w1_ref[...], preferred_element_type=jnp.float32)
            h1 = jnp.maximum(h1 * s1_ref[...] + b1_ref[...], 0.0)
            pad_ref[p, oy:oy + ny, ox:ox + nx, :] = (
                h1.astype(jnp.bfloat16).reshape(ny, nx, Cpm))
            # keep the halo ring zero (re-done every step: safe under megacore
            # grid splitting; only a few tiny VMEM stores)
            if oy > 0:
                pad_ref[p, 0:oy, :, :] = jnp.zeros((oy, Wph, Cpm), jnp.bfloat16)
            if oy + ny < Hph:
                pad_ref[p, oy + ny:Hph, :, :] = jnp.zeros(
                    (Hph - oy - ny, Wph, Cpm), jnp.bfloat16)
            if ox > 0:
                pad_ref[p, :, 0:ox, :] = jnp.zeros((Hph, ox, Cpm), jnp.bfloat16)
            if ox + nx < Wph:
                pad_ref[p, :, ox + nx:Wph, :] = jnp.zeros(
                    (Hph, Wph - ox - nx, Cpm), jnp.bfloat16)

        # ---- conv2 (3x3, stride) as 9 shifted 1x1 MXU matmuls; the column
        #      shift is hoisted so only 3*stride LHS repacks materialize ----
        first = True
        for kx in range(3):
            px, b = kx % s, kx // s
            for py in range(s):
                colv = pad_ref[py * s + px, :, b:b + Wo, :].reshape(Hph * Wo, Cpm)
                for ky in range(py, 3, s):
                    a = ky // s
                    t = ky * 3 + kx
                    part = jnp.dot(colv[a * Wo:a * Wo + Ho * Wo, :],
                                   w2_ref[t * Cpm:(t + 1) * Cpm, :],
                                   preferred_element_type=jnp.float32)
                    if first:
                        acc_ref[...] = part
                        first = False
                    else:
                        acc_ref[...] += part

        res = acc_ref[...] * s2_ref[...] + b2_ref[...]
        o_ref[0] = jnp.maximum(res, 0.0).astype(o_ref.dtype)

    return kernel


def fused_conv1_conv2_bn_relu(x_phases, w1p, s1, b1, w2p_flat, s2, b2, stride):
    """x_phases[qy*s+qx] = x[:, qy::s, qx::s, :] (bf16, channel-padded).

    Returns ((N*Ho*Wo, Cpm) bf16, Ho, Wo)."""
    s = stride
    n_ph = s * s
    assert len(x_phases) == n_ph
    N, Ho, Wo, Cinp = x_phases[0].shape            # phase (0,0) == output grid
    Cpm = w1p.shape[1]
    Hph = 2 // s + Ho
    Wph = 2 // s + Wo
    phase_shapes = [(p.shape[1], p.shape[2]) for p in x_phases]

    kernel = _make_conv12_kernel(s, phase_shapes, Ho, Wo, Hph, Wph, Cinp, Cpm)

    in_specs = ([pl.BlockSpec((1, ny, nx, Cinp), lambda n: (n, 0, 0, 0))
                 for (ny, nx) in phase_shapes]
                + [pl.BlockSpec((Cinp, Cpm), lambda n: (0, 0)),
                   pl.BlockSpec((1, Cpm), lambda n: (0, 0)),
                   pl.BlockSpec((1, Cpm), lambda n: (0, 0)),
                   pl.BlockSpec((9 * Cpm, Cpm), lambda n: (0, 0)),
                   pl.BlockSpec((1, Cpm), lambda n: (0, 0)),
                   pl.BlockSpec((1, Cpm), lambda n: (0, 0))])
    args = list(x_phases) + [
        w1p.astype(jnp.bfloat16),
        s1.reshape(1, Cpm).astype(jnp.float32),
        b1.reshape(1, Cpm).astype(jnp.float32),
        w2p_flat.astype(jnp.bfloat16),
        s2.reshape(1, Cpm).astype(jnp.float32),
        b2.reshape(1, Cpm).astype(jnp.float32)]

    n_pix = sum(ny * nx for ny, nx in phase_shapes)  # == H*W
    flops = 2 * N * (n_pix * Cinp * Cpm + Ho * Wo * 9 * Cpm * Cpm)
    bytes_accessed = (N * n_pix * Cinp * 2 + Cinp * Cpm * 2 + 9 * Cpm * Cpm * 2
                      + 4 * Cpm * 4 + N * Ho * Wo * Cpm * 2)

    out = pl.pallas_call(
        kernel,
        out_shape=jax.ShapeDtypeStruct((N, Ho * Wo, Cpm), jnp.bfloat16),
        grid=(N,),
        in_specs=in_specs,
        out_specs=pl.BlockSpec((1, Ho * Wo, Cpm), lambda n: (n, 0, 0)),
        scratch_shapes=[pltpu.VMEM((n_ph, Hph, Wph, Cpm), jnp.bfloat16),
                        pltpu.VMEM((Ho * Wo, Cpm), jnp.float32)],
        compiler_params=pltpu.CompilerParams(
            dimension_semantics=("parallel",),
            vmem_limit_bytes=_vmem_limit_bytes()),
        cost_estimate=pl.CostEstimate(flops=int(flops), transcendentals=0,
                                      bytes_accessed=int(bytes_accessed)),
    )(*args)
    return out.reshape(N * Ho * Wo, Cpm), Ho, Wo


# ----------------------------------------------------------------------------
# Bottleneck forward (Pallas)
# ----------------------------------------------------------------------------
def bottleneck_forward(x_nchw, params, stride):
    # NCHW -> NHWC done in bf16 (half the HBM traffic of an f32 layout pass).
    x = jnp.transpose(x_nchw.astype(jnp.bfloat16), (0, 2, 3, 1))
    N, H, W, Cin = x.shape
    Cmid = params["w1"].shape[1]
    Cout = params["w3"].shape[1]
    Cinp = _round_up(Cin, LANE)   # lane-padded input channels (K of conv1/ds)
    Cpm = _round_up(Cmid, LANE)   # lane-padded mid channels
    Cpo = _round_up(Cout, LANE)   # lane-padded out channels

    s1, b1 = fold_bn(*params["bn1"])
    s2, b2 = fold_bn(*params["bn2"])
    s3, b3 = fold_bn(*params["bn3"])

    # zero-pad weights / BN params so padded channels stay exactly zero.
    w1p = _pad_matrix(params["w1"], Cinp, Cpm)
    w2p = jnp.pad(params["w2"], ((0, 0), (0, 0),
                                 (0, Cpm - Cmid), (0, Cpm - Cmid))
                  ).reshape(9 * Cpm, Cpm)
    w3p = _pad_matrix(params["w3"], Cpm, Cpo)
    s1p, b1p = _pad_vec(s1, Cpm), _pad_vec(b1, Cpm)
    s2p, b2p = _pad_vec(s2, Cpm), _pad_vec(b2, Cpm)
    s3p, b3p = _pad_vec(s3, Cpo), _pad_vec(b3, Cpo)

    # channel-pad x once (bf16); stride-phase split for the 3x3 conv.
    xp = _pad_cols(x, Cinp)
    if stride == 1:
        xphases = [xp]
    else:
        xphases = [xp[:, qy::stride, qx::stride, :]
                   for qy in range(stride) for qx in range(stride)]

    # conv1 + bn1 + relu + conv2 + bn2 + relu  (single fused kernel; h1 stays
    # in VMEM; stride handled via the phase-split views).
    h2, Ho, Wo = fused_conv1_conv2_bn_relu(xphases, w1p, s1p, b1p,
                                           w2p, s2p, b2p, stride)
    M3 = N * Ho * Wo

    # conv3 + bn3 + (identity | downsample 1x1 conv + bn) + relu, one kernel.
    if stride != 1 or Cin != Cout:
        # downsample LHS == stride-phase (0,0) of x, already materialized.
        xd = xphases[0].reshape(M3, Cinp)
        sd, bd = fold_bn(*params["bnd"])
        wdp = _pad_matrix(params["wd"], Cinp, Cpo)
        out = fused_matmul_bn_relu(
            h2, w3p, s3p, b3p,
            ds_x=xd, ds_w=wdp,
            ds_scale=_pad_vec(sd, Cpo), ds_shift=_pad_vec(bd, Cpo))
    else:
        identity = xp.reshape(M3, Cpo)   # Cin == Cout  =>  Cinp == Cpo
        out = fused_matmul_bn_relu(h2, w3p, s3p, b3p, residual=identity)

    out = out[:, :Cout].reshape(N, Ho, Wo, Cout)
    return jnp.transpose(out, (0, 3, 1, 2))  # back to NCHW


# ----------------------------------------------------------------------------
# Pure-JAX reference mirroring the kernel precision (bf16 operands, f32 acc)
# ----------------------------------------------------------------------------
def bottleneck_reference(x_nchw, params, stride):
    x = jnp.transpose(x_nchw, (0, 2, 3, 1)).astype(jnp.float32)
    Cin = x.shape[-1]
    Cmid = params["w1"].shape[1]
    Cout = params["w3"].shape[1]

    def conv(x, w_hwio, s, pad):
        return jax.lax.conv_general_dilated(
            x.astype(jnp.bfloat16), w_hwio.astype(jnp.bfloat16), (s, s), pad,
            dimension_numbers=("NHWC", "HWIO", "NHWC"),
            preferred_element_type=jnp.float32)

    def bn(x, p):
        sc, sh = fold_bn(*p)
        return x * sc + sh

    def q(x):  # intermediates / residual are carried as bf16 by the kernels
        return x.astype(jnp.bfloat16).astype(jnp.float32)

    if stride != 1 or Cin != Cout:
        ident = bn(conv(x, params["wd"].reshape(1, 1, Cin, Cout), stride,
                        "VALID"), params["bnd"])
    else:
        ident = q(x)

    out = q(jax.nn.relu(bn(conv(x, params["w1"].reshape(1, 1, Cin, Cmid), 1,
                                "VALID"), params["bn1"])))
    out = q(jax.nn.relu(bn(conv(out, params["w2"], stride, ((1, 1), (1, 1))),
                           params["bn2"])))
    out = bn(conv(out, params["w3"].reshape(1, 1, Cmid, Cout), 1, "VALID"),
             params["bn3"])
    out = jax.nn.relu(out + ident)
    return jnp.transpose(out, (0, 3, 1, 2))


# ----------------------------------------------------------------------------
# Deterministic parameter init (shapes per nn.Module __init__)
# ----------------------------------------------------------------------------
def init_params(key, in_channels, out_channels, expansion=4):
    Cin, Cmid, Cout = in_channels, out_channels, out_channels * expansion
    ks = jax.random.split(key, 12)

    def bn_params(k, c):
        k1, k2, k3, k4 = jax.random.split(k, 4)
        gamma = jax.random.uniform(k1, (c,), jnp.float32, 0.5, 1.5)
        beta = 0.1 * jax.random.normal(k2, (c,), jnp.float32)
        mean = 0.1 * jax.random.normal(k3, (c,), jnp.float32)
        var = jax.random.uniform(k4, (c,), jnp.float32, 0.5, 1.5)
        return (gamma, beta, mean, var)

    return {
        "w1": 0.1 * jax.random.normal(ks[0], (Cin, Cmid), jnp.float32),
        "w2": 0.1 * jax.random.normal(ks[1], (3, 3, Cmid, Cmid), jnp.float32),
        "w3": 0.1 * jax.random.normal(ks[2], (Cmid, Cout), jnp.float32),
        "wd": 0.1 * jax.random.normal(ks[3], (Cin, Cout), jnp.float32),
        "bn1": bn_params(ks[4], Cmid),
        "bn2": bn_params(ks[5], Cmid),
        "bn3": bn_params(ks[6], Cout),
        "bnd": bn_params(ks[7], Cout),
    }


if __name__ == "__main__":
    key = jax.random.PRNGKey(0)
    k_x, k_p, k_x2, k_p2 = jax.random.split(key, 4)

    # --- stride-2 bottleneck (downsample path) ---
    N, Cin, H, W = 2, 8, 16, 16
    out_channels = 8
    stride = 2
    x = jax.random.normal(k_x, (N, Cin, H, W), jnp.float32)
    params = init_params(k_p, Cin, out_channels)
    fwd = jax.jit(functools.partial(bottleneck_forward, stride=stride))
    out = jax.block_until_ready(fwd(x, params))
    ref = jax.block_until_ready(bottleneck_reference(x, params, stride))
    assert out.shape == (N, out_channels * 4, H // stride, W // stride), out.shape
    err = float(jnp.max(jnp.abs(out - ref)))
    assert err < 1e-2, err

    # --- stride-1 bottleneck (identity residual path) ---
    Cin1 = out_channels * 4
    x1 = jax.random.normal(k_x2, (N, Cin1, H, W), jnp.float32)
    params1 = init_params(k_p2, Cin1, out_channels)
    fwd1 = jax.jit(functools.partial(bottleneck_forward, stride=1))
    out1 = jax.block_until_ready(fwd1(x1, params1))
    ref1 = jax.block_until_ready(bottleneck_reference(x1, params1, 1))
    assert out1.shape == (N, out_channels * 4, H, W), out1.shape
    err1 = float(jnp.max(jnp.abs(out1 - ref1)))
    assert err1 < 1e-2, err1

    print("KERNEL_OK")
</pallas_src>

<mosaic_0001>
module attributes {stable_mosaic.version = 11 : i64} {
  func.func @_mm_bn_add_ds_relu_kernel(%arg0: i32, %arg1: i32, %arg2: memref<128x128xbf16, #tpu.memory_space<vmem>>, %arg3: memref<128x128xbf16, #tpu.memory_space<vmem>>, %arg4: memref<1x128xf32, #tpu.memory_space<vmem>>, %arg5: memref<1x128xf32, #tpu.memory_space<vmem>>, %arg6: memref<128x128xbf16, #tpu.memory_space<vmem>>, %arg7: memref<128x128xbf16, #tpu.memory_space<vmem>>, %arg8: memref<1x128xf32, #tpu.memory_space<vmem>>, %arg9: memref<1x128xf32, #tpu.memory_space<vmem>>, %arg10: memref<128x128xf32, #tpu.memory_space<vmem>>) attributes {dimension_semantics = [#tpu.dimension_semantics<parallel>, #tpu.dimension_semantics<parallel>], iteration_bounds = array<i64: 1, 1>, scalar_prefetch = 0 : i64, scratch_operands = 0 : i64, tpu.core_type = #tpu.core_type<tc>, window_params = [{transform_indices = @transform_0, window_bounds = array<i64: 128, 128>}, {transform_indices = @transform_1, window_bounds = array<i64: 128, 128>}, {transform_indices = @transform_2, window_bounds = array<i64: 1, 128>}, {transform_indices = @transform_3, window_bounds = array<i64: 1, 128>}, {transform_indices = @transform_4, window_bounds = array<i64: 128, 128>}, {transform_indices = @transform_5, window_bounds = array<i64: 128, 128>}, {transform_indices = @transform_6, window_bounds = array<i64: 1, 128>}, {transform_indices = @transform_7, window_bounds = array<i64: 1, 128>}, {transform_indices = @transform_8, window_bounds = array<i64: 128, 128>}]} {
    %c0 = arith.constant 0 : index
    %c0_0 = arith.constant 0 : index
    %0 = vector.load %arg2[%c0, %c0_0] : memref<128x128xbf16, #tpu.memory_space<vmem>>, vector<128x128xbf16>
    %c0_1 = arith.constant 0 : index
    %c0_2 = arith.constant 0 : index
    %1 = vector.load %arg3[%c0_1, %c0_2] : memref<128x128xbf16, #tpu.memory_space<vmem>>, vector<128x128xbf16>
    %cst = arith.constant dense<0.000000e+00> : vector<128x128xf32>
    %2 = tpu.matmul %0, %1, %cst {dimension_numbers = #tpu.dot_dimension_numbers<[1], [0], [0], [1], [0, 0, 1, 1], [], []>} : vector<128x128xbf16>, vector<128x128xbf16>, vector<128x128xf32> -> vector<128x128xf32>
    %c0_3 = arith.constant 0 : index
    %c0_4 = arith.constant 0 : index
    %3 = vector.load %arg4[%c0_3, %c0_4] : memref<1x128xf32, #tpu.memory_space<vmem>>, vector<1x128xf32>
    %4 = vector.broadcast %3 : vector<1x128xf32> to vector<128x128xf32>
    %5 = arith.mulf %2, %4 : vector<128x128xf32>
    %c0_5 = arith.constant 0 : index
    %c0_6 = arith.constant 0 : index
    %6 = vector.load %arg5[%c0_5, %c0_6] : memref<1x128xf32, #tpu.memory_space<vmem>>, vector<1x128xf32>
    %7 = vector.broadcast %6 : vector<1x128xf32> to vector<128x128xf32>
    %8 = arith.addf %5, %7 : vector<128x128xf32>
    %c0_7 = arith.constant 0 : index
    %c0_8 = arith.constant 0 : index
    %9 = vector.load %arg6[%c0_7, %c0_8] : memref<128x128xbf16, #tpu.memory_space<vmem>>, vector<128x128xbf16>
    %c0_9 = arith.constant 0 : index
    %c0_10 = arith.constant 0 : index
    %10 = vector.load %arg7[%c0_9, %c0_10] : memref<128x128xbf16, #tpu.memory_space<vmem>>, vector<128x128xbf16>
    %cst_11 = arith.constant dense<0.000000e+00> : vector<128x128xf32>
    %11 = tpu.matmul %9, %10, %cst_11 {dimension_numbers = #tpu.dot_dimension_numbers<[1], [0], [0], [1], [0, 0, 1, 1], [], []>} : vector<128x128xbf16>, vector<128x128xbf16>, vector<128x128xf32> -> vector<128x128xf32>
    %c0_12 = arith.constant 0 : index
    %c0_13 = arith.constant 0 : index
    %12 = vector.load %arg8[%c0_12, %c0_13] : memref<1x128xf32, #tpu.memory_space<vmem>>, vector<1x128xf32>
    %13 = vector.broadcast %12 : vector<1x128xf32> to vector<128x128xf32>
    %14 = arith.mulf %11, %13 : vector<128x128xf32>
    %15 = arith.addf %8, %14 : vector<128x128xf32>
    %c0_14 = arith.constant 0 : index
    %c0_15 = arith.constant 0 : index
    %16 = vector.load %arg9[%c0_14, %c0_15] : memref<1x128xf32, #tpu.memory_space<vmem>>, vector<1x128xf32>
    %17 = vector.broadcast %16 : vector<1x128xf32> to vector<128x128xf32>
    %18 = arith.addf %15, %17 : vector<128x128xf32>
    %cst_16 = arith.constant 0.000000e+00 : f32
    %19 = vector.broadcast %cst_16 : f32 to vector<128x128xf32>
    %20 = arith.maximumf %18, %19 : vector<128x128xf32>
    %c0_17 = arith.constant 0 : index
    %c0_18 = arith.constant 0 : index
    %21 = vector.load %arg10[%c0_17, %c0_18] : memref<128x128xf32, #tpu.memory_space<vmem>>, vector<128x128xf32>
    tpu.vector_store %arg10[%c0_17, %c0_18], %20 {strides = array<i32>} : memref<128x128xf32, #tpu.memory_space<vmem>>, vector<128x128xf32>,
    return
  }
  func.func @transform_0(%arg0: i32, %arg1: i32) -> (i32, i32) {
    %c0_i32 = arith.constant 0 : i32
    %c0_i32_0 = arith.constant 0 : i32
    return %arg0, %c0_i32 : i32, i32
  }
  func.func @transform_1(%arg0: i32, %arg1: i32) -> (i32, i32) {
    %c0_i32 = arith.constant 0 : i32
    %c0_i32_0 = arith.constant 0 : i32
    return %c0_i32, %arg1 : i32, i32
  }
  func.func @transform_2(%arg0: i32, %arg1: i32) -> (i32, i32) {
    %c0_i32 = arith.constant 0 : i32
    %c0_i32_0 = arith.constant 0 : i32
    return %c0_i32, %arg1 : i32, i32
  }
  func.func @transform_3(%arg0: i32, %arg1: i32) -> (i32, i32) {
    %c0_i32 = arith.constant 0 : i32
    %c0_i32_0 = arith.constant 0 : i32
    return %c0_i32, %arg1 : i32, i32
  }
  func.func @transform_4(%arg0: i32, %arg1: i32) -> (i32, i32) {
    %c0_i32 = arith.constant 0 : i32
    %c0_i32_0 = arith.constant 0 : i32
    return %arg0, %c0_i32 : i32, i32
  }
  func.func @transform_5(%arg0: i32, %arg1: i32) -> (i32, i32) {
    %c0_i32 = arith.constant 0 : i32
    %c0_i32_0 = arith.constant 0 : i32
    return %c0_i32, %arg1 : i32, i32
  }
  func.func @transform_6(%arg0: i32, %arg1: i32) -> (i32, i32) {
    %c0_i32 = arith.constant 0 : i32
    %c0_i32_0 = arith.constant 0 : i32
    return %c0_i32, %arg1 : i32, i32
  }
  func.func @transform_7(%arg0: i32, %arg1: i32) -> (i32, i32) {
    %c0_i32 = arith.constant 0 : i32
    %c0_i32_0 = arith.constant 0 : i32
    return %c0_i32, %arg1 : i32, i32
  }
  func.func @transform_8(%arg0: i32, %arg1: i32) -> (i32, i32) {
    %c0_i32 = arith.constant 0 : i32
    return %arg0, %arg1 : i32, i32
  }
}

module attributes {stable_mosaic.version = 11 : i64} {
  func.func @kernel(%arg0: i32, %arg1: memref<1x8x8x128xbf16, #tpu.memory_space<vmem>>, %arg2: memref<1x8x8x128xbf16, #tpu.memory_space<vmem>>, %arg3: memref<1x8x8x128xbf16, #tpu.memory_space<vmem>>, %arg4: memref<1x8x8x128xbf16, #tpu.memory_space<vmem>>, %arg5: memref<128x128xbf16, #tpu.memory_space<vmem>>, %arg6: memref<1x128xf32, #tpu.memory_space<vmem>>, %arg7: memref<1x128xf32, #tpu.memory_space<vmem>>, %arg8: memref<1152x128xbf16, #tpu.memory_space<vmem>>, %arg9: memref<1x128xf32, #tpu.memory_space<vmem>>, %arg10: memref<1x128xf32, #tpu.memory_space<vmem>>, %arg11: memref<1x64x128xbf16, #tpu.memory_space<vmem>>, %arg12: memref<4x9x9x128xbf16, #tpu.memory_space<vmem>>, %arg13: memref<64x128xf32, #tpu.memory_space<vmem>>) attributes {dimension_semantics = [#tpu.dimension_semantics<parallel>], iteration_bounds = array<i64: 2>, scalar_prefetch = 0 : i64, scratch_operands = 2 : i64, tpu.core_type = #tpu.core_type<tc>, window_params = [{transform_indices = @transform_0, window_bounds = array<i64: 1, 8, 8, 128>}, {transform_indices = @transform_1, window_bounds = array<i64: 1, 8, 8, 128>}, {transform_indices = @transform_2, window_bounds = array<i64: 1, 8, 8, 128>}, {transform_indices = @transform_3, window_bounds = array<i64: 1, 8, 8, 128>}, {pipeline_mode = #tpu.pipeline_mode<synchronous>, transform_indices = @transform_4, window_bounds = array<i64: 128, 128>}, {pipeline_mode = #tpu.pipeline_mode<synchronous>, transform_indices = @transform_5, window_bounds = array<i64: 1, 128>}, {pipeline_mode = #tpu.pipeline_mode<synchronous>, transform_indices = @transform_6, window_bounds = array<i64: 1, 128>}, {pipeline_mode = #tpu.pipeline_mode<synchronous>, transform_indices = @transform_7, window_bounds = array<i64: 1152, 128>}, {pipeline_mode = #tpu.pipeline_mode<synchronous>, transform_indices = @transform_8, window_bounds = array<i64: 1, 128>}, {pipeline_mode = #tpu.pipeline_mode<synchronous>, transform_indices = @transform_9, window_bounds = array<i64: 1, 128>}, {transform_indices = @transform_10, window_bounds = array<i64: 1, 64, 128>}]} {
    %c0 = arith.constant 0 : index
    %c0_0 = arith.constant 0 : index
    %c0_1 = arith.constant 0 : index
    %c0_2 = arith.constant 0 : index
    %0 = vector.load %arg4[%c0, %c0_0, %c0_1, %c0_2] : memref<1x8x8x128xbf16, #tpu.memory_space<vmem>>, vector<1x8x8x128xbf16>
    %1 = vector.shape_cast %0 : vector<1x8x8x128xbf16> to vector<8x8x128xbf16>
    %2 = vector.shape_cast %1 : vector<8x8x128xbf16> to vector<64x128xbf16>
    %c0_3 = arith.constant 0 : index
    %c0_4 = arith.constant 0 : index
    %3 = vector.load %arg5[%c0_3, %c0_4] : memref<128x128xbf16, #tpu.memory_space<vmem>>, vector<128x128xbf16>
    %cst = arith.constant dense<0.000000e+00> : vector<64x128xf32>
    %4 = tpu.matmul %2, %3, %cst {dimension_numbers = #tpu.dot_dimension_numbers<[1], [0], [0], [1], [0, 0, 1, 1], [], []>} : vector<64x128xbf16>, vector<128x128xbf16>, vector<64x128xf32> -> vector<64x128xf32>
    %c0_5 = arith.constant 0 : index
    %c0_6 = arith.constant 0 : index
    %5 = vector.load %arg6[%c0_5, %c0_6] : memref<1x128xf32, #tpu.memory_space<vmem>>, vector<1x128xf32>
    %6 = vector.broadcast %5 : vector<1x128xf32> to vector<64x128xf32>
    %7 = arith.mulf %4, %6 : vector<64x128xf32>
    %c0_7 = arith.constant 0 : index
    %c0_8 = arith.constant 0 : index
    %8 = vector.load %arg7[%c0_7, %c0_8] : memref<1x128xf32, #tpu.memory_space<vmem>>, vector<1x128xf32>
    %9 = vector.broadcast %8 : vector<1x128xf32> to vector<64x128xf32>
    %10 = arith.addf %7, %9 : vector<64x128xf32>
    %cst_9 = arith.constant 0.000000e+00 : f32
    %11 = vector.broadcast %cst_9 : f32 to vector<64x128xf32>
    %12 = arith.maximumf %10, %11 : vector<64x128xf32>
    %13 = arith.truncf %12 : vector<64x128xf32> to vector<64x128xbf16>
    %14 = vector.shape_cast %13 : vector<64x128xbf16> to vector<8x8x128xbf16>
    %c0_10 = arith.constant 0 : index
    %c1 = arith.constant 1 : index
    %c1_11 = arith.constant 1 : index
    %c0_12 = arith.constant 0 : index
    %15 = vector.load %arg12[%c0_10, %c1, %c1_11, %c0_12] : memref<4x9x9x128xbf16, #tpu.memory_space<vmem>>, vector<1x8x8x128xbf16>
    %16 = vector.shape_cast %15 : vector<1x8x8x128xbf16> to vector<8x8x128xbf16>
    %17 = vector.shape_cast %14 : vector<8x8x128xbf16> to vector<1x8x8x128xbf16>
    tpu.vector_store %arg12[%c0_10, %c1, %c1_11, %c0_12], %17 {strides = array<i32>} : memref<4x9x9x128xbf16, #tpu.memory_space<vmem>>, vector<1x8x8x128xbf16>,
    %cst_13 = arith.constant 0.000000e+00 : bf16
    %18 = vector.broadcast %cst_13 : bf16 to vector<1x9x128xbf16>
    %c0_14 = arith.constant 0 : index
    %c0_15 = arith.constant 0 : index
    %c0_16 = arith.constant 0 : index
    %c0_17 = arith.constant 0 : index
    %19 = vector.load %arg12[%c0_14, %c0_15, %c0_16, %c0_17] : memref<4x9x9x128xbf16, #tpu.memory_space<vmem>>, vector<1x1x9x128xbf16>
    %20 = vector.shape_cast %19 : vector<1x1x9x128xbf16> to vector<1x9x128xbf16>
    %21 = vector.shape_cast %18 : vector<1x9x128xbf16> to vector<1x1x9x128xbf16>
    tpu.vector_store %arg12[%c0_14, %c0_15, %c0_16, %c0_17], %21 {strides = array<i32>} : memref<4x9x9x128xbf16, #tpu.memory_space<vmem>>, vector<1x1x9x128xbf16>,
    %cst_18 = arith.constant 0.000000e+00 : bf16
    %22 = vector.broadcast %cst_18 : bf16 to vector<9x1x128xbf16>
    %c0_19 = arith.constant 0 : index
    %c0_20 = arith.constant 0 : index
    %c0_21 = arith.constant 0 : index
    %c0_22 = arith.constant 0 : index
    %23 = vector.load %arg12[%c0_19, %c0_20, %c0_21, %c0_22] : memref<4x9x9x128xbf16, #tpu.memory_space<vmem>>, vector<1x9x1x128xbf16>
    %24 = vector.shape_cast %23 : vector<1x9x1x128xbf16> to vector<9x1x128xbf16>
    %25 = vector.shape_cast %22 : vector<9x1x128xbf16> to vector<1x9x1x128xbf16>
    tpu.vector_store %arg12[%c0_19, %c0_20, %c0_21, %c0_22], %25 {strides = array<i32>} : memref<4x9x9x128xbf16, #tpu.memory_space<vmem>>, vector<1x9x1x128xbf16>,
    %c0_23 = arith.constant 0 : index
    %c0_24 = arith.constant 0 : index
    %c0_25 = arith.constant 0 : index
    %c0_26 = arith.constant 0 : index
    %26 = vector.load %arg3[%c0_23, %c0_24, %c0_25, %c0_26] : memref<1x8x8x128xbf16, #tpu.memory_space<vmem>>, vector<1x8x8x128xbf16>
    %27 = vector.shape_cast %26 : vector<1x8x8x128xbf16> to vector<8x8x128xbf16>
    %28 = vector.shape_cast %27 : vector<8x8x128xbf16> to vector<64x128xbf16>
    %c0_27 = arith.constant 0 : index
    %c0_28 = arith.constant 0 : index
    %29 = vector.load %arg5[%c0_27, %c0_28] : memref<128x128xbf16, #tpu.memory_space<vmem>>, vector<128x128xbf16>
    %cst_29 = arith.constant dense<0.000000e+00> : vector<64x128xf32>
    %30 = tpu.matmul %28, %29, %cst_29 {dimension_numbers = #tpu.dot_dimension_numbers<[1], [0], [0], [1], [0, 0, 1, 1], [], []>} : vector<64x128xbf16>, vector<128x128xbf16>, vector<64x128xf32> -> vector<64x128xf32>
    %c0_30 = arith.constant 0 : index
    %c0_31 = arith.constant 0 : index
    %31 = vector.load %arg6[%c0_30, %c0_31] : memref<1x128xf32, #tpu.memory_space<vmem>>, vector<1x128xf32>
    %32 = vector.broadcast %31 : vector<1x128xf32> to vector<64x128xf32>
    %33 = arith.mulf %30, %32 : vector<64x128xf32>
    %c0_32 = arith.constant 0 : index
    %c0_33 = arith.constant 0 : index
    %34 = vector.load %arg7[%c0_32, %c0_33] : memref<1x128xf32, #tpu.memory_space<vmem>>, vector<1x128xf32>
    %35 = vector.broadcast %34 : vector<1x128xf32> to vector<64x128xf32>
    %36 = arith.addf %33, %35 : vector<64x128xf32>
    %cst_34 = arith.constant 0.000000e+00 : f32
    %37 = vector.broadcast %cst_34 : f32 to vector<64x128xf32>
    %38 = arith.maximumf %36, %37 : vector<64x128xf32>
    %39 = arith.truncf %38 : vector<64x128xf32> to vector<64x128xbf16>
    %40 = vector.shape_cast %39 : vector<64x128xbf16> to vector<8x8x128xbf16>
    %c1_35 = arith.constant 1 : index
    %c1_36 = arith.constant 1 : index
    %c0_37 = arith.constant 0 : index
    %c0_38 = arith.constant 0 : index
    %41 = vector.load %arg12[%c1_35, %c1_36, %c0_37, %c0_38] : memref<4x9x9x128xbf16, #tpu.memory_space<vmem>>, vector<1x8x8x128xbf16>
    %42 = vector.shape_cast %41 : vector<1x8x8x128xbf16> to vector<8x8x128xbf16>
    %43 = vector.shape_cast %40 : vector<8x8x128xbf16> to vector<1x8x8x128xbf16>
    tpu.vector_store %arg12[%c1_35, %c1_36, %c0_37, %c0_38], %43 {strides = array<i32>} : memref<4x9x9x128xbf16, #tpu.memory_space<vmem>>, vector<1x8x8x128xbf16>,
    %cst_39 = arith.constant 0.000000e+00 : bf16
    %44 = vector.broadcast %cst_39 : bf16 to vector<1x9x128xbf16>
    %c1_40 = arith.constant 1 : index
    %c0_41 = arith.constant 0 : index
    %c0_42 = arith.constant 0 : index
    %c0_43 = arith.constant 0 : index
    %45 = vector.load %arg12[%c1_40, %c0_41, %c0_42, %c0_43] : memref<4x9x9x128xbf16, #tpu.memory_space<vmem>>, vector<1x1x9x128xbf16>
    %46 = vector.shape_cast %45 : vector<1x1x9x128xbf16> to vector<1x9x128xbf16>
    %47 = vector.shape_cast %44 : vector<1x9x128xbf16> to vector<1x1x9x128xbf16>
    tpu.vector_store %arg12[%c1_40, %c0_41, %c0_42, %c0_43], %47 {strides = array<i32>} : memref<4x9x9x128xbf16, #tpu.memory_space<vmem>>, vector<1x1x9x128xbf16>,
    %cst_44 = arith.constant 0.000000e+00 : bf16
    %48 = vector.broadcast %cst_44 : bf16 to vector<9x1x128xbf16>
    %c1_45 = arith.constant 1 : index
    %c0_46 = arith.constant 0 : index
    %c8 = arith.constant 8 : index
    %c0_47 = arith.constant 0 : index
    %49 = vector.load %arg12[%c1_45, %c0_46, %c8, %c0_47] : memref<4x9x9x128xbf16, #tpu.memory_space<vmem>>, vector<1x9x1x128xbf16>
    %50 = vector.shape_cast %49 : vector<1x9x1x128xbf16> to vector<9x1x128xbf16>
    %51 = vector.shape_cast %48 : vector<9x1x128xbf16> to vector<1x9x1x128xbf16>
    tpu.vector_store %arg12[%c1_45, %c0_46, %c8, %c0_47], %51 {strides = array<i32>} : memref<4x9x9x128xbf16, #tpu.memory_space<vmem>>, vector<1x9x1x128xbf16>,
    %c0_48 = arith.constant 0 : index
    %c0_49 = arith.constant 0 : index
    %c0_50 = arith.constant 0 : index
    %c0_51 = arith.constant 0 : index
    %52 = vector.load %arg2[%c0_48, %c0_49, %c0_50, %c0_51] : memref<1x8x8x128xbf16, #tpu.memory_space<vmem>>, vector<1x8x8x128xbf16>
    %53 = vector.shape_cast %52 : vector<1x8x8x128xbf16> to vector<8x8x128xbf16>
    %54 = vector.shape_cast %53 : vector<8x8x128xbf16> to vector<64x128xbf16>
    %c0_52 = arith.constant 0 : index
    %c0_53 = arith.constant 0 : index
    %55 = vector.load %arg5[%c0_52, %c0_53] : memref<128x128xbf16, #tpu.memory_space<vmem>>, vector<128x128xbf16>
    %cst_54 = arith.constant dense<0.000000e+00> : vector<64x128xf32>
    %56 = tpu.matmul %54, %55, %cst_54 {dimension_numbers = #tpu.dot_dimension_numbers<[1], [0], [0], [1], [0, 0, 1, 1], [], []>} : vector<64x128xbf16>, vector<128x128xbf16>, vector<64x128xf32> -> vector<64x128xf32>
    %c0_55 = arith.constant 0 : index
    %c0_56 = arith.constant 0 : index
    %57 = vector.load %arg6[%c0_55, %c0_56] : memref<1x128xf32, #tpu.memory_space<vmem>>, vector<1x128xf32>
    %58 = vector.broadcast %57 : vector<1x128xf32> to vector<64x128xf32>
    %59 = arith.mulf %56, %58 : vector<64x128xf32>
    %c0_57 = arith.constant 0 : index
    %c0_58 = arith.constant 0 : index
    %60 = vector.load %arg7[%c0_57, %c0_58] : memref<1x128xf32, #tpu.memory_space<vmem>>, vector<1x128xf32>
    %61 = vector.broadcast %60 : vector<1x128xf32> to vector<64x128xf32>
    %62 = arith.addf %59, %61 : vector<64x128xf32>
    %cst_59 = arith.constant 0.000000e+00 : f32
    %63 = vector.broadcast %cst_59 : f32 to vector<64x128xf32>
    %64 = arith.maximumf %62, %63 : vector<64x128xf32>
    %65 = arith.truncf %64 : vector<64x128xf32> to vector<64x128xbf16>
    %66 = vector.shape_cast %65 : vector<64x128xbf16> to vector<8x8x128xbf16>
    %c2 = arith.constant 2 : index
    %c0_60 = arith.constant 0 : index
    %c1_61 = arith.constant 1 : index
    %c0_62 = arith.constant 0 : index
    %67 = vector.load %arg12[%c2, %c0_60, %c1_61, %c0_62] : memref<4x9x9x128xbf16, #tpu.memory_space<vmem>>, vector<1x8x8x128xbf16>
    %68 = vector.shape_cast %67 : vector<1x8x8x128xbf16> to vector<8x8x128xbf16>
    %69 = vector.shape_cast %66 : vector<8x8x128xbf16> to vector<1x8x8x128xbf16>
    tpu.vector_store %arg12[%c2, %c0_60, %c1_61, %c0_62], %69 {strides = array<i32>} : memref<4x9x9x128xbf16, #tpu.memory_space<vmem>>, vector<1x8x8x128xbf16>,
    %cst_63 = arith.constant 0.000000e+00 : bf16
    %70 = vector.broadcast %cst_63 : bf16 to vector<1x9x128xbf16>
    %c2_64 = arith.constant 2 : index
    %c8_65 = arith.constant 8 : index
    %c0_66 = arith.constant 0 : index
    %c0_67 = arith.constant 0 : index
    %71 = vector.load %arg12[%c2_64, %c8_65, %c0_66, %c0_67] : memref<4x9x9x128xbf16, #tpu.memory_space<vmem>>, vector<1x1x9x128xbf16>
    %72 = vector.shape_cast %71 : vector<1x1x9x128xbf16> to vector<1x9x128xbf16>
    %73 = vector.shape_cast %70 : vector<1x9x128xbf16> to vector<1x1x9x128xbf16>
    tpu.vector_store %arg12[%c2_64, %c8_65, %c0_66, %c0_67], %73 {strides = array<i32>} : memref<4x9x9x128xbf16, #tpu.memory_space<vmem>>, vector<1x1x9x128xbf16>,
    %cst_68 = arith.constant 0.000000e+00 : bf16
    %74 = vector.broadcast %cst_68 : bf16 to vector<9x1x128xbf16>
    %c2_69 = arith.constant 2 : index
    %c0_70 = arith.constant 0 : index
    %c0_71 = arith.constant 0 : index
    %c0_72 = arith.constant 0 : index
    %75 = vector.load %arg12[%c2_69, %c0_70, %c0_71, %c0_72] : memref<4x9x9x128xbf16, #tpu.memory_space<vmem>>, vector<1x9x1x128xbf16>
    %76 = vector.shape_cast %75 : vector<1x9x1x128xbf16> to vector<9x1x128xbf16>
    %77 = vector.shape_cast %74 : vector<9x1x128xbf16> to vector<1x9x1x128xbf16>
    tpu.vector_store %arg12[%c2_69, %c0_70, %c0_71, %c0_72], %77 {strides = array<i32>} : memref<4x9x9x128xbf16, #tpu.memory_space<vmem>>, vector<1x9x1x128xbf16>,
    %c0_73 = arith.constant 0 : index
    %c0_74 = arith.constant 0 : index
    %c0_75 = arith.constant 0 : index
    %c0_76 = arith.constant 0 : index
    %78 = vector.load %arg1[%c0_73, %c0_74, %c0_75, %c0_76] : memref<1x8x8x128xbf16, #tpu.memory_space<vmem>>, vector<1x8x8x128xbf16>
    %79 = vector.shape_cast %78 : vector<1x8x8x128xbf16> to vector<8x8x128xbf16>
    %80 = vector.shape_cast %79 : vector<8x8x128xbf16> to vector<64x128xbf16>
    %c0_77 = arith.constant 0 : index
    %c0_78 = arith.constant 0 : index
    %81 = vector.load %arg5[%c0_77, %c0_78] : memref<128x128xbf16, #tpu.memory_space<vmem>>, vector<128x128xbf16>
    %cst_79 = arith.constant dense<0.000000e+00> : vector<64x128xf32>
    %82 = tpu.matmul %80, %81, %cst_79 {dimension_numbers = #tpu.dot_dimension_numbers<[1], [0], [0], [1], [0, 0, 1, 1], [], []>} : vector<64x128xbf16>, vector<128x128xbf16>, vector<64x128xf32> -> vector<64x128xf32>
    %c0_80 = arith.constant 0 : index
    %c0_81 = arith.constant 0 : index
    %83 = vector.load %arg6[%c0_80, %c0_81] : memref<1x128xf32, #tpu.memory_space<vmem>>, vector<1x128xf32>
    %84 = vector.broadcast %83 : vector<1x128xf32> to vector<64x128xf32>
    %85 = arith.mulf %82, %84 : vector<64x128xf32>
    %c0_82 = arith.constant 0 : index
    %c0_83 = arith.constant 0 : index
    %86 = vector.load %arg7[%c0_82, %c0_83] : memref<1x128xf32, #tpu.memory_space<vmem>>, vector<1x128xf32>
    %87 = vector.broadcast %86 : vector<1x128xf32> to vector<64x128xf32>
    %88 = arith.addf %85, %87 : vector<64x128xf32>
    %cst_84 = arith.constant 0.000000e+00 : f32
    %89 = vector.broadcast %cst_84 : f32 to vector<64x128xf32>
    %90 = arith.maximumf %88, %89 : vector<64x128xf32>
    %91 = arith.truncf %90 : vector<64x128xf32> to vector<64x128xbf16>
    %92 = vector.shape_cast %91 : vector<64x128xbf16> to vector<8x8x128xbf16>
    %c3 = arith.constant 3 : index
    %c0_85 = arith.constant 0 : index
    %c0_86 = arith.constant 0 : index
    %c0_87 = arith.constant 0 : index
    %93 = vector.load %arg12[%c3, %c0_85, %c0_86, %c0_87] : memref<4x9x9x128xbf16, #tpu.memory_space<vmem>>, vector<1x8x8x128xbf16>
    %94 = vector.shape_cast %93 : vector<1x8x8x128xbf16> to vector<8x8x128xbf16>
    %95 = vector.shape_cast %92 : vector<8x8x128xbf16> to vector<1x8x8x128xbf16>
    tpu.vector_store %arg12[%c3, %c0_85, %c0_86, %c0_87], %95 {strides = array<i32>} : memref<4x9x9x128xbf16, #tpu.memory_space<vmem>>, vector<1x8x8x128xbf16>,
    %cst_88 = arith.constant 0.000000e+00 : bf16
    %96 = vector.broadcast %cst_88 : bf16 to vector<1x9x128xbf16>
    %c3_89 = arith.constant 3 : index
    %c8_90 = arith.constant 8 : index
    %c0_91 = arith.constant 0 : index
    %c0_92 = arith.constant 0 : index
    %97 = vector.load %arg12[%c3_89, %c8_90, %c0_91, %c0_92] : memref<4x9x9x128xbf16, #tpu.memory_space<vmem>>, vector<1x1x9x128xbf16>
    %98 = vector.shape_cast %97 : vector<1x1x9x128xbf16> to vector<1x9x128xbf16>
    %99 = vector.shape_cast %96 : vector<1x9x128xbf16> to vector<1x1x9x128xbf16>
    tpu.vector_store %arg12[%c3_89, %c8_90, %c0_91, %c0_92], %99 {strides = array<i32>} : memref<4x9x9x128xbf16, #tpu.memory_space<vmem>>, vector<1x1x9x128xbf16>,
    %cst_93 = arith.constant 0.000000e+00 : bf16
    %100 = vector.broadcast %cst_93 : bf16 to vector<9x1x128xbf16>
    %c3_94 = arith.constant 3 : index
    %c0_95 = arith.constant 0 : index
    %c8_96 = arith.constant 8 : index
    %c0_97 = arith.constant 0 : index
    %101 = vector.load %arg12[%c3_94, %c0_95, %c8_96, %c0_97] : memref<4x9x9x128xbf16, #tpu.memory_space<vmem>>, vector<1x9x1x128xbf16>
    %102 = vector.shape_cast %101 : vector<1x9x1x128xbf16> to vector<9x1x128xbf16>
    %103 = vector.shape_cast %100 : vector<9x1x128xbf16> to vector<1x9x1x128xbf16>
    tpu.vector_store %arg12[%c3_94, %c0_95, %c8_96, %c0_97], %103 {strides = array<i32>} : memref<4x9x9x128xbf16, #tpu.memory_space<vmem>>, vector<1x9x1x128xbf16>,
    %c0_98 = arith.constant 0 : index
    %c0_99 = arith.constant 0 : index
    %c0_100 = arith.constant 0 : index
    %c0_101 = arith.constant 0 : index
    %104 = vector.load %arg12[%c0_98, %c0_99, %c0_100, %c0_101] : memref<4x9x9x128xbf16, #tpu.memory_space<vmem>>, vector<1x9x8x128xbf16>
    %105 = vector.shape_cast %104 : vector<1x9x8x128xbf16> to vector<9x8x128xbf16>
    %106 = vector.shape_cast %105 : vector<9x8x128xbf16> to vector<72x128xbf16>
    %107 = vector.extract_strided_slice %106 {offsets = [0, 0], sizes = [64, 128], strides = [1, 1]} : vector<72x128xbf16> to vector<64x128xbf16>
    %c0_102 = arith.constant 0 : index
    %c0_103 = arith.constant 0 : index
    %108 = vector.load %arg8[%c0_102, %c0_103] : memref<1152x128xbf16, #tpu.memory_space<vmem>>, vector<128x128xbf16>
    %cst_104 = arith.constant dense<0.000000e+00> : vector<64x128xf32>
    %109 = tpu.matmul %107, %108, %cst_104 {dimension_numbers = #tpu.dot_dimension_numbers<[1], [0], [0], [1], [0, 0, 1, 1], [], []>} : vector<64x128xbf16>, vector<128x128xbf16>, vector<64x128xf32> -> vector<64x128xf32>
    %c0_105 = arith.constant 0 : index
    %c0_106 = arith.constant 0 : index
    %110 = vector.load %arg13[%c0_105, %c0_106] : memref<64x128xf32, #tpu.memory_space<vmem>>, vector<64x128xf32>
    tpu.vector_store %arg13[%c0_105, %c0_106], %109 {strides = array<i32>} : memref<64x128xf32, #tpu.memory_space<vmem>>, vector<64x128xf32>,
    %111 = vector.extract_strided_slice %106 {offsets = [8, 0], sizes = [64, 128], strides = [1, 1]} : vector<72x128xbf16> to vector<64x128xbf16>
    %c768 = arith.constant 768 : index
    %c0_107 = arith.constant 0 : index
    %112 = vector.load %arg8[%c768, %c0_107] : memref<1152x128xbf16, #tpu.memory_space<vmem>>, vector<128x128xbf16>
    %cst_108 = arith.constant dense<0.000000e+00> : vector<64x128xf32>
    %113 = tpu.matmul %111, %112, %cst_108 {dimension_numbers = #tpu.dot_dimension_numbers<[1], [0], [0], [1], [0, 0, 1, 1], [], []>} : vector<64x128xbf16>, vector<128x128xbf16>, vector<64x128xf32> -> vector<64x128xf32>
    %c0_109 = arith.constant 0 : index
    %c0_110 = arith.constant 0 : index
    %114 = vector.load %arg13[%c0_109, %c0_110] : memref<64x128xf32, #tpu.memory_space<vmem>>, vector<64x128xf32>
    %115 = arith.addf %114, %113 : vector<64x128xf32>
    %c0_111 = arith.constant 0 : index
    %c0_112 = arith.constant 0 : index
    %116 = vector.load %arg13[%c0_111, %c0_112] : memref<64x128xf32, #tpu.memory_space<vmem>>, vector<64x128xf32>
    tpu.vector_store %arg13[%c0_111, %c0_112], %115 {strides = array<i32>} : memref<64x128xf32, #tpu.memory_space<vmem>>, vector<64x128xf32>,
    %c2_113 = arith.constant 2 : index
    %c0_114 = arith.constant 0 : index
    %c0_115 = arith.constant 0 : index
    %c0_116 = arith.constant 0 : index
    %117 = vector.load %arg12[%c2_113, %c0_114, %c0_115, %c0_116] : memref<4x9x9x128xbf16, #tpu.memory_space<vmem>>, vector<1x9x8x128xbf16>
    %118 = vector.shape_cast %117 : vector<1x9x8x128xbf16> to vector<9x8x128xbf16>
    %119 = vector.shape_cast %118 : vector<9x8x128xbf16> to vector<72x128xbf16>
    %120 = vector.extract_strided_slice %119 {offsets = [0, 0], sizes = [64, 128], strides = [1, 1]} : vector<72x128xbf16> to vector<64x128xbf16>
    %c384 = arith.constant 384 : index
    %c0_117 = arith.constant 0 : index
    %121 = vector.load %arg8[%c384, %c0_117] : memref<1152x128xbf16, #tpu.memory_space<vmem>>, vector<128x128xbf16>
    %cst_118 = arith.constant dense<0.000000e+00> : vector<64x128xf32>
    %122 = tpu.matmul %120, %121, %cst_118 {dimension_numbers = #tpu.dot_dimension_numbers<[1], [0], [0], [1], [0, 0, 1, 1], [], []>} : vector<64x128xbf16>, vector<128x128xbf16>, vector<64x128xf32> -> vector<64x128xf32>
    %c0_119 = arith.constant 0 : index
    %c0_120 = arith.constant 0 : index
    %123 = vector.load %arg13[%c0_119, %c0_120] : memref<64x128xf32, #tpu.memory_space<vmem>>, vector<64x128xf32>
    %124 = arith.addf %123, %122 : vector<64x128xf32>
    %c0_121 = arith.constant 0 : index
    %c0_122 = arith.constant 0 : index
    %125 = vector.load %arg13[%c0_121, %c0_122] : memref<64x128xf32, #tpu.memory_space<vmem>>, vector<64x128xf32>
    tpu.vector_store %arg13[%c0_121, %c0_122], %124 {strides = array<i32>} : memref<64x128xf32, #tpu.memory_space<vmem>>, vector<64x128xf32>,
    %c1_123 = arith.constant 1 : index
    %c0_124 = arith.constant 0 : index
    %c0_125 = arith.constant 0 : index
    %c0_126 = arith.constant 0 : index
    %126 = vector.load %arg12[%c1_123, %c0_124, %c0_125, %c0_126] : memref<4x9x9x128xbf16, #tpu.memory_space<vmem>>, vector<1x9x8x128xbf16>
    %127 = vector.shape_cast %126 : vector<1x9x8x128xbf16> to vector<9x8x128xbf16>
    %128 = vector.shape_cast %127 : vector<9x8x128xbf16> to vector<72x128xbf16>
    %129 = vector.extract_strided_slice %128 {offsets = [0, 0], sizes = [64, 128], strides = [1, 1]} : vector<72x128xbf16> to vector<64x128xbf16>
    %c128 = arith.constant 128 : index
    %c0_127 = arith.constant 0 : index
    %130 = vector.load %arg8[%c128, %c0_127] : memref<1152x128xbf16, #tpu.memory_space<vmem>>, vector<128x128xbf16>
    %cst_128 = arith.constant dense<0.000000e+00> : vector<64x128xf32>
    %131 = tpu.matmul %129, %130, %cst_128 {dimension_numbers = #tpu.dot_dimension_numbers<[1], [0], [0], [1], [0, 0, 1, 1], [], []>} : vector<64x128xbf16>, vector<128x128xbf16>, vector<64x128xf32> -> vector<64x128xf32>
    %c0_129 = arith.constant 0 : index
    %c0_130 = arith.constant 0 : index
    %132 = vector.load %arg13[%c0_129, %c0_130] : memref<64x128xf32, #tpu.memory_space<vmem>>, vector<64x128xf32>
    %133 = arith.addf %132, %131 : vector<64x128xf32>
    %c0_131 = arith.constant 0 : index
    %c0_132 = arith.constant 0 : index
    %134 = vector.load %arg13[%c0_131, %c0_132] : memref<64x128xf32, #tpu.memory_space<vmem>>, vector<64x128xf32>
    tpu.vector_store %arg13[%c0_131, %c0_132], %133 {strides = array<i32>} : memref<64x128xf32, #tpu.memory_space<vmem>>, vector<64x128xf32>,
    %135 = vector.extract_strided_slice %128 {offsets = [8, 0], sizes = [64, 128], strides = [1, 1]} : vector<72x128xbf16> to vector<64x128xbf16>
    %c896 = arith.constant 896 : index
    %c0_133 = arith.constant 0 : index
    %136 = vector.load %arg8[%c896, %c0_133] : memref<1152x128xbf16, #tpu.memory_space<vmem>>, vector<128x128xbf16>
    %cst_134 = arith.constant dense<0.000000e+00> : vector<64x128xf32>
    %137 = tpu.matmul %135, %136, %cst_134 {dimension_numbers = #tpu.dot_dimension_numbers<[1], [0], [0], [1], [0, 0, 1, 1], [], []>} : vector<64x128xbf16>, vector<128x128xbf16>, vector<64x128xf32> -> vector<64x128xf32>
    %c0_135 = arith.constant 0 : index
    %c0_136 = arith.constant 0 : index
    %138 = vector.load %arg13[%c0_135, %c0_136] : memref<64x128xf32, #tpu.memory_space<vmem>>, vector<64x128xf32>
    %139 = arith.addf %138, %137 : vector<64x128xf32>
    %c0_137 = arith.constant 0 : index
    %c0_138 = arith.constant 0 : index
    %140 = vector.load %arg13[%c0_137, %c0_138] : memref<64x128xf32, #tpu.memory_space<vmem>>, vector<64x128xf32>
    tpu.vector_store %arg13[%c0_137, %c0_138], %139 {strides = array<i32>} : memref<64x128xf32, #tpu.memory_space<vmem>>, vector<64x128xf32>,
    %c3_139 = arith.constant 3 : index
    %c0_140 = arith.constant 0 : index
    %c0_141 = arith.constant 0 : index
    %c0_142 = arith.constant 0 : index
    %141 = vector.load %arg12[%c3_139, %c0_140, %c0_141, %c0_142] : memref<4x9x9x128xbf16, #tpu.memory_space<vmem>>, vector<1x9x8x128xbf16>
    %142 = vector.shape_cast %141 : vector<1x9x8x128xbf16> to vector<9x8x128xbf16>
    %143 = vector.shape_cast %142 : vector<9x8x128xbf16> to vector<72x128xbf16>
    %144 = vector.extract_strided_slice %143 {offsets = [0, 0], sizes = [64, 128], strides = [1, 1]} : vector<72x128xbf16> to vector<64x128xbf16>
    %c512 = arith.constant 512 : index
    %c0_143 = arith.constant 0 : index
    %145 = vector.load %arg8[%c512, %c0_143] : memref<1152x128xbf16, #tpu.memory_space<vmem>>, vector<128x128xbf16>
    %cst_144 = arith.constant dense<0.000000e+00> : vector<64x128xf32>
    %146 = tpu.matmul %144, %145, %cst_144 {dimension_numbers = #tpu.dot_dimension_numbers<[1], [0], [0], [1], [0, 0, 1, 1], [], []>} : vector<64x128xbf16>, vector<128x128xbf16>, vector<64x128xf32> -> vector<64x128xf32>
    %c0_145 = arith.constant 0 : index
    %c0_146 = arith.constant 0 : index
    %147 = vector.load %arg13[%c0_145, %c0_146] : memref<64x128xf32, #tpu.memory_space<vmem>>, vector<64x128xf32>
    %148 = arith.addf %147, %146 : vector<64x128xf32>
    %c0_147 = arith.constant 0 : index
    %c0_148 = arith.constant 0 : index
    %149 = vector.load %arg13[%c0_147, %c0_148] : memref<64x128xf32, #tpu.memory_space<vmem>>, vector<64x128xf32>
    tpu.vector_store %arg13[%c0_147, %c0_148], %148 {strides = array<i32>} : memref<64x128xf32, #tpu.memory_space<vmem>>, vector<64x128xf32>,
    %c0_149 = arith.constant 0 : index
    %c0_150 = arith.constant 0 : index
    %c1_151 = arith.constant 1 : index
    %c0_152 = arith.constant 0 : index
    %150 = vector.load %arg12[%c0_149, %c0_150, %c1_151, %c0_152] : memref<4x9x9x128xbf16, #tpu.memory_space<vmem>>, vector<1x9x8x128xbf16>
    %151 = vector.shape_cast %150 : vector<1x9x8x128xbf16> to vector<9x8x128xbf16>
    %152 = vector.shape_cast %151 : vector<9x8x128xbf16> to vector<72x128xbf16>
    %153 = vector.extract_strided_slice %152 {offsets = [0, 0], sizes = [64, 128], strides = [1, 1]} : vector<72x128xbf16> to vector<64x128xbf16>
    %c256 = arith.constant 256 : index
    %c0_153 = arith.constant 0 : index
    %154 = vector.load %arg8[%c256, %c0_153] : memref<1152x128xbf16, #tpu.memory_space<vmem>>, vector<128x128xbf16>
    %cst_154 = arith.constant dense<0.000000e+00> : vector<64x128xf32>
    %155 = tpu.matmul %153, %154, %cst_154 {dimension_numbers = #tpu.dot_dimension_numbers<[1], [0], [0], [1], [0, 0, 1, 1], [], []>} : vector<64x128xbf16>, vector<128x128xbf16>, vector<64x128xf32> -> vector<64x128xf32>
    %c0_155 = arith.constant 0 : index
    %c0_156 = arith.constant 0 : index
    %156 = vector.load %arg13[%c0_155, %c0_156] : memref<64x128xf32, #tpu.memory_space<vmem>>, vector<64x128xf32>
    %157 = arith.addf %156, %155 : vector<64x128xf32>
    %c0_157 = arith.constant 0 : index
    %c0_158 = arith.constant 0 : index
    %158 = vector.load %arg13[%c0_157, %c0_158] : memref<64x128xf32, #tpu.memory_space<vmem>>, vector<64x128xf32>
    tpu.vector_store %arg13[%c0_157, %c0_158], %157 {strides = array<i32>} : memref<64x128xf32, #tpu.memory_space<vmem>>, vector<64x128xf32>,
    %159 = vector.extract_strided_slice %152 {offsets = [8, 0], sizes = [64, 128], strides = [1, 1]} : vector<72x128xbf16> to vector<64x128xbf16>
    %c1024 = arith.constant 1024 : index
    %c0_159 = arith.constant 0 : index
    %160 = vector.load %arg8[%c1024, %c0_159] : memref<1152x128xbf16, #tpu.memory_space<vmem>>, vector<128x128xbf16>
    %cst_160 = arith.constant dense<0.000000e+00> : vector<64x128xf32>
    %161 = tpu.matmul %159, %160, %cst_160 {dimension_numbers = #tpu.dot_dimension_numbers<[1], [0], [0], [1], [0, 0, 1, 1], [], []>} : vector<64x128xbf16>, vector<128x128xbf16>, vector<64x128xf32> -> vector<64x128xf32>
    %c0_161 = arith.constant 0 : index
    %c0_162 = arith.constant 0 : index
    %162 = vector.load %arg13[%c0_161, %c0_162] : memref<64x128xf32, #tpu.memory_space<vmem>>, vector<64x128xf32>
    %163 = arith.addf %162, %161 : vector<64x128xf32>
    %c0_163 = arith.constant 0 : index
    %c0_164 = arith.constant 0 : index
    %164 = vector.load %arg13[%c0_163, %c0_164] : memref<64x128xf32, #tpu.memory_space<vmem>>, vector<64x128xf32>
    tpu.vector_store %arg13[%c0_163, %c0_164], %163 {strides = array<i32>} : memref<64x128xf32, #tpu.memory_space<vmem>>, vector<64x128xf32>,
    %c2_165 = arith.constant 2 : index
    %c0_166 = arith.constant 0 : index
    %c1_167 = arith.constant 1 : index
    %c0_168 = arith.constant 0 : index
    %165 = vector.load %arg12[%c2_165, %c0_166, %c1_167, %c0_168] : memref<4x9x9x128xbf16, #tpu.memory_space<vmem>>, vector<1x9x8x128xbf16>
    %166 = vector.shape_cast %165 : vector<1x9x8x128xbf16> to vector<9x8x128xbf16>
    %167 = vector.shape_cast %166 : vector<9x8x128xbf16> to vector<72x128xbf16>
    %168 = vector.extract_strided_slice %167 {offsets = [0, 0], sizes = [64, 128], strides = [1, 1]} : vector<72x128xbf16> to vector<64x128xbf16>
    %c640 = arith.constant 640 : index
    %c0_169 = arith.constant 0 : index
    %169 = vector.load %arg8[%c640, %c0_169] : memref<1152x128xbf16, #tpu.memory_space<vmem>>, vector<128x128xbf16>
    %cst_170 = arith.constant dense<0.000000e+00> : vector<64x128xf32>
    %170 = tpu.matmul %168, %169, %cst_170 {dimension_numbers = #tpu.dot_dimension_numbers<[1], [0], [0], [1], [0, 0, 1, 1], [], []>} : vector<64x128xbf16>, vector<128x128xbf16>, vector<64x128xf32> -> vector<64x128xf32>
    %c0_171 = arith.constant 0 : index
    %c0_172 = arith.constant 0 : index
    %171 = vector.load %arg13[%c0_171, %c0_172] : memref<64x128xf32, #tpu.memory_space<vmem>>, vector<64x128xf32>
    %172 = arith.addf %171, %170 : vector<64x128xf32>
    %c0_173 = arith.constant 0 : index
    %c0_174 = arith.constant 0 : index
    %173 = vector.load %arg13[%c0_173, %c0_174] : memref<64x128xf32, #tpu.memory_space<vmem>>, vector<64x128xf32>
    tpu.vector_store %arg13[%c0_173, %c0_174], %172 {strides = array<i32>} : memref<64x128xf32, #tpu.memory_space<vmem>>, vector<64x128xf32>,
    %c0_175 = arith.constant 0 : index
    %c0_176 = arith.constant 0 : index
    %174 = vector.load %arg13[%c0_175, %c0_176] : memref<64x128xf32, #tpu.memory_space<vmem>>, vector<64x128xf32>
    %c0_177 = arith.constant 0 : index
    %c0_178 = arith.constant 0 : index
    %175 = vector.load %arg9[%c0_177, %c0_178] : memref<1x128xf32, #tpu.memory_space<vmem>>, vector<1x128xf32>
    %176 = vector.broadcast %175 : vector<1x128xf32> to vector<64x128xf32>
    %177 = arith.mulf %174, %176 : vector<64x128xf32>
    %c0_179 = arith.constant 0 : index
    %c0_180 = arith.constant 0 : index
    %178 = vector.load %arg10[%c0_179, %c0_180] : memref<1x128xf32, #tpu.memory_space<vmem>>, vector<1x128xf32>
    %179 = vector.broadcast %178 : vector<1x128xf32> to vector<64x128xf32>
    %180 = arith.addf %177, %179 : vector<64x128xf32>
    %cst_181 = arith.constant 0.000000e+00 : f32
    %181 = vector.broadcast %cst_181 : f32 to vector<64x128xf32>
    %182 = arith.maximumf %180, %181 : vector<64x128xf32>
    %183 = arith.truncf %182 : vector<64x128xf32> to vector<64x128xbf16>
    %c0_182 = arith.constant 0 : index
    %c0_183 = arith.constant 0 : index
    %c0_184 = arith.constant 0 : index
    %184 = vector.load %arg11[%c0_182, %c0_183, %c0_184] : memref<1x64x128xbf16, #tpu.memory_space<vmem>>, vector<1x64x128xbf16>
    %185 = vector.shape_cast %184 : vector<1x64x128xbf16> to vector<64x128xbf16>
    %186 = vector.shape_cast %183 : vector<64x128xbf16> to vector<1x64x128xbf16>
    tpu.vector_store %arg11[%c0_182, %c0_183, %c0_184], %186 {strides = array<i32>} : memref<1x64x128xbf16, #tpu.memory_space<vmem>>, vector<1x64x128xbf16>,
    return
  }
  func.func @transform_0(%arg0: i32) -> (i32, i32, i32, i32) {
    %c0_i32 = arith.constant 0 : i32
    %c0_i32_0 = arith.constant 0 : i32
    %c0_i32_1 = arith.constant 0 : i32
    %c0_i32_2 = arith.constant 0 : i32
    return %arg0, %c0_i32, %c0_i32_0, %c0_i32_1 : i32, i32, i32, i32
  }
  func.func @transform_1(%arg0: i32) -> (i32, i32, i32, i32) {
    %c0_i32 = arith.constant 0 : i32
    %c0_i32_0 = arith.constant 0 : i32
    %c0_i32_1 = arith.constant 0 : i32
    %c0_i32_2 = arith.constant 0 : i32
    return %arg0, %c0_i32, %c0_i32_0, %c0_i32_1 : i32, i32, i32, i32
  }
  func.func @transform_2(%arg0: i32) -> (i32, i32, i32, i32) {
    %c0_i32 = arith.constant 0 : i32
    %c0_i32_0 = arith.constant 0 : i32
    %c0_i32_1 = arith.constant 0 : i32
    %c0_i32_2 = arith.constant 0 : i32
    return %arg0, %c0_i32, %c0_i32_0, %c0_i32_1 : i32, i32, i32, i32
  }
  func.func @transform_3(%arg0: i32) -> (i32, i32, i32, i32) {
    %c0_i32 = arith.constant 0 : i32
    %c0_i32_0 = arith.constant 0 : i32
    %c0_i32_1 = arith.constant 0 : i32
    %c0_i32_2 = arith.constant 0 : i32
    return %arg0, %c0_i32, %c0_i32_0, %c0_i32_1 : i32, i32, i32, i32
  }
  func.func @transform_4(%arg0: i32) -> (i32, i32) {
    %c0_i32 = arith.constant 0 : i32
    %c0_i32_0 = arith.constant 0 : i32
    %c0_i32_1 = arith.constant 0 : i32
    return %c0_i32, %c0_i32_0 : i32, i32
  }
  func.func @transform_5(%arg0: i32) -> (i32, i32) {
    %c0_i32 = arith.constant 0 : i32
    %c0_i32_0 = arith.constant 0 : i32
    %c0_i32_1 = arith.constant 0 : i32
    return %c0_i32, %c0_i32_0 : i32, i32
  }
  func.func @transform_6(%arg0: i32) -> (i32, i32) {
    %c0_i32 = arith.constant 0 : i32
    %c0_i32_0 = arith.constant 0 : i32
    %c0_i32_1 = arith.constant 0 : i32
    return %c0_i32, %c0_i32_0 : i32, i32
  }
  func.func @transform_7(%arg0: i32) -> (i32, i32) {
    %c0_i32 = arith.constant 0 : i32
    %c0_i32_0 = arith.constant 0 : i32
    %c0_i32_1 = arith.constant 0 : i32
    return %c0_i32, %c0_i32_0 : i32, i32
  }
  func.func @transform_8(%arg0: i32) -> (i32, i32) {
    %c0_i32 = arith.constant 0 : i32
    %c0_i32_0 = arith.constant 0 : i32
    %c0_i32_1 = arith.constant 0 : i32
    return %c0_i32, %c0_i32_0 : i32, i32
  }
  func.func @transform_9(%arg0: i32) -> (i32, i32) {
    %c0_i32 = arith.constant 0 : i32
    %c0_i32_0 = arith.constant 0 : i32
    %c0_i32_1 = arith.constant 0 : i32
    return %c0_i32, %c0_i32_0 : i32, i32
  }
  func.func @transform_10(%arg0: i32) -> (i32, i32, i32) {
    %c0_i32 = arith.constant 0 : i32
    %c0_i32_0 = arith.constant 0 : i32
    %c0_i32_1 = arith.constant 0 : i32
    return %arg0, %c0_i32, %c0_i32_0 : i32, i32, i32
  }
}

</mosaic_0001>

<bundles_post_ra>
// kernel: bottleneck_forward.3
= control target key start
LH: loop header
LB: loop body
LE: loop exit
PB: predicated region body
PF: predicated region fallthrough
CT: control target
= control target key end

     0   :  { %s1068_s0 = inlined_call_operand.vmem [shape: bf16[128,128], index: 0, kind: input, shape index: {}]   ;;  %s1069_s1 = inlined_call_operand.vmem [shape: bf16[128,128], index: 1, kind: input, shape index: {}]   ;;  %s1070_s2 = inlined_call_operand.vmem [shape: f32[1,128], index: 2, kind: input, shape index: {}]   ;;  %s1071_s3 = inlined_call_operand.vmem [shape: f32[1,128], index: 3, kind: input, shape index: {}]   ;;  %s1072_s4 = inlined_call_operand.vmem [shape: bf16[128,128], index: 4, kind: input, shape index: {}]   ;;  %s1073_s5 = inlined_call_operand.vmem [shape: bf16[128,128], index: 5, kind: input, shape index: {}]   ;;  %s1074_s6 = inlined_call_operand.vmem [shape: f32[1,128], index: 6, kind: input, shape index: {}]   ;;  %s1075_s7 = inlined_call_operand.vmem [shape: f32[1,128], index: 7, kind: input, shape index: {}]   ;;  %s1076_s8 = inlined_call_operand.hbm [shape: f32[128,128], index: 8, kind: output, shape index: {}]  }
   0x1   :  { %v772_v0 = vld [vmem:[%s1069_s1] sm:$0xff]   ;;  %v774_v2 = vld [vmem:[%s1069_s1 + $0x8] sm:$0xff]   ;;  %v776_v4 = vld [vmem:[%s1069_s1 + $0x10] sm:$0xff]  }
   0x2   :  { %v773_v1 = vld [vmem:[%s1073_s5] sm:$0xff]   ;;  %705 = vmatprep.subr.bf16.mxu0 %v772_v0  ;;  %v775_v3 = vld [vmem:[%s1073_s5 + $0x8] sm:$0xff]   ;;  %v777_v5 = vld [vmem:[%s1073_s5 + $0x10] sm:$0xff]  }
   0x3   :  { %737 = vmatprep.subr.bf16.mxu1 %v773_v1  ;;  %706 = vmatpush3.bf16.msra.mxu0 %v772_v0  ;;  %v778_v6 = vld [vmem:[%s1069_s1 + $0x18] sm:$0xff]   ;;  %v780_v8 = vld [vmem:[%s1069_s1 + $0x20] sm:$0xff]   ;;  %v782_v10 = vld [vmem:[%s1069_s1 + $0x28] sm:$0xff]  }
   0x4   :  { %738 = vmatpush3.bf16.msra.mxu1 %v773_v1  ;;  %707 = vmatprep.subr.bf16.mxu0 %v774_v2  ;;  %v779_v7 = vld [vmem:[%s1073_s5 + $0x18] sm:$0xff]   ;;  %v781_v9 = vld [vmem:[%s1073_s5 + $0x20] sm:$0xff]   ;;  %v783_v11 = vld [vmem:[%s1073_s5 + $0x28] sm:$0xff]  }
   0x5   :  { %739 = vmatprep.subr.bf16.mxu1 %v775_v3  ;;  %v788_v12 = vld [vmem:[%s1068_s0] sm:$0xff]   ;;  %v784_v14 = vld [vmem:[%s1069_s1 + $0x30] sm:$0xff]   ;;  %v786_v16 = vld [vmem:[%s1069_s1 + $0x38] sm:$0xff]  }
   0x6   :  { %v789_v13 = vld [vmem:[%s1072_s4] sm:$0xff]   ;;  %721 = vmatprep.mubr.bf16.mxu0 %v788_v12  ;;  %v785_v15 = vld [vmem:[%s1073_s5 + $0x30] sm:$0xff]   ;;  %v787_v17 = vld [vmem:[%s1073_s5 + $0x38] sm:$0xff]  }
   0x7   :  { %708 = vmatpush3.bf16.msra.mxu0 %v774_v2  ;;  %753 = vmatprep.mubr.bf16.mxu1 %v789_v13  ;;  %v790_v18 = vld [vmem:[%s1068_s0 + $0x8] sm:$0xff]   ;;  %v792_v20 = vld [vmem:[%s1068_s0 + $0x10] sm:$0xff]  }
   0x8   :  { %740 = vmatpush3.bf16.msra.mxu1 %v775_v3  ;;  %709 = vmatprep.subr.bf16.mxu0 %v776_v4  ;;  %v791_v19 = vld [vmem:[%s1072_s4 + $0x8] sm:$0xff]   ;;  %v793_v21 = vld [vmem:[%s1072_s4 + $0x10] sm:$0xff]  }
   0x9   :  { %741 = vmatprep.subr.bf16.mxu1 %v777_v5 }
   0xb   :  { %710 = vmatpush3.bf16.msra.mxu0 %v776_v4 }
   0xc   :  { %742 = vmatpush3.bf16.msra.mxu1 %v777_v5  ;;  %711 = vmatprep.subr.bf16.mxu0 %v778_v6 }
   0xd   :  { %743 = vmatprep.subr.bf16.mxu1 %v779_v7 }
   0xf   :  { %712 = vmatpush3.bf16.msra.mxu0 %v778_v6 }
  0x10   :  { %744 = vmatpush3.bf16.msra.mxu1 %v779_v7  ;;  %713 = vmatprep.subr.bf16.mxu0 %v780_v8 }
  0x11   :  { %745 = vmatprep.subr.bf16.mxu1 %v781_v9 }
  0x13   :  { %714 = vmatpush3.bf16.msra.mxu0 %v780_v8 }
  0x14   :  { %746 = vmatpush3.bf16.msra.mxu1 %v781_v9  ;;  %715 = vmatprep.subr.bf16.mxu0 %v782_v10 }
  0x15   :  { %747 = vmatprep.subr.bf16.mxu1 %v783_v11 }
  0x17   :  { %716 = vmatpush3.bf16.msra.mxu0 %v782_v10 }
  0x18   :  { %748 = vmatpush3.bf16.msra.mxu1 %v783_v11  ;;  %717 = vmatprep.subr.bf16.mxu0 %v784_v14 }
  0x19   :  { %749 = vmatprep.subr.bf16.mxu1 %v785_v15 }
  0x1b   :  { %718 = vmatpush3.bf16.msra.mxu0 %v784_v14 }
  0x1c   :  { %750 = vmatpush3.bf16.msra.mxu1 %v785_v15  ;;  %719 = vmatprep.subr.bf16.mxu0 %v786_v16 }
  0x1d   :  { %751 = vmatprep.subr.bf16.mxu1 %v787_v17 }
  0x1f   :  { %720 = vmatpush3.bf16.msra.mxu0 %v786_v16 }
  0x20   :  { %752 = vmatpush3.bf16.msra.mxu1 %v787_v17 }
  0x21   :  { %13 = vsyncpa [#allocation3], 0  ;;  %v794_v22 = vld [vmem:[%s1068_s0 + $0x18] sm:$0xff]   ;;  %v796_v24 = vld [vmem:[%s1068_s0 + $0x20] sm:$0xff]  }
  0x22   :  { %722 = vmatmul.mubr.bf16.vlgmr.msra.gmra.mrb[0].mxu0 %v790_v18  ;;  %v795_v23 = vld [vmem:[%s1072_s4 + $0x18] sm:$0xff]   ;;  %v797_v25 = vld [vmem:[%s1072_s4 + $0x20] sm:$0xff]   ;;  %v798_v26 = vld [vmem:[%s1068_s0 + $0x28] sm:$0xff]  }
  0x23   :  { %754 = vmatmul.mubr.bf16.vlgmr.msra.gmra.mrb[0].mxu1 %v791_v19  ;;  %725 = vmatprep.mubr.bf16.mxu0 %v792_v20  ;;  %v799_v27 = vld [vmem:[%s1072_s4 + $0x28] sm:$0xff]   ;;  %v800_v28 = vld [vmem:[%s1068_s0 + $0x30] sm:$0xff]   ;;  %v802_v30 = vld [vmem:[%s1068_s0 + $0x38] sm:$0xff]  }
  0x24   :  { %757 = vmatprep.mubr.bf16.mxu1 %v793_v21  ;;  %v801_v29 = vld [vmem:[%s1072_s4 + $0x30] sm:$0xff]   ;;  %v803_v31 = vld [vmem:[%s1072_s4 + $0x38] sm:$0xff]   ;;  %v975_v32 = vld [vmem:[%s1070_s2] ss:$0 sm:$0xff] }
  0x25   :  { %v980_v33 = vld [vmem:[%s1074_s6] ss:$0 sm:$0xff] }
  0x26   :  { %v985_v35 = vld [vmem:[%s1071_s3] ss:$0 sm:$0xff]  ;;  %s828_s3 = smov [#allocation2]  }
  0x27   :  { %v996_v48 = vld [vmem:[%s1075_s7] ss:$0 sm:$0xff]  ;;  %s626_s4 = sshll.u32 %s828_s3, 4  ;;  %s627_s4 = int_to_ptr.vmem [resolvable:$true] %s626_s4 }
  0x28   :  { %s804_s6 = scalar_lea.vmem %s627_s4, 2048  ;;  %p809_p1 = scmp.lt.s32.totalorder %s627_s4, %s627_s4 }
  0x29   :  { %p805_p0 = scmp.ne.s32.totalorder %s627_s4, %s804_s6  ;;  %p810_p2 = scmp.lt.s32.totalorder %s804_s6, %s804_s6 }
  0x2a   :  { %726 = vmatmul.mubr.bf16.gmra.mrb[4].mxu0 %v794_v22 }
  0x2b   :  { %758 = vmatmul.mubr.bf16.gmra.mrb[4].mxu1 %v795_v23  ;;  %729 = vmatprep.mubr.bf16.mxu0 %v796_v24  ;;  %p811_p3 = por %p810_p2, %p809_p1 }
  0x2c   :  { %761 = vmatprep.mubr.bf16.mxu1 %v797_v25 }
  0x2d   :  { %p812_p4 = pnand %p811_p3, %p805_p0 }
  0x32   :  { %730 = vmatmul.mubr.bf16.gmra.mrb[8].mxu0 %v798_v26 }
  0x33   :  { %762 = vmatmul.mubr.bf16.gmra.mrb[8].mxu1 %v799_v27  ;;  %733 = vmatprep.mubr.bf16.mxu0 %v800_v28 }
  0x34   :  { %765 = vmatprep.mubr.bf16.mxu1 %v801_v29 }
  0x3a   :  { %734 = vmatmul.mubr.bf16.gmra.mrb[12].mxu0 %v802_v30 }
  0x3b   :  { %766 = vmatmul.mubr.bf16.gmra.mrb[12].mxu1 %v803_v31 }
  0xf5   :  { %v723_v34 = vpop.f32.mrb[0].mxu0 }
  0xf6   :  { %v265_v36 = vmul.f32 %v723_v34, %v975_v32  ;;  %v755_v37 = vpop.f32.mrb[0].mxu1  ;;  %v193_v38 = vpop.f32.mrb[1].mxu0 }
  0xf7   :  { %v536_v39 = vmul.f32 %v755_v37, %v980_v33  ;;  %v263_v40 = vmul.f32 %v975_v32, %v193_v38  ;;  %v464_v41 = vpop.f32.mrb[1].mxu1  ;;  %v724_v42 = vpop.f32.mrb[2].mxu0 }
  0xf8   :  { %v288_v43 = vadd.f32 %v985_v35, %v265_v36  ;;  %v534_v44 = vmul.f32 %v980_v33, %v464_v41  ;;  %v266_v45 = vmul.f32 %v724_v42, %v975_v32  ;;  %v756_v46 = vpop.f32.mrb[2].mxu1  ;;  %v196_v47 = vpop.f32.mrb[3].mxu0 }
  0xf9   :  { %v286_v49 = vadd.f32 %v985_v35, %v263_v40  ;;  %v264_v50 = vmul.f32 %v975_v32, %v196_v47  ;;  %v467_v51 = vpop.f32.mrb[3].mxu1  ;;  %v537_v54 = vmul.f32 %v756_v46, %v980_v33 }
  0xfa   :  { %v552_v52 = vadd.f32 %v536_v39, %v288_v43  ;;  %v289_v53 = vadd.f32 %v985_v35, %v266_v45  ;;  %v535_v57 = vmul.f32 %v980_v33, %v467_v51 }
  0xfb   :  { %v550_v55 = vadd.f32 %v534_v44, %v286_v49  ;;  %v287_v56 = vadd.f32 %v985_v35, %v264_v50 }
  0xfc   :  { %v575_v58 = vadd.f32 %v996_v48, %v552_v52  ;;  %v553_v59 = vadd.f32 %v537_v54, %v289_v53 }
  0xfd   :  { %v573_v60 = vadd.f32 %v996_v48, %v550_v55  ;;  %v551_v61 = vadd.f32 %v535_v57, %v287_v56  ;;  %v727_v62 = vpop.f32.mrb[4].mxu0 }
  0xfe   :  { %v591_v63 = vmax.f32 %v575_v58, 0.0  ;;  %v576_v0 = vadd.f32 %v996_v48, %v553_v59  ;;  %v269_v1 = vmul.f32 %v727_v62, %v975_v32  ;;  %v759_v2 = vpop.f32.mrb[4].mxu1  ;;  %v209_v3 = vpop.f32.mrb[5].mxu0 }
  0xff   :  { %v589_v4 = vmax.f32 %v573_v60, 0.0  ;;  %v574_v5 = vadd.f32 %v996_v48, %v551_v61  ;;  %v540_v6 = vmul.f32 %v759_v2, %v980_v33  ;;  %v267_v7 = vmul.f32 %v975_v32, %v209_v3  ;;  %v480_v8 = vpop.f32.mrb[5].mxu1  ;;  %v728_v9 = vpop.f32.mrb[6].mxu0 }
 0x100   :  { %607 = vst [vmem:[#allocation2 + $0x10] sm:$0xff] %v591_v63  ;;  %v592_v10 = vmax.f32 %v576_v0, 0.0  ;;  %v292_v11 = vadd.f32 %v985_v35, %v269_v1  ;;  %v538_v12 = vmul.f32 %v980_v33, %v480_v8  ;;  %v270_v13 = vmul.f32 %v728_v9, %v975_v32  ;;  %v760_v14 = vpop.f32.mrb[6].mxu1  ;;  %v212_v15 = vpop.f32.mrb[7].mxu0 }
 0x101   :  { %605 = vst [vmem:[#allocation2] sm:$0xff] %v589_v4  ;;  %v590_v16 = vmax.f32 %v574_v5, 0.0  ;;  %v290_v17 = vadd.f32 %v985_v35, %v267_v7  ;;  %v268_v18 = vmul.f32 %v975_v32, %v212_v15  ;;  %v483_v19 = vpop.f32.mrb[7].mxu1  ;;  %v541_v22 = vmul.f32 %v760_v14, %v980_v33 }
 0x102   :  { %608 = vst [vmem:[#allocation2 + $0x18] sm:$0xff] %v592_v10  ;;  %v556_v20 = vadd.f32 %v540_v6, %v292_v11  ;;  %v293_v21 = vadd.f32 %v985_v35, %v270_v13  ;;  %v539_v25 = vmul.f32 %v980_v33, %v483_v19 }
 0x103   :  { %606 = vst [vmem:[#allocation2 + $0x8] sm:$0xff] %v590_v16  ;;  %v554_v23 = vadd.f32 %v538_v12, %v290_v17  ;;  %v291_v24 = vadd.f32 %v985_v35, %v268_v18 }
 0x104   :  { %v579_v26 = vadd.f32 %v996_v48, %v556_v20  ;;  %v557_v27 = vadd.f32 %v541_v22, %v293_v21 }
 0x105   :  { %v577_v28 = vadd.f32 %v996_v48, %v554_v23  ;;  %v555_v29 = vadd.f32 %v539_v25, %v291_v24  ;;  %v731_v30 = vpop.f32.mrb[8].mxu0 }
 0x106   :  { %v595_v31 = vmax.f32 %v579_v26, 0.0  ;;  %v580_v34 = vadd.f32 %v996_v48, %v557_v27  ;;  %v273_v36 = vmul.f32 %v731_v30, %v975_v32  ;;  %v763_v37 = vpop.f32.mrb[8].mxu1  ;;  %v225_v38 = vpop.f32.mrb[9].mxu0 }
 0x107   :  { %v593_v39 = vmax.f32 %v577_v28, 0.0  ;;  %v578_v40 = vadd.f32 %v996_v48, %v555_v29  ;;  %v544_v41 = vmul.f32 %v763_v37, %v980_v33  ;;  %v271_v42 = vmul.f32 %v975_v32, %v225_v38  ;;  %v496_v43 = vpop.f32.mrb[9].mxu1  ;;  %v732_v44 = vpop.f32.mrb[10].mxu0 }
 0x108   :  { %611 = vst [vmem:[#allocation2 + $0x30] sm:$0xff] %v595_v31  ;;  %v596_v45 = vmax.f32 %v580_v34, 0.0  ;;  %v296_v46 = vadd.f32 %v985_v35, %v273_v36  ;;  %v542_v47 = vmul.f32 %v980_v33, %v496_v43  ;;  %v274_v49 = vmul.f32 %v732_v44, %v975_v32  ;;  %v764_v50 = vpop.f32.mrb[10].mxu1  ;;  %v228_v51 = vpop.f32.mrb[11].mxu0 }
 0x109   :  { %609 = vst [vmem:[#allocation2 + $0x20] sm:$0xff] %v593_v39  ;;  %v594_v52 = vmax.f32 %v578_v40, 0.0  ;;  %v294_v53 = vadd.f32 %v985_v35, %v271_v42  ;;  %v272_v54 = vmul.f32 %v975_v32, %v228_v51  ;;  %v499_v55 = vpop.f32.mrb[11].mxu1  ;;  %v545_v58 = vmul.f32 %v764_v50, %v980_v33 }
 0x10a   :  { %612 = vst [vmem:[#allocation2 + $0x38] sm:$0xff] %v596_v45  ;;  %v560_v56 = vadd.f32 %v544_v41, %v296_v46  ;;  %v297_v57 = vadd.f32 %v985_v35, %v274_v49  ;;  %v543_v61 = vmul.f32 %v980_v33, %v499_v55 }
 0x10b   :  { %610 = vst [vmem:[#allocation2 + $0x28] sm:$0xff] %v594_v52  ;;  %v558_v59 = vadd.f32 %v542_v47, %v294_v53  ;;  %v295_v60 = vadd.f32 %v985_v35, %v272_v54 }
 0x10c   :  { %v583_v62 = vadd.f32 %v996_v48, %v560_v56  ;;  %v561_v63 = vadd.f32 %v545_v58, %v297_v57 }
 0x10d   :  { %v581_v0 = vadd.f32 %v996_v48, %v558_v59  ;;  %v559_v1 = vadd.f32 %v543_v61, %v295_v60  ;;  %v735_v2 = vpop.f32.mrb[12].mxu0 }
 0x10e   :  { %v599_v3 = vmax.f32 %v583_v62, 0.0  ;;  %v584_v4 = vadd.f32 %v996_v48, %v561_v63  ;;  %v277_v5 = vmul.f32 %v735_v2, %v975_v32  ;;  %v767_v6 = vpop.f32.mrb[12].mxu1  ;;  %v241_v7 = vpop.f32.mrb[13].mxu0 }
 0x10f   :  { %v597_v8 = vmax.f32 %v581_v0, 0.0  ;;  %v582_v9 = vadd.f32 %v996_v48, %v559_v1  ;;  %v548_v10 = vmul.f32 %v767_v6, %v980_v33  ;;  %v275_v11 = vmul.f32 %v975_v32, %v241_v7  ;;  %v512_v12 = vpop.f32.mrb[13].mxu1  ;;  %v736_v13 = vpop.f32.mrb[14].mxu0 }
 0x110   :  { %615 = vst [vmem:[#allocation2 + $0x50] sm:$0xff] %v599_v3  ;;  %v600_v14 = vmax.f32 %v584_v4, 0.0  ;;  %v300_v15 = vadd.f32 %v985_v35, %v277_v5  ;;  %v546_v16 = vmul.f32 %v980_v33, %v512_v12  ;;  %v278_v17 = vmul.f32 %v736_v13, %v975_v32  ;;  %v768_v18 = vpop.f32.mrb[14].mxu1  ;;  %v244_v19 = vpop.f32.mrb[15].mxu0 }
 0x111   :  { %613 = vst [vmem:[#allocation2 + $0x40] sm:$0xff] %v597_v8  ;;  %v598_v20 = vmax.f32 %v582_v9, 0.0  ;;  %v298_v21 = vadd.f32 %v985_v35, %v275_v11  ;;  %v276_v22 = vmul.f32 %v975_v32, %v244_v19  ;;  %v515_v23 = vpop.f32.mrb[15].mxu1  ;;  %v549_v26 = vmul.f32 %v768_v18, %v980_v33 }
 0x112   :  { %616 = vst [vmem:[#allocation2 + $0x58] sm:$0xff] %v600_v14  ;;  %v564_v24 = vadd.f32 %v548_v10, %v300_v15  ;;  %v301_v25 = vadd.f32 %v985_v35, %v278_v17  ;;  %v547_v29 = vmul.f32 %v980_v33, %v515_v23 }
 0x113   :  { %614 = vst [vmem:[#allocation2 + $0x48] sm:$0xff] %v598_v20  ;;  %v562_v27 = vadd.f32 %v546_v16, %v298_v21  ;;  %v299_v28 = vadd.f32 %v985_v35, %v276_v22 }
 0x114   :  { %v587_v30 = vadd.f32 %v996_v48, %v564_v24  ;;  %v565_v31 = vadd.f32 %v549_v26, %v301_v25 }
 0x115   :  { %v585_v34 = vadd.f32 %v996_v48, %v562_v27  ;;  %v563_v36 = vadd.f32 %v547_v29, %v299_v28 }
 0x116   :  { %v603_v32 = vmax.f32 %v587_v30, 0.0  ;;  %v588_v37 = vadd.f32 %v996_v48, %v565_v31 }
 0x117   :  { %v601_v38 = vmax.f32 %v585_v34, 0.0  ;;  %v586_v39 = vadd.f32 %v996_v48, %v563_v36 }
 0x118   :  { %619 = vst [vmem:[#allocation2 + $0x70] sm:$0xff] %v603_v32  ;;  %v604_v40 = vmax.f32 %v588_v37, 0.0 }
 0x119   :  { %617 = vst [vmem:[#allocation2 + $0x60] sm:$0xff] %v601_v38  ;;  %v602_v35 = vmax.f32 %v586_v39, 0.0 }
 0x11a   :  { %620 = vst [vmem:[#allocation2 + $0x78] sm:$0xff] %v604_v40 }
 0x11b   :  { %618 = vst [vmem:[#allocation2 + $0x68] sm:$0xff] %v602_v35 }
 0x11c   :  { %815 = shalt.err (!%p812_p4)
}
 0x11d   :  { %s816_s28 = scalar_lea.hbm %s1076_s8, 2048 }
 0x11e   :  { %p817_p5 = scmp.ne.s32.totalorder %s1076_s8, %s816_s28  ;;  %p820_p6 = scmp.lt.u32.totalorder %s816_s28, %s1076_s8 }
 0x120   :  { %p822_p7 = pnand %p820_p6, %p817_p5 }
 0x122   :  { %825 = shalt.err (!%p822_p7)
}
 0x123   :  { %s829_s11 = smov 128   ;;  %s830_s12 = smov 8  }
 0x124   :  { %632 = dma.vmem_to_hbm [thread:$0]  %s627_s4, 2048, %s1076_s8, [#allocation3], %s829_s11, %s829_s11, %s830_s12  }
 0x125   :  { %826 = dma.done.wait [#allocation3], 2048  }
 0x126   :  { %827 = vsyncadd [#allocation3], 4294965248 }
 0x127   :  { %636 = vsyncpa [#allocation3], 1 }

// kernel: bottleneck_forward.2
= control target key start
LH: loop header
LB: loop body
LE: loop exit
PB: predicated region body
PF: predicated region fallthrough
CT: control target
= control target key end

     0   :  { %s4804_s13 = smov 0   ;;  %s5555_s0 = inlined_call_operand.vmem [shape: bf16[2,8,8,128], index: 0, kind: input, shape index: {}]   ;;  %s5556_s1 = inlined_call_operand.vmem [shape: bf16[2,8,8,128], index: 1, kind: input, shape index: {}]   ;;  %s5557_s2 = inlined_call_operand.vmem [shape: bf16[2,8,8,128], index: 2, kind: input, shape index: {}]   ;;  %s5558_s3 = inlined_call_operand.vmem [shape: bf16[2,8,8,128], index: 3, kind: input, shape index: {}]   ;;  %s5559_s4 = inlined_call_operand.vmem [shape: bf16[128,128], index: 4, kind: input, shape index: {}]   ;;  %s5560_s5 = inlined_call_operand.vmem [shape: f32[1,128], index: 5, kind: input, shape index: {}]   ;;  %s5561_s6 = inlined_call_operand.vmem [shape: f32[1,128], index: 6, kind: input, shape index: {}]   ;;  %s5562_s7 = inlined_call_operand.vmem [shape: bf16[1152,128], index: 7, kind: input, shape index: {}]   ;;  %s5563_s8 = inlined_call_operand.vmem [shape: f32[1,128], index: 8, kind: input, shape index: {}]   ;;  %s5564_s9 = inlined_call_operand.vmem [shape: f32[1,128], index: 9, kind: input, shape index: {}]   ;;  %s5565_s10 = inlined_call_operand.vmem [shape: bf16[2,64,128], index: 10, kind: output, shape index: {}]  }
   0x1 LB: > { %s3742_s14 = sadd.s32 4294967295, %s4746_s13   ;;  %p3746_p0 = scmp.ge.s32.totalorder %s4746_s13, 1  ;;  %s4746_s13 = sphi %s4804_s13, %s20_s13  }
   0x2   : > { %p342_p1 = scmp.lt.s32.totalorder %s4746_s13, 3 }
   0x4   : > { %p343_p2 = pnand %p3746_p0, %p342_p1 }
   0x5   : > { %v4590_v0 = vld [vmem:[%s5559_s4] sm:$0xff] (!%p343_p2)   ;;  %p395_p3 = scmp.lt.s32.totalorder (!%p343_p2), %s3742_s14, 1  ;;  %v4591_v1 = vld [vmem:[%s5559_s4 + $0x8] sm:$0xff] (!%p343_p2)   ;;  %v4592_v2 = vld [vmem:[%s5559_s4 + $0x10] sm:$0xff] (!%p343_p2)   ;;  %vm731_vm0 = vcmask (!%p343_p2), 1040384   ;;  %v4748_v63 = vmov (!%p343_p2), 0  }
   0x6   : > { %346 = sbr.rel (%p343_p2) target bundleno = 770 (0x302), region = 60  ;;  %4189 = vmatprep.subr.bf16.mxu1 (!%p343_p2), %v4590_v0  ;;  %v4593_v3 = vld [vmem:[%s5559_s4 + $0x18] sm:$0xff] (!%p343_p2)   ;;  %v4594_v5 = vld [vmem:[%s5559_s4 + $0x20] sm:$0xff] (!%p343_p2)   ;;  %v4595_v6 = vld [vmem:[%s5559_s4 + $0x28] sm:$0xff] (!%p343_p2)   ;;  %vm732_vm1 = vsmask.f32 (!%p343_p2), 256 }
   0x7   : > { %4190 = vmatpush3.bf16.msra.mxu1 (!%p343_p2), %v4590_v0  ;;  %v4596_v7 = vld [vmem:[%s5559_s4 + $0x30] sm:$0xff] (!%p343_p2)   ;;  %v4597_v8 = vld [vmem:[%s5559_s4 + $0x38] sm:$0xff] (!%p343_p2)   ;;  %v4600_v9 = vld [vmem:[%s5559_s4] sm:$0xff] (!%p343_p2)   ;;  %779 = vst [vmem:[#allocation2] sm:$0xf] (!%p343_p2), %v4748_v63  ;;  %vm725_vm3 = vcmask (!%p343_p2), 1043456  }
   0x8   : > { %4191 = vmatprep.subr.bf16.mxu1 (!%p343_p2), %v4591_v1  ;;  %v4601_v12 = vld [vmem:[%s5559_s4 + $0x8] sm:$0xff] (!%p343_p2)   ;;  %v4604_v13 = vld [vmem:[%s5559_s4 + $0x10] sm:$0xff] (!%p343_p2)   ;;  %v4605_v16 = vld [vmem:[%s5559_s4 + $0x18] sm:$0xff] (!%p343_p2)   ;;  %1435 = vst [vmem:[#allocation2 + $0xd0] sm:$0xf] (!%p343_p2), %v4748_v63 }
   0x9   : > { %v4606_v17 = vld [vmem:[%s5559_s4 + $0x20] sm:$0xff] (!%p343_p2)   ;;  %v4607_v18 = vld [vmem:[%s5559_s4 + $0x28] sm:$0xff] (!%p343_p2)   ;;  %v4608_v19 = vld [vmem:[%s5559_s4 + $0x30] sm:$0xff] (!%p343_p2)   ;;  %1051 = vst [vmem:[#allocation2 + $0x48] sm:$0xf] (!%p343_p2), %v4748_v63 }
   0xa   : > { %v4609_v20 = vld [vmem:[%s5559_s4 + $0x38] sm:$0xff] (!%p343_p2)   ;;  %v4612_v21 = vld [vmem:[%s5559_s4] sm:$0xff] (!%p343_p2)   ;;  %v4613_v24 = vld [vmem:[%s5559_s4 + $0x8] sm:$0xff] (!%p343_p2)   ;;  %vm726_vm4 = vsmask.f32 (!%p343_p2), 7938 }
   0xb   : > { %4192 = vmatpush3.bf16.msra.mxu1 (!%p343_p2), %v4591_v1  ;;  %v4616_v25 = vld [vmem:[%s5559_s4 + $0x10] sm:$0xff] (!%p343_p2)   ;;  %v4617_v28 = vld [vmem:[%s5559_s4 + $0x18] sm:$0xff] (!%p343_p2)   ;;  %v4618_v29 = vld [vmem:[%s5559_s4 + $0x20] sm:$0xff] (!%p343_p2)   ;;  %vm2808_vm6 = vsmask.f32 (!%p343_p2), 3328 }
   0xc   : > { %4193 = vmatprep.subr.bf16.mxu1 (!%p343_p2), %v4592_v2  ;;  %v4619_v30 = vld [vmem:[%s5559_s4 + $0x28] sm:$0xff] (!%p343_p2)   ;;  %v4620_v31 = vld [vmem:[%s5559_s4 + $0x30] sm:$0xff] (!%p343_p2)   ;;  %v4621_v32 = vld [vmem:[%s5559_s4 + $0x38] sm:$0xff] (!%p343_p2)   ;;  %vm2809_vm7 = vsmask.f32 (!%p343_p2), 7440 }
   0xd   : > { %s5573_s14 = smov (!%p395_p3, %s3742_s14), 1  ;;  %v4626_v33 = vld [vmem:[%s5559_s4] sm:$0xff]   ;;  %v4627_v36 = vld [vmem:[%s5559_s4 + $0x8] sm:$0xff]   ;;  %v4628_v37 = vld [vmem:[%s5559_s4 + $0x10] sm:$0xff]  }
   0xe   : > { %s4821_s21 = sshll.u32 %s5573_s14, 5  ;;  %v4629_v40 = vld [vmem:[%s5559_s4 + $0x18] sm:$0xff]   ;;  %v4630_v41 = vld [vmem:[%s5559_s4 + $0x20] sm:$0xff]   ;;  %v4631_v42 = vld [vmem:[%s5559_s4 + $0x28] sm:$0xff]  }
   0xf   : > { %s4827_s24 = scalar_lea.vmem %s5558_s3, %s4821_s21  ;;  %4194 = vmatpush3.bf16.msra.mxu1 %v4592_v2  ;;  %s4843_s14 = scalar_lea.vmem %s5557_s2, %s4821_s21  ;;  %v4632_v43 = vld [vmem:[%s5559_s4 + $0x30] sm:$0xff]   ;;  %v4633_v44 = vld [vmem:[%s5559_s4 + $0x38] sm:$0xff]   ;;  %v4638_v45 = vld [vmem:[%s5562_s7] sm:$0xff]  }
  0x10   : > { %v4598_v4 = vld [vmem:[%s4827_s24] sm:$0xff]   ;;  %4195 = vmatprep.subr.bf16.mxu1 %v4593_v3  ;;  %v4599_v10 = vld [vmem:[%s4827_s24 + $0x8] sm:$0xff]   ;;  %v4602_v11 = vld [vmem:[%s4827_s24 + $0x10] sm:$0xff]   ;;  %s4863_s27 = scalar_lea.vmem %s5556_s1, %s4821_s21 }
  0x11   : > { %4205 = vmatprep.mubr.bf16.mxu1 %v4598_v4  ;;  %v4603_v14 = vld [vmem:[%s4827_s24 + $0x18] sm:$0xff]   ;;  %v4610_v15 = vld [vmem:[%s4843_s14] sm:$0xff]   ;;  %s4880_s24 = scalar_lea.vmem %s5555_s0, %s4821_s21  ;;  %v4611_v22 = vld [vmem:[%s4843_s14 + $0x8] sm:$0xff]  }
  0x12   : > { %v4614_v23 = vld [vmem:[%s4843_s14 + $0x10] sm:$0xff]   ;;  %v4615_v26 = vld [vmem:[%s4843_s14 + $0x18] sm:$0xff]   ;;  %v4622_v27 = vld [vmem:[%s4863_s27] sm:$0xff]  }
  0x13   : > { %4196 = vmatpush3.bf16.msra.mxu1 %v4593_v3  ;;  %v4623_v34 = vld [vmem:[%s4863_s27 + $0x8] sm:$0xff]   ;;  %v4624_v35 = vld [vmem:[%s4863_s27 + $0x10] sm:$0xff]   ;;  %v4625_v38 = vld [vmem:[%s4863_s27 + $0x18] sm:$0xff]  }
  0x14   : > { %4197 = vmatprep.subr.bf16.mxu1 %v4594_v5  ;;  %v4634_v39 = vld [vmem:[%s4880_s24] sm:$0xff]   ;;  %v4635_v46 = vld [vmem:[%s4880_s24 + $0x8] sm:$0xff]   ;;  %v4636_v47 = vld [vmem:[%s4880_s24 + $0x10] sm:$0xff]  }
  0x15   : > { %v4639_v48 = vld [vmem:[%s5562_s7 + $0x8] sm:$0xff]   ;;  %v4637_v49 = vld [vmem:[%s4880_s24 + $0x18] sm:$0xff]   ;;  %v4640_v50 = vld [vmem:[%s5562_s7 + $0x10] sm:$0xff]   ;;  %s419_s24 = scalar_lea.vmem %s5565_s10, %s4821_s21 }
  0x16   : > { %v1052_v51 = vld [vmem:[#allocation2 + $0x4c] sm:$0x1]  ;;  %v1058_v52 = vld [vmem:[#allocation2 + $0x54] sm:$0x1]  ;;  %v1061_v53 = vld [vmem:[#allocation2 + $0x5c] sm:$0x1] }
  0x17   : > { %4198 = vmatpush3.bf16.msra.mxu1 %v4594_v5  ;;  %v1064_v54 = vld [vmem:[#allocation2 + $0x64] sm:$0x1]  ;;  %v1067_v55 = vld [vmem:[#allocation2 + $0x6c] sm:$0x1]  ;;  %v1070_v56 = vld [vmem:[#allocation2 + $0x74] sm:$0x1] }
  0x18   : > { %4199 = vmatprep.subr.bf16.mxu1 %v4595_v6  ;;  %v4641_v57 = vld [vmem:[%s5562_s7 + $0x18] sm:$0xff]   ;;  %v1076_v59 = vld [vmem:[#allocation2 + $0x84] sm:$0x1]  ;;  %v1079_v60 = vld [vmem:[#allocation2 + $0x8c] sm:$0x1] }
  0x19   : > { %v1073_v58 = vld [vmem:[#allocation2 + $0x7c] sm:$0x1]  ;;  %v1436_v61 = vld [vmem:[#allocation2 + $0xd4] sm:$0x1]  ;;  %vm4962_vm2 = vmand %vm731_vm0, %vm732_vm1 }
  0x1a   : > { %v1053_v0 = vsel %vm4962_vm2, 0, %v1052_v51  ;;  %v1059_v1 = vsel %vm4962_vm2, 0, %v1058_v52  ;;  %v1062_v2 = vsel %vm4962_vm2, 0, %v1061_v53  ;;  %v1065_v3 = vsel %vm4962_vm2, 0, %v1064_v54  ;;  %v5059_v51 = vld [vmem:[%s5562_s7 + $0x40] sm:$0xff]   ;;  %vm5085_vm5 = vmand %vm725_vm3, %vm726_vm4 }
  0x1b   : > { %4200 = vmatpush3.bf16.msra.mxu1 %v4595_v6  ;;  %v1068_v4 = vsel %vm4962_vm2, 0, %v1067_v55  ;;  %v1071_v5 = vsel %vm4962_vm2, 0, %v1070_v56  ;;  %v1074_v6 = vsel %vm4962_vm2, 0, %v1073_v58  ;;  %1054 = vst [vmem:[#allocation2 + $0x4c] sm:$0x1] %v1053_v0  ;;  %vm5354_vm8 = vmor %vm2808_vm6, %vm2809_vm7 }
  0x1c   : > { %4201 = vmatprep.subr.bf16.mxu1 %v4596_v7  ;;  %1060 = vst [vmem:[#allocation2 + $0x54] sm:$0x1] %v1059_v1  ;;  %1063 = vst [vmem:[#allocation2 + $0x5c] sm:$0x1] %v1062_v2  ;;  %v5065_v52 = vld [vmem:[%s5560_s5] ss:$0 sm:$0xff] }
  0x1d   : > { %1066 = vst [vmem:[#allocation2 + $0x64] sm:$0x1] %v1065_v3  ;;  %1069 = vst [vmem:[#allocation2 + $0x6c] sm:$0x1] %v1068_v4  ;;  %v5070_v54 = vld [vmem:[%s5561_s6] ss:$0 sm:$0xff] }
  0x1e   : > { %1072 = vst [vmem:[#allocation2 + $0x74] sm:$0x1] %v1071_v5  ;;  %1075 = vst [vmem:[#allocation2 + $0x7c] sm:$0x1] %v1074_v6 }
  0x1f   : > { %4202 = vmatpush3.bf16.msra.mxu1 %v4596_v7  ;;  %v1077_v7 = vsel %vm4962_vm2, 0, %v1076_v59 }
  0x20   : > { %4203 = vmatprep.subr.bf16.mxu1 %v4597_v8  ;;  %1078 = vst [vmem:[#allocation2 + $0x84] sm:$0x1] %v1077_v7 }
  0x23   : > { %4204 = vmatpush3.bf16.msra.mxu1 %v4597_v8  ;;  %v4642_v8 = vld [vmem:[%s5562_s7 + $0x20] sm:$0xff]  }
  0x24   : > { %4213 = vmatprep.subr.bf16.mxu1 %v4600_v9 }
  0x26   : > { %4206 = vmatmul.mubr.bf16.vlgmr.msra.gmra.mrb[0].mxu1 %v4599_v10  ;;  %v1437_v10 = vsel %vm4962_vm2, 0, %v1436_v61 }
  0x27   : > { %4214 = vmatpush3.bf16.msra.mxu1 %v4600_v9  ;;  %4209 = vmatprep.mubr.bf16.mxu1 %v4602_v11  ;;  %v1080_v9 = vsel %vm4962_vm2, 0, %v1079_v60  ;;  %1438 = vst [vmem:[#allocation2 + $0xd4] sm:$0x1] %v1437_v10  ;;  %v1708_v11 = vld [vmem:[#allocation2 + $0x11c] sm:$0x1] }
  0x28   : > { %4215 = vmatprep.subr.bf16.mxu1 %v4601_v12  ;;  %1081 = vst [vmem:[#allocation2 + $0x8c] sm:$0x1] %v1080_v9 }
  0x2b   : > { %4216 = vmatpush3.bf16.msra.mxu1 %v4601_v12  ;;  %v1711_v12 = vld [vmem:[#allocation2 + $0xdc] sm:$0x1] }
  0x2c   : > { %4217 = vmatprep.subr.bf16.mxu1 %v4604_v13 }
  0x2e   : > { %4210 = vmatmul.mubr.bf16.gmra.mrb[4].mxu1 %v4603_v14  ;;  %v1709_v14 = vsel %vm4962_vm2, 0, %v1708_v11 }
  0x2f   : > { %4218 = vmatpush3.bf16.msra.mxu1 %v4604_v13  ;;  %4229 = vmatprep.mubr.bf16.mxu1 %v4610_v15  ;;  %v1714_v13 = vld [vmem:[#allocation2 + $0xe4] sm:$0x1]  ;;  %v1712_v15 = vsel %vm4962_vm2, 0, %v1711_v12  ;;  %1710 = vst [vmem:[#allocation2 + $0x11c] sm:$0x1] %v1709_v14 }
  0x30   : > { %4219 = vmatprep.subr.bf16.mxu1 %v4605_v16  ;;  %1713 = vst [vmem:[#allocation2 + $0xdc] sm:$0x1] %v1712_v15  ;;  %v743_v15 = vld [vmem:[#allocation2 + $0x18] sm:$0xf] }
  0x33   : > { %4220 = vmatpush3.bf16.msra.mxu1 %v4605_v16  ;;  %v1715_v16 = vsel %vm4962_vm2, 0, %v1714_v13 }
  0x34   : > { %4221 = vmatprep.subr.bf16.mxu1 %v4606_v17  ;;  %1716 = vst [vmem:[#allocation2 + $0xe4] sm:$0x1] %v1715_v16  ;;  %v746_v16 = vld [vmem:[#allocation2 + $0x1c] sm:$0x1] }
  0x37   : > { %4222 = vmatpush3.bf16.msra.mxu1 %v4606_v17  ;;  %v1717_v17 = vld [vmem:[#allocation2 + $0xec] sm:$0x1] }
  0x38   : > { %4223 = vmatprep.subr.bf16.mxu1 %v4607_v18 }
  0x3b   : > { %4224 = vmatpush3.bf16.msra.mxu1 %v4607_v18  ;;  %v1718_v18 = vsel %vm4962_vm2, 0, %v1717_v17 }
  0x3c   : > { %4225 = vmatprep.subr.bf16.mxu1 %v4608_v19  ;;  %1719 = vst [vmem:[#allocation2 + $0xec] sm:$0x1] %v1718_v18 }
  0x3f   : > { %4226 = vmatpush3.bf16.msra.mxu1 %v4608_v19  ;;  %v1720_v19 = vld [vmem:[#allocation2 + $0xf4] sm:$0x1] }
  0x40   : > { %4227 = vmatprep.subr.bf16.mxu1 %v4609_v20 }
  0x43   : > { %4228 = vmatpush3.bf16.msra.mxu1 %v4609_v20  ;;  %v1723_v20 = vld [vmem:[#allocation2 + $0xfc] sm:$0x1] }
  0x44   : > { %4237 = vmatprep.subr.bf16.mxu1 %v4612_v21 }
  0x46   : > { %4230 = vmatmul.mubr.bf16.vlgmr.msra.gmra.mrb[8].mxu1 %v4611_v22  ;;  %v1721_v22 = vsel %vm4962_vm2, 0, %v1720_v19 }
  0x47   : > { %4238 = vmatpush3.bf16.msra.mxu1 %v4612_v21  ;;  %4233 = vmatprep.mubr.bf16.mxu1 %v4614_v23  ;;  %v4643_v21 = vld [vmem:[%s5562_s7 + $0x28] sm:$0xff]   ;;  %v1724_v23 = vsel %vm4962_vm2, 0, %v1723_v20  ;;  %1722 = vst [vmem:[#allocation2 + $0xf4] sm:$0x1] %v1721_v22 }
  0x48   : > { %4239 = vmatprep.subr.bf16.mxu1 %v4613_v24  ;;  %1725 = vst [vmem:[#allocation2 + $0xfc] sm:$0x1] %v1724_v23  ;;  %v728_v23 = vld [vmem:[#allocation2 + $0x8] sm:$0xf] }
  0x4b   : > { %4240 = vmatpush3.bf16.msra.mxu1 %v4613_v24  ;;  %v1726_v24 = vld [vmem:[#allocation2 + $0x104] sm:$0x1] }
  0x4c   : > { %4241 = vmatprep.subr.bf16.mxu1 %v4616_v25 }
  0x4e   : > { %4234 = vmatmul.mubr.bf16.gmra.mrb[12].mxu1 %v4615_v26  ;;  %v1727_v26 = vsel %vm4962_vm2, 0, %v1726_v24 }
  0x4f   : > { %4242 = vmatpush3.bf16.msra.mxu1 %v4616_v25  ;;  %4253 = vmatprep.mubr.bf16.mxu1 %v4622_v27  ;;  %v1729_v25 = vld [vmem:[#allocation2 + $0x10c] sm:$0x1]  ;;  %1728 = vst [vmem:[#allocation2 + $0x104] sm:$0x1] %v1727_v26 }
  0x50   : > { %4243 = vmatprep.subr.bf16.mxu1 %v4617_v28  ;;  %v1730_v27 = vsel %vm4962_vm2, 0, %v1729_v25 }
  0x51   : > { %1731 = vst [vmem:[#allocation2 + $0x10c] sm:$0x1] %v1730_v27 }
  0x53   : > { %4244 = vmatpush3.bf16.msra.mxu1 %v4617_v28  ;;  %v1732_v28 = vld [vmem:[#allocation2 + $0x114] sm:$0x1] }
  0x54   : > { %4245 = vmatprep.subr.bf16.mxu1 %v4618_v29 }
  0x57   : > { %4246 = vmatpush3.bf16.msra.mxu1 %v4618_v29  ;;  %v1055_v29 = vld [vmem:[#allocation2 + $0x4c] sm:$0x1] }
  0x58   : > { %4247 = vmatprep.subr.bf16.mxu1 %v4619_v30 }
  0x5b   : > { %4248 = vmatpush3.bf16.msra.mxu1 %v4619_v30  ;;  %v1733_v30 = vsel %vm4962_vm2, 0, %v1732_v28 }
  0x5c   : > { %4249 = vmatprep.subr.bf16.mxu1 %v4620_v31  ;;  %1734 = vst [vmem:[#allocation2 + $0x114] sm:$0x1] %v1733_v30  ;;  %v734_v30 = vld [vmem:[#allocation2 + $0xc] sm:$0x1] }
  0x5f   : > { %4250 = vmatpush3.bf16.msra.mxu1 %v4620_v31  ;;  %v1056_v31 = vsel %vm4962_vm2, 0, %v1055_v29 }
  0x60   : > { %4251 = vmatprep.subr.bf16.mxu1 %v4621_v32  ;;  %1057 = vst [vmem:[#allocation2 + $0x4c] sm:$0x1] %v1056_v31 }
  0x63   : > { %4252 = vmatpush3.bf16.msra.mxu1 %v4621_v32  ;;  %v4644_v32 = vld [vmem:[%s5562_s7 + $0x30] sm:$0xff]  }
  0x64   : > { %4261 = vmatprep.subr.bf16.mxu1 %v4626_v33 }
  0x66   : > { %4254 = vmatmul.mubr.bf16.vlgmr.msra.gmra.mrb[16].mxu1 %v4623_v34 }
  0x67   : > { %4257 = vmatprep.mubr.bf16.mxu1 %v4624_v35  ;;  %4262 = vmatpush3.bf16.msra.mxu1 %v4626_v33  ;;  %v783_v33 = vld [vmem:[#allocation2] sm:$0x1]  ;;  %v780_v35 = vld [vmem:[#allocation2 + $0x4] sm:$0x1] }
  0x68   : > { %4263 = vmatprep.subr.bf16.mxu1 %v4627_v36  ;;  %v784_v34 = vsel %vm4962_vm2, 0, %v783_v33 }
  0x69   : > { %785 = vst [vmem:[#allocation2] sm:$0x1] %v784_v34 }
  0x6b   : > { %4264 = vmatpush3.bf16.msra.mxu1 %v4627_v36  ;;  %v1735_v36 = vld [vmem:[#allocation2 + $0x11c] sm:$0x1] }
  0x6c   : > { %4265 = vmatprep.subr.bf16.mxu1 %v4628_v37 }
  0x6e   : > { %4258 = vmatmul.mubr.bf16.gmra.mrb[20].mxu1 %v4625_v38  ;;  %v1736_v38 = vsel %vm4962_vm2, 0, %v1735_v36 }
  0x6f   : > { %4266 = vmatpush3.bf16.msra.mxu1 %v4628_v37  ;;  %4277 = vmatprep.mubr.bf16.mxu1 %v4634_v39  ;;  %v781_v37 = vsel %vm4962_vm2, 0, %v780_v35  ;;  %v4645_v39 = vld [vmem:[%s5562_s7 + $0x38] sm:$0xff]   ;;  %1737 = vst [vmem:[#allocation2 + $0x11c] sm:$0x1] %v1736_v38 }
  0x70   : > { %4267 = vmatprep.subr.bf16.mxu1 %v4629_v40  ;;  %782 = vst [vmem:[#allocation2 + $0x4] sm:$0x1] %v781_v37  ;;  %v749_v37 = vld [vmem:[#allocation2 + $0x20] sm:$0xf] }
  0x73   : > { %4268 = vmatpush3.bf16.msra.mxu1 %v4629_v40  ;;  %v5027_v40 = vld [vmem:[%s5562_s7 + $0x180] sm:$0xff]  }
  0x74   : > { %4269 = vmatprep.subr.bf16.mxu1 %v4630_v41 }
  0x77   : > { %4270 = vmatpush3.bf16.msra.mxu1 %v4630_v41  ;;  %v1463_v41 = vld [vmem:[#allocation2 + $0xd0] sm:$0x1] }
  0x78   : > { %4271 = vmatprep.subr.bf16.mxu1 %v4631_v42 }
  0x7b   : > { %4272 = vmatpush3.bf16.msra.mxu1 %v4631_v42  ;;  %v1464_v42 = vsel %vm4962_vm2, 0, %v1463_v41 }
  0x7c   : > { %4273 = vmatprep.subr.bf16.mxu1 %v4632_v43  ;;  %1465 = vst [vmem:[#allocation2 + $0xd0] sm:$0x1] %v1464_v42  ;;  %v752_v42 = vld [vmem:[#allocation2 + $0x24] sm:$0x1] }
  0x7f   : > { %4274 = vmatpush3.bf16.msra.mxu1 %v4632_v43  ;;  %v4661_v43 = vld [vmem:[%s5562_s7 + $0xc0] sm:$0xff]  }
  0x80   : > { %4275 = vmatprep.subr.bf16.mxu1 %v4633_v44  ;;  %4333 = vmatprep.subr.bf16.mxu0 %v4661_v43 }
  0x81   : > { %4334 = vmatpush3.bf16.msra.mxu0 %v4661_v43 }
  0x83   : > { %4276 = vmatpush3.bf16.msra.mxu1 %v4633_v44  ;;  %v4662_v44 = vld [vmem:[%s5562_s7 + $0xc8] sm:$0xff]  }
  0x84   : > { %4285 = vmatprep.subr.bf16.mxu1 %v4638_v45  ;;  %4335 = vmatprep.subr.bf16.mxu0 %v4662_v44 }
  0x85   : > { %4336 = vmatpush3.bf16.msra.mxu0 %v4662_v44 }
  0x86   : > { %4278 = vmatmul.mubr.bf16.vlgmr.msra.gmra.mrb[24].mxu1 %v4635_v46  ;;  %v4665_v46 = vld [vmem:[%s5562_s7 + $0xd8] sm:$0xff]  }
  0x87   : > { %4281 = vmatprep.mubr.bf16.mxu1 %v4636_v47  ;;  %4286 = vmatpush3.bf16.msra.mxu1 %v4638_v45  ;;  %v4664_v45 = vld [vmem:[%s5562_s7 + $0xd0] sm:$0xff]   ;;  %v4666_v47 = vld [vmem:[%s5562_s7 + $0xe0] sm:$0xff]  }
  0x88   : > { %4287 = vmatprep.subr.bf16.mxu1 %v4639_v48  ;;  %4337 = vmatprep.subr.bf16.mxu0 %v4664_v45 }
  0x89   : > { %4338 = vmatpush3.bf16.msra.mxu0 %v4664_v45 }
  0x8a   : > { %4339 = vmatprep.subr.bf16.mxu0 %v4665_v46 }
  0x8b   : > { %4288 = vmatpush3.bf16.msra.mxu1 %v4639_v48  ;;  %v4668_v48 = vld [vmem:[%s5562_s7 + $0xe8] sm:$0xff]  }
  0x8c   : > { %4289 = vmatprep.subr.bf16.mxu1 %v4640_v50 }
  0x8d   : > { %4340 = vmatpush3.bf16.msra.mxu0 %v4665_v46 }
  0x8e   : > { %4282 = vmatmul.mubr.bf16.gmra.mrb[28].mxu1 %v4637_v49  ;;  %4341 = vmatprep.subr.bf16.mxu0 %v4666_v47  ;;  %v4670_v49 = vld [vmem:[%s5562_s7 + $0xf0] sm:$0xff]  }
  0x8f   : > { %4290 = vmatpush3.bf16.msra.mxu1 %v4640_v50  ;;  %v4672_v50 = vld [vmem:[%s5562_s7 + $0xf8] sm:$0xff]  }
  0x90   : > { %4291 = vmatprep.subr.bf16.mxu1 %v4641_v57 }
  0x91   : > { %4342 = vmatpush3.bf16.msra.mxu0 %v4666_v47 }
  0x92   : > { %4343 = vmatprep.subr.bf16.mxu0 %v4668_v48 }
  0x93   : > { %4292 = vmatpush3.bf16.msra.mxu1 %v4641_v57 }
  0x94   : > { %4293 = vmatprep.subr.bf16.mxu1 %v4642_v8 }
  0x95   : > { %4344 = vmatpush3.bf16.msra.mxu0 %v4668_v48 }
  0x96   : > { %4345 = vmatprep.subr.bf16.mxu0 %v4670_v49 }
  0x97   : > { %4294 = vmatpush3.bf16.msra.mxu1 %v4642_v8 }
  0x98   : > { %4295 = vmatprep.subr.bf16.mxu1 %v4643_v21 }
  0x99   : > { %4346 = vmatpush3.bf16.msra.mxu0 %v4670_v49  ;;  %v737_v49 = vld [vmem:[#allocation2 + $0x10] sm:$0xf] }
  0x9a   : > { %4347 = vmatprep.subr.bf16.mxu0 %v4672_v50 }
  0x9b   : > { %4296 = vmatpush3.bf16.msra.mxu1 %v4643_v21 }
  0x9c   : > { %4297 = vmatprep.subr.bf16.mxu1 %v4644_v32 }
  0x9d   : > { %4348 = vmatpush3.bf16.msra.mxu0 %v4672_v50  ;;  %v740_v50 = vld [vmem:[#allocation2 + $0x14] sm:$0x1] }
  0x9e   : > { %4357 = vmatprep.subr.bf16.mxu0 %v5059_v51 }
  0x9f   : > { %4298 = vmatpush3.bf16.msra.mxu1 %v4644_v32 }
  0xa0   : > { %4299 = vmatprep.subr.bf16.mxu1 %v4645_v39 }
  0xa3   : > { %4300 = vmatpush3.bf16.msra.mxu1 %v4645_v39 }
  0xa4   : > { %4309 = vmatprep.subr.bf16.mxu1 %v5027_v40 }
  0xf9   : > { %v4207_v53 = vpop.f32.mrb[0].mxu1 }
  0xfa   : > { %v591_v55 = vmul.f32 %v4207_v53, %v5065_v52  ;;  %v551_v56 = vpop.f32.mrb[1].mxu1 }
  0xfb   : > { %v589_v57 = vmul.f32 %v5065_v52, %v551_v56  ;;  %v4208_v58 = vpop.f32.mrb[2].mxu1 }
  0xfc   : > { %v606_v59 = vadd.f32 %v5070_v54, %v591_v55  ;;  %v592_v60 = vmul.f32 %v4208_v58, %v5065_v52  ;;  %v554_v61 = vpop.f32.mrb[3].mxu1 }
  0xfd   : > { %v604_v63 = vadd.f32 %v5070_v54, %v589_v57  ;;  %v590_v0 = vmul.f32 %v5065_v52, %v554_v61 }
  0xfe   : > { %v614_v1 = vmax.f32 %v606_v59, 0.0  ;;  %v607_v2 = vadd.f32 %v5070_v54, %v592_v60 }
  0xff   : > { %v612_v3 = vmax.f32 %v604_v63, 0.0  ;;  %v605_v4 = vadd.f32 %v5070_v54, %v590_v0 }
 0x100   : > { %v3972_v5 = vpack.c.bf16 %v614_v1, %v614_v1  ;;  %v615_v6 = vmax.f32 %v607_v2, 0.0 }
 0x101   : > { %v3970_v7 = vpack.c.bf16 %v612_v3, %v612_v3  ;;  %v613_v8 = vmax.f32 %v605_v4, 0.0  ;;  %v4211_v9 = vpop.f32.mrb[4].mxu1 }
 0x102   : > { %v661_v10 = vshrl.u32 %v3972_v5, 16  ;;  %v664_v11 = vshll.u32 %v3972_v5, 16  ;;  %v3973_v12 = vpack.c.bf16 %v615_v6, %v615_v6  ;;  %v595_v13 = vmul.f32 %v4211_v9, %v5065_v52  ;;  %v567_v14 = vpop.f32.mrb[5].mxu1 }
 0x103   : > { %v645_v17 = vshrl.u32 %v3970_v7, 16  ;;  %v648_v18 = vshll.u32 %v3970_v7, 16  ;;  %v3971_v19 = vpack.c.bf16 %v613_v8, %v613_v8  ;;  %v593_v20 = vmul.f32 %v5065_v52, %v567_v14  ;;  %v4212_v21 = vpop.f32.mrb[6].mxu1 }
 0x104   : > { %v663_v22 = vrot.slane %v661_v10, 7  ;;  %v669_v24 = vshrl.u32 %v3973_v12, 16  ;;  %v672_v25 = vshll.u32 %v3973_v12, 16  ;;  %v610_v26 = vadd.f32 %v5070_v54, %v595_v13  ;;  %v570_v27 = vpop.f32.mrb[7].mxu1  ;;  %v767_v12 = vld [vmem:[#allocation2 + $0x38] sm:$0xf] }
 0x105   : > { %v647_v29 = vrot.slane %v645_v17, 7  ;;  %v653_v31 = vshrl.u32 %v3971_v19, 16  ;;  %v656_v32 = vshll.u32 %v3971_v19, 16  ;;  %v608_v33 = vadd.f32 %v5070_v54, %v593_v20  ;;  %v770_v13 = vld [vmem:[#allocation2 + $0x3c] sm:$0x1] }
 0x106   : > { %v666_v34 = vor.u32 %v664_v11, %v663_v22  ;;  %v667_v35 = vrot.slane %v663_v22, 4  ;;  %v671_v36 = vrot.slane %v669_v24, 7  ;;  %v618_v38 = vmax.f32 %v610_v26, 0.0  ;;  %v755_v11 = vld [vmem:[#allocation2 + $0x28] sm:$0xf] }
 0x107   : > { %v650_v39 = vor.u32 %v648_v18, %v647_v29  ;;  %v651_v41 = vrot.slane %v647_v29, 4  ;;  %v655_v43 = vrot.slane %v653_v31, 7  ;;  %v616_v44 = vmax.f32 %v608_v33, 0.0 }
 0x108   : > { %v744_v45 = vsel %vm5085_vm5, %v666_v34, %v743_v15  ;;  %v747_v46 = vsel %vm4962_vm2, %v667_v35, %v746_v16  ;;  %v674_v47 = vor.u32 %v672_v25, %v671_v36  ;;  %v675_v48 = vrot.slane %v671_v36, 4 }
 0x109   : > { %745 = vst [vmem:[#allocation2 + $0x18] sm:$0xf] %v744_v45  ;;  %748 = vst [vmem:[#allocation2 + $0x1c] sm:$0x1] %v747_v46  ;;  %v729_v53 = vsel %vm5085_vm5, %v650_v39, %v728_v23  ;;  %v735_v55 = vsel %vm4962_vm2, %v651_v41, %v734_v30  ;;  %v658_v56 = vor.u32 %v656_v32, %v655_v43  ;;  %v659_v57 = vrot.slane %v655_v43, 4 }
 0x10a   : > { %730 = vst [vmem:[#allocation2 + $0x8] sm:$0xf] %v729_v53  ;;  %736 = vst [vmem:[#allocation2 + $0xc] sm:$0x1] %v735_v55  ;;  %v750_v58 = vsel %vm5085_vm5, %v674_v47, %v749_v37  ;;  %v753_v59 = vsel %vm4962_vm2, %v675_v48, %v752_v42  ;;  %v3976_v60 = vpack.c.bf16 %v618_v38, %v618_v38  ;;  %v773_v42 = vld [vmem:[#allocation2 + $0x40] sm:$0xf] }
 0x10b   : > { %v3974_v61 = vpack.c.bf16 %v616_v44, %v616_v44  ;;  %751 = vst [vmem:[#allocation2 + $0x20] sm:$0xf] %v750_v58  ;;  %754 = vst [vmem:[#allocation2 + $0x24] sm:$0x1] %v753_v59  ;;  %v738_v63 = vsel %vm5085_vm5, %v658_v56, %v737_v49  ;;  %v741_v0 = vsel %vm4962_vm2, %v659_v57, %v740_v50  ;;  %v776_v43 = vld [vmem:[#allocation2 + $0x44] sm:$0x1] }
 0x10c   : > { %v596_v1 = vmul.f32 %v4212_v21, %v5065_v52  ;;  %v594_v2 = vmul.f32 %v5065_v52, %v570_v27  ;;  %739 = vst [vmem:[#allocation2 + $0x10] sm:$0xf] %v738_v63  ;;  %742 = vst [vmem:[#allocation2 + $0x14] sm:$0x1] %v741_v0  ;;  %v693_v3 = vshrl.u32 %v3976_v60, 16  ;;  %v696_v4 = vshll.u32 %v3976_v60, 16 }
 0x10d   : > { %v677_v5 = vshrl.u32 %v3974_v61, 16  ;;  %v680_v6 = vshll.u32 %v3974_v61, 16  ;;  %v758_v21 = vld [vmem:[#allocation2 + $0x2c] sm:$0x1]  ;;  %v761_v47 = vld [vmem:[#allocation2 + $0x30] sm:$0xf] }
 0x10e   : > { %v611_v7 = vadd.f32 %v5070_v54, %v596_v1  ;;  %v609_v8 = vadd.f32 %v5070_v54, %v594_v2  ;;  %v695_v9 = vrot.slane %v693_v3, 7  ;;  %v764_v48 = vld [vmem:[#allocation2 + $0x34] sm:$0x1]  ;;  %v1738_v57 = vld [vmem:[#allocation2] sm:$0xf] }
 0x10f   : > { %v679_v10 = vrot.slane %v677_v5, 7 }
 0x110   : > { %v619_v14 = vmax.f32 %v611_v7, 0.0  ;;  %v617_v15 = vmax.f32 %v609_v8, 0.0  ;;  %v792_v16 = vld [vmem:[#allocation2 + $0x18] sm:$0x1]  ;;  %v698_v17 = vor.u32 %v696_v4, %v695_v9  ;;  %v699_v18 = vrot.slane %v695_v9, 4 }
 0x111   : > { %v682_v19 = vor.u32 %v680_v6, %v679_v10  ;;  %v683_v20 = vrot.slane %v679_v10, 4  ;;  %v793_v22 = vsel %vm4962_vm2, 0, %v792_v16  ;;  %v786_v23 = vld [vmem:[#allocation2 + $0x8] sm:$0x1] }
 0x112   : > { %v3977_v24 = vpack.c.bf16 %v619_v14, %v619_v14  ;;  %v3975_v25 = vpack.c.bf16 %v617_v15, %v617_v15  ;;  %794 = vst [vmem:[#allocation2 + $0x18] sm:$0x1] %v793_v22  ;;  %v787_v26 = vsel %vm4962_vm2, 0, %v786_v23  ;;  %v795_v27 = vld [vmem:[#allocation2 + $0x20] sm:$0x1]  ;;  %v768_v29 = vsel %vm5085_vm5, %v698_v17, %v767_v12  ;;  %v4649_v15 = vld [vmem:[%s5562_s7 + $0x188] sm:$0xff]  }
 0x113   : > { %v771_v30 = vsel %vm4962_vm2, %v699_v18, %v770_v13  ;;  %v756_v31 = vsel %vm5085_vm5, %v682_v19, %v755_v11  ;;  %788 = vst [vmem:[#allocation2 + $0x8] sm:$0x1] %v787_v26  ;;  %v796_v32 = vsel %vm4962_vm2, 0, %v795_v27  ;;  %v789_v33 = vld [vmem:[#allocation2 + $0x10] sm:$0x1]  ;;  %v759_v34 = vsel %vm4962_vm2, %v683_v20, %v758_v21 }
 0x114   : > { %769 = vst [vmem:[#allocation2 + $0x38] sm:$0xf] %v768_v29  ;;  %772 = vst [vmem:[#allocation2 + $0x3c] sm:$0x1] %v771_v30  ;;  %v701_v35 = vshrl.u32 %v3977_v24, 16  ;;  %v704_v36 = vshll.u32 %v3977_v24, 16 }
 0x115   : > { %757 = vst [vmem:[#allocation2 + $0x28] sm:$0xf] %v756_v31  ;;  %797 = vst [vmem:[#allocation2 + $0x20] sm:$0x1] %v796_v32  ;;  %v790_v37 = vsel %vm4962_vm2, 0, %v789_v33  ;;  %v685_v38 = vshrl.u32 %v3975_v25, 16 }
 0x116   : > { %760 = vst [vmem:[#allocation2 + $0x2c] sm:$0x1] %v759_v34  ;;  %v688_v39 = vshll.u32 %v3975_v25, 16  ;;  %791 = vst [vmem:[#allocation2 + $0x10] sm:$0x1] %v790_v37  ;;  %v703_v41 = vrot.slane %v701_v35, 7 }
 0x117   : > { %v687_v44 = vrot.slane %v685_v38, 7  ;;  %v4652_v26 = vld [vmem:[%s5562_s7 + $0x190] sm:$0xff]  }
 0x118   : > { %v706_v45 = vor.u32 %v704_v36, %v703_v41  ;;  %v707_v46 = vrot.slane %v703_v41, 4 }
 0x119   : > { %v690_v49 = vor.u32 %v688_v39, %v687_v44  ;;  %v691_v50 = vrot.slane %v687_v44, 4  ;;  %v4231_v56 = vpop.f32.mrb[8].mxu1  ;;  %v5147_v11 = vld [vmem:[#allocation2 + $0x18] sm:$0xf] }
 0x11a   : > { %v774_v53 = vsel %vm5085_vm5, %v706_v45, %v773_v42  ;;  %v777_v55 = vsel %vm4962_vm2, %v707_v46, %v776_v43  ;;  %v980_v63 = vmul.f32 %v4231_v56, %v5065_v52  ;;  %v940_v0 = vpop.f32.mrb[9].mxu1  ;;  %v5140_v5 = vld [vmem:[#allocation2 + $0x8] sm:$0xf]  ;;  %v4655_v44 = vld [vmem:[%s5562_s7 + $0x198] sm:$0xff]  }
 0x11b   : > { %v804_v58 = vld [vmem:[#allocation2 + $0x38] sm:$0x1]  ;;  %775 = vst [vmem:[#allocation2 + $0x40] sm:$0xf] %v774_v53  ;;  %778 = vst [vmem:[#allocation2 + $0x44] sm:$0x1] %v777_v55  ;;  %v762_v60 = vsel %vm5085_vm5, %v690_v49, %v761_v47  ;;  %v765_v61 = vsel %vm4962_vm2, %v691_v50, %v764_v48  ;;  %v978_v3 = vmul.f32 %v5065_v52, %v940_v0 }
 0x11c   : > { %v798_v59 = vld [vmem:[#allocation2 + $0x28] sm:$0x1]  ;;  %v805_v1 = vsel %vm4962_vm2, 0, %v804_v58  ;;  %763 = vst [vmem:[#allocation2 + $0x30] sm:$0xf] %v762_v60  ;;  %v4232_v4 = vpop.f32.mrb[10].mxu1  ;;  %v995_v6 = vadd.f32 %v5070_v54, %v980_v63  ;;  %v3845_v9 = vcombine.low %v1738_v57, %v5140_v5 }
 0x11d   : > { %v799_v2 = vsel %vm4962_vm2, 0, %v798_v59  ;;  %766 = vst [vmem:[#allocation2 + $0x34] sm:$0x1] %v765_v61  ;;  %806 = vst [vmem:[#allocation2 + $0x38] sm:$0x1] %v805_v1  ;;  %v981_v7 = vmul.f32 %v4232_v4, %v5065_v52  ;;  %v943_v8 = vpop.f32.mrb[11].mxu1  ;;  %v993_v12 = vadd.f32 %v5070_v54, %v978_v3 }
 0x11e   : > { %800 = vst [vmem:[#allocation2 + $0x28] sm:$0x1] %v799_v2  ;;  %v5145_v10 = vld [vmem:[#allocation2 + $0x10] sm:$0xf]  ;;  %v979_v13 = vmul.f32 %v5065_v52, %v943_v8  ;;  %v1003_v16 = vmax.f32 %v995_v6, 0.0  ;;  %4301 = vmatprep.mubr.bf16.mxu1 %v3845_v9  ;;  %v4656_v57 = vld [vmem:[%s5562_s7 + $0x1a0] sm:$0xff]  }
 0x11f   : > { %v3846_v14 = vcombine.low %v5145_v10, %v5147_v11  ;;  %v996_v17 = vadd.f32 %v5070_v54, %v981_v7  ;;  %v1001_v18 = vmax.f32 %v993_v12, 0.0  ;;  %v5168_v35 = vld [vmem:[#allocation2 + $0x20] sm:$0xf]  ;;  %v3857_v0 = vcombine.low %v5140_v5, %v5145_v10  ;;  %v4657_v1 = vld [vmem:[%s5562_s7 + $0x1a8] sm:$0xff]   ;;  %v4658_v2 = vld [vmem:[%s5562_s7 + $0x1b0] sm:$0xff]  }
 0x120   : > { %v994_v19 = vadd.f32 %v5070_v54, %v979_v13  ;;  %v3980_v20 = vpack.c.bf16 %v1003_v16, %v1003_v16  ;;  %v4659_v3 = vld [vmem:[%s5562_s7 + $0x1b8] sm:$0xff]   ;;  %v4667_v5 = vld [vmem:[%s5562_s7 + $0x140] sm:$0xff]  }
 0x121   : > { %4302 = vmatmul.mubr.bf16.vlgmr.msra.gmra.mrb[32].mxu1 %v3846_v14  ;;  %v1004_v21 = vmax.f32 %v996_v17, 0.0  ;;  %v3978_v23 = vpack.c.bf16 %v1001_v18, %v1001_v18  ;;  %v4235_v25 = vpop.f32.mrb[12].mxu1  ;;  %v3858_v14 = vcombine.low %v5147_v11, %v5168_v35  ;;  %v4669_v17 = vld [vmem:[%s5562_s7 + $0x148] sm:$0xff]  }
 0x122   : > { %4310 = vmatpush3.bf16.msra.mxu1 %v5027_v40  ;;  %v807_v22 = vld [vmem:[#allocation2 + $0x40] sm:$0x1]  ;;  %v1002_v24 = vmax.f32 %v994_v19, 0.0  ;;  %1044 = vst [vmem:[#allocation2 + $0x60] sm:$0xf] %v3980_v20  ;;  %v984_v31 = vmul.f32 %v4235_v25, %v5065_v52  ;;  %v956_v32 = vpop.f32.mrb[13].mxu1 }
 0x123   : > { %4311 = vmatprep.subr.bf16.mxu1 %v4649_v15  ;;  %v808_v27 = vsel %vm4962_vm2, 0, %v807_v22  ;;  %v801_v29 = vld [vmem:[#allocation2 + $0x30] sm:$0x1]  ;;  %v3981_v30 = vpack.c.bf16 %v1004_v21, %v1004_v21  ;;  %1042 = vst [vmem:[#allocation2 + $0x50] sm:$0xf] %v3978_v23  ;;  %v982_v34 = vmul.f32 %v5065_v52, %v956_v32  ;;  %v4236_v37 = vpop.f32.mrb[14].mxu1 }
 0x124   : > { %809 = vst [vmem:[#allocation2 + $0x40] sm:$0x1] %v808_v27  ;;  %v802_v40 = vsel %vm4962_vm2, 0, %v801_v29  ;;  %v3979_v33 = vpack.c.bf16 %v1002_v24, %v1002_v24  ;;  %v999_v38 = vadd.f32 %v5070_v54, %v984_v31  ;;  %v985_v41 = vmul.f32 %v4236_v37, %v5065_v52  ;;  %v959_v42 = vpop.f32.mrb[15].mxu1  ;;  %v5183_v56 = vld [vmem:[#allocation2 + $0x38] sm:$0xf] }
 0x125   : > { %v5170_v36 = vld [vmem:[#allocation2 + $0x28] sm:$0xf]  ;;  %803 = vst [vmem:[#allocation2 + $0x30] sm:$0x1] %v802_v40  ;;  %1045 = vst [vmem:[#allocation2 + $0x68] sm:$0xf] %v3981_v30  ;;  %v997_v43 = vadd.f32 %v5070_v54, %v982_v34  ;;  %v983_v45 = vmul.f32 %v5065_v52, %v959_v42 }
 0x126   : > { %4312 = vmatpush3.bf16.msra.mxu1 %v4649_v15  ;;  %v3847_v39 = vcombine.low %v5168_v35, %v5170_v36  ;;  %1043 = vst [vmem:[#allocation2 + $0x58] sm:$0xf] %v3979_v33  ;;  %v1007_v46 = vmax.f32 %v999_v38, 0.0  ;;  %v1000_v47 = vadd.f32 %v5070_v54, %v985_v41  ;;  %v4671_v30 = vld [vmem:[%s5562_s7 + $0x150] sm:$0xff]   ;;  %v1398_v35 = vld [vmem:[#allocation2 + $0xa0] sm:$0xf] }
 0x127   : > { %4313 = vmatprep.subr.bf16.mxu1 %v4652_v26  ;;  %v1005_v48 = vmax.f32 %v997_v43, 0.0  ;;  %v998_v49 = vadd.f32 %v5070_v54, %v983_v45 }
 0x128   : > { %4305 = vmatprep.mubr.bf16.mxu1 %v3847_v39  ;;  %v3984_v50 = vpack.c.bf16 %v1007_v46, %v1007_v46  ;;  %v1008_v53 = vmax.f32 %v1000_v47, 0.0 }
 0x129   : > { %v3982_v55 = vpack.c.bf16 %v1005_v48, %v1005_v48  ;;  %v1006_v58 = vmax.f32 %v998_v49, 0.0 }
 0x12a   : > { %4314 = vmatpush3.bf16.msra.mxu1 %v4652_v26  ;;  %1048 = vst [vmem:[#allocation2 + $0x80] sm:$0xf] %v3984_v50  ;;  %v3985_v59 = vpack.c.bf16 %v1008_v53, %v1008_v53  ;;  %v1389_v50 = vld [vmem:[#allocation2 + $0x94] sm:$0x1] }
 0x12b   : > { %4315 = vmatprep.subr.bf16.mxu1 %v4655_v44  ;;  %1046 = vst [vmem:[#allocation2 + $0x70] sm:$0xf] %v3982_v55  ;;  %v3983_v61 = vpack.c.bf16 %v1006_v58, %v1006_v58  ;;  %v1746_v21 = vld [vmem:[#allocation2 + $0x40] sm:$0xf] }
 0x12c   : > { %v1744_v60 = vld [vmem:[#allocation2 + $0x30] sm:$0xf]  ;;  %1049 = vst [vmem:[#allocation2 + $0x88] sm:$0xf] %v3985_v59  ;;  %v3860_v29 = vcombine.low %v5183_v56, %v1746_v21 }
 0x12d   : > { %v3848_v63 = vcombine.low %v1744_v60, %v5183_v56  ;;  %1047 = vst [vmem:[#allocation2 + $0x78] sm:$0xf] %v3983_v61  ;;  %v3859_v20 = vcombine.low %v5170_v36, %v1744_v60  ;;  %v1401_v36 = vld [vmem:[#allocation2 + $0xa4] sm:$0x1]  ;;  %v1404_v61 = vld [vmem:[#allocation2 + $0xa8] sm:$0xf] }
 0x12e   : > { %4316 = vmatpush3.bf16.msra.mxu1 %v4655_v44  ;;  %v1386_v44 = vld [vmem:[#allocation2 + $0x90] sm:$0xf] }
 0x12f   : > { %4317 = vmatprep.subr.bf16.mxu1 %v4656_v57  ;;  %4306 = vmatmul.mubr.bf16.gmra.mrb[36].mxu1 %v3848_v63 }
 0x130   : > { %4325 = vmatprep.mubr.bf16.mxu1 %v3857_v0 }
 0x132   : > { %4318 = vmatpush3.bf16.msra.mxu1 %v4656_v57  ;;  %v4673_v57 = vld [vmem:[%s5562_s7 + $0x158] sm:$0xff]  }
 0x133   : > { %4319 = vmatprep.subr.bf16.mxu1 %v4657_v1 }
 0x136   : > { %4320 = vmatpush3.bf16.msra.mxu1 %v4657_v1 }
 0x137   : > { %4321 = vmatprep.subr.bf16.mxu1 %v4658_v2 }
 0x139   : > { %v4255_v4 = vpop.f32.mrb[16].mxu1 }
 0x13a   : > { %4322 = vmatpush3.bf16.msra.mxu1 %v4658_v2  ;;  %v1252_v6 = vmul.f32 %v4255_v4, %v5065_v52  ;;  %v1212_v7 = vpop.f32.mrb[17].mxu1  ;;  %v1407_v2 = vld [vmem:[#allocation2 + $0xac] sm:$0x1] }
 0x13b   : > { %4323 = vmatprep.subr.bf16.mxu1 %v4659_v3  ;;  %v1250_v8 = vmul.f32 %v5065_v52, %v1212_v7  ;;  %v4256_v9 = vpop.f32.mrb[18].mxu1 }
 0x13c   : > { %v1267_v10 = vadd.f32 %v5070_v54, %v1252_v6  ;;  %v1253_v12 = vmul.f32 %v4256_v9, %v5065_v52  ;;  %v1215_v13 = vpop.f32.mrb[19].mxu1  ;;  %v1392_v9 = vld [vmem:[#allocation2 + $0x98] sm:$0xf] }
 0x13d   : > { %v1265_v15 = vadd.f32 %v5070_v54, %v1250_v8  ;;  %v1251_v16 = vmul.f32 %v5065_v52, %v1215_v13 }
 0x13e   : > { %4324 = vmatpush3.bf16.msra.mxu1 %v4659_v3  ;;  %v1275_v18 = vmax.f32 %v1267_v10, 0.0  ;;  %v1268_v19 = vadd.f32 %v5070_v54, %v1253_v12  ;;  %v1395_v10 = vld [vmem:[#allocation2 + $0x9c] sm:$0x1] }
 0x13f   : > { %4501 = vmatprep.subr.bf16.mxu1 %v4667_v5  ;;  %v1273_v22 = vmax.f32 %v1265_v15, 0.0  ;;  %v1266_v23 = vadd.f32 %v5070_v54, %v1251_v16  ;;  %v4677_v16 = vld [vmem:[%s5562_s7 + $0x160] sm:$0xff]  }
 0x140   : > { %v3988_v11 = vpack.c.bf16 %v1275_v18, %v1275_v18  ;;  %v1276_v24 = vmax.f32 %v1268_v19, 0.0 }
 0x141   : > { %4326 = vmatmul.mubr.bf16.vlgmr.msra.gmra.mrb[32].mxu1 %v3858_v14  ;;  %v3986_v25 = vpack.c.bf16 %v1273_v22, %v1273_v22  ;;  %v1274_v26 = vmax.f32 %v1266_v23, 0.0  ;;  %v4259_v27 = vpop.f32.mrb[20].mxu1 }
 0x142   : > { %4329 = vmatprep.mubr.bf16.mxu1 %v3859_v20  ;;  %4509 = vmatpush3.bf16.msra.mxu1 %v4667_v5  ;;  %v1322_v31 = vshrl.u32 %v3988_v11, 16  ;;  %v1325_v32 = vshll.u32 %v3988_v11, 16  ;;  %v3989_v40 = vpack.c.bf16 %v1276_v24, %v1276_v24  ;;  %v1256_v33 = vmul.f32 %v4259_v27, %v5065_v52  ;;  %v1228_v34 = vpop.f32.mrb[21].mxu1 }
 0x143   : > { %4502 = vmatprep.subr.bf16.mxu1 %v4669_v17  ;;  %v1306_v37 = vshrl.u32 %v3986_v25, 16  ;;  %v1309_v38 = vshll.u32 %v3986_v25, 16  ;;  %v3987_v39 = vpack.c.bf16 %v1274_v26, %v1274_v26  ;;  %v1254_v41 = vmul.f32 %v5065_v52, %v1228_v34  ;;  %v4260_v42 = vpop.f32.mrb[22].mxu1  ;;  %v1410_v34 = vld [vmem:[#allocation2 + $0xb0] sm:$0xf] }
 0x144   : > { %v1324_v43 = vrot.slane %v1322_v31, 7  ;;  %v1330_v45 = vshrl.u32 %v3989_v40, 16  ;;  %v1333_v46 = vshll.u32 %v3989_v40, 16  ;;  %v1271_v47 = vadd.f32 %v5070_v54, %v1256_v33  ;;  %v1231_v48 = vpop.f32.mrb[23].mxu1  ;;  %v4679_v31 = vld [vmem:[%s5562_s7 + $0x168] sm:$0xff]  }
 0x145   : > { %v1308_v49 = vrot.slane %v1306_v37, 7  ;;  %v1314_v53 = vshrl.u32 %v3987_v39, 16  ;;  %v1317_v55 = vshll.u32 %v3987_v39, 16  ;;  %v1269_v56 = vadd.f32 %v5070_v54, %v1254_v41  ;;  %v1422_v40 = vld [vmem:[#allocation2 + $0xc0] sm:$0xf] }
 0x146   : > { %4510 = vmatpush3.bf16.msra.mxu1 %v4669_v17  ;;  %v1327_v58 = vor.u32 %v1325_v32, %v1324_v43  ;;  %v1328_v59 = vrot.slane %v1324_v43, 4  ;;  %v1332_v60 = vrot.slane %v1330_v45, 7  ;;  %v1279_v63 = vmax.f32 %v1271_v47, 0.0  ;;  %v1413_v43 = vld [vmem:[#allocation2 + $0xb4] sm:$0x1] }
 0x147   : > { %4503 = vmatprep.subr.bf16.mxu1 %v4671_v30  ;;  %v1311_v0 = vor.u32 %v1309_v38, %v1308_v49  ;;  %v1312_v1 = vrot.slane %v1308_v49, 4  ;;  %v1316_v3 = vrot.slane %v1314_v53, 7  ;;  %v1277_v4 = vmax.f32 %v1269_v56, 0.0  ;;  %v5259_v47 = vld [vmem:[%s5562_s7 + $0x170] sm:$0xff]  }
 0x148   : > { %v1399_v5 = vsel %vm5085_vm5, %v1327_v58, %v1398_v35  ;;  %v1402_v6 = vsel %vm4962_vm2, %v1328_v59, %v1401_v36  ;;  %v1335_v7 = vor.u32 %v1333_v46, %v1332_v60  ;;  %v1336_v8 = vrot.slane %v1332_v60, 4 }
 0x149   : > { %4330 = vmatmul.mubr.bf16.gmra.mrb[36].mxu1 %v3860_v29  ;;  %1400 = vst [vmem:[#allocation2 + $0xa0] sm:$0xf] %v1399_v5  ;;  %1403 = vst [vmem:[#allocation2 + $0xa4] sm:$0x1] %v1402_v6  ;;  %v1387_v12 = vsel %vm5085_vm5, %v1311_v0, %v1386_v44  ;;  %v1390_v13 = vsel %vm4962_vm2, %v1312_v1, %v1389_v50  ;;  %v1319_v14 = vor.u32 %v1317_v55, %v1316_v3  ;;  %v1416_v6 = vld [vmem:[#allocation2 + $0xb8] sm:$0xf] }
 0x14a   : > { %4511 = vmatpush3.bf16.msra.mxu1 %v4671_v30  ;;  %v1320_v15 = vrot.slane %v1316_v3, 4  ;;  %1388 = vst [vmem:[#allocation2 + $0x90] sm:$0xf] %v1387_v12  ;;  %1391 = vst [vmem:[#allocation2 + $0x94] sm:$0x1] %v1390_v13  ;;  %v1405_v17 = vsel %vm5085_vm5, %v1335_v7, %v1404_v61  ;;  %v1408_v18 = vsel %vm4962_vm2, %v1336_v8, %v1407_v2  ;;  %v5279_v3 = vld [vmem:[%s5562_s7 + $0x178] sm:$0xff]  }
 0x14b   : > { %4504 = vmatprep.subr.bf16.mxu1 %v4673_v57  ;;  %v3992_v19 = vpack.c.bf16 %v1279_v63, %v1279_v63  ;;  %v3990_v20 = vpack.c.bf16 %v1277_v4, %v1277_v4  ;;  %1406 = vst [vmem:[#allocation2 + $0xa8] sm:$0xf] %v1405_v17  ;;  %1409 = vst [vmem:[#allocation2 + $0xac] sm:$0x1] %v1408_v18  ;;  %v1393_v21 = vsel %vm5085_vm5, %v1319_v14, %v1392_v9  ;;  %v1428_v2 = vld [vmem:[#allocation2 + $0xc8] sm:$0xf] }
 0x14c   : > { %v1396_v22 = vsel %vm4962_vm2, %v1320_v15, %v1395_v10  ;;  %v1257_v23 = vmul.f32 %v4260_v42, %v5065_v52  ;;  %v1255_v11 = vmul.f32 %v5065_v52, %v1231_v48  ;;  %1394 = vst [vmem:[#allocation2 + $0x98] sm:$0xf] %v1393_v21  ;;  %v1425_v52 = vld [vmem:[#allocation2 + $0xc4] sm:$0x1]  ;;  %v1431_v4 = vld [vmem:[#allocation2 + $0xcc] sm:$0x1] }
 0x14d   : > { %1397 = vst [vmem:[#allocation2 + $0x9c] sm:$0x1] %v1396_v22  ;;  %v1354_v24 = vshrl.u32 %v3992_v19, 16  ;;  %v1357_v25 = vshll.u32 %v3992_v19, 16  ;;  %v1338_v26 = vshrl.u32 %v3990_v20, 16  ;;  %v1341_v27 = vshll.u32 %v3990_v20, 16 }
 0x14e   : > { %4512 = vmatpush3.bf16.msra.mxu1 %v4673_v57  ;;  %v1272_v29 = vadd.f32 %v5070_v54, %v1257_v23  ;;  %v1270_v30 = vadd.f32 %v5070_v54, %v1255_v11  ;;  %v1419_v9 = vld [vmem:[#allocation2 + $0xbc] sm:$0x1]  ;;  %v5284_v10 = vld [vmem:[%s5560_s5] ss:$0 sm:$0xff] }
 0x14f   : > { %4505 = vmatprep.subr.bf16.mxu1 %v4677_v16  ;;  %v1356_v32 = vrot.slane %v1354_v24, 7  ;;  %v1340_v33 = vrot.slane %v1338_v26, 7  ;;  %v5295_v17 = vld [vmem:[%s5561_s6] ss:$0 sm:$0xff]  ;;  %v4678_v26 = vld [vmem:[%s5562_s7 + $0x48] sm:$0xff]  }
 0x150   : > { %v1280_v35 = vmax.f32 %v1272_v29, 0.0  ;;  %v1278_v36 = vmax.f32 %v1270_v30, 0.0  ;;  %v1445_v37 = vld [vmem:[#allocation2 + $0xa0] sm:$0x1] }
 0x151   : > { %v1359_v38 = vor.u32 %v1357_v25, %v1356_v32  ;;  %v1360_v39 = vrot.slane %v1356_v32, 4  ;;  %v1343_v41 = vor.u32 %v1341_v27, %v1340_v33  ;;  %v1344_v42 = vrot.slane %v1340_v33, 4  ;;  %v1439_v44 = vld [vmem:[#allocation2 + $0x90] sm:$0x1] }
 0x152   : > { %4513 = vmatpush3.bf16.msra.mxu1 %v4677_v16  ;;  %v1446_v54 = vsel %vm4962_vm2, 0, %v1445_v37  ;;  %v3993_v45 = vpack.c.bf16 %v1280_v35, %v1280_v35  ;;  %v3991_v46 = vpack.c.bf16 %v1278_v36, %v1278_v36  ;;  %v1440_v48 = vsel %vm4962_vm2, 0, %v1439_v44  ;;  %v1448_v49 = vld [vmem:[#allocation2 + $0xa8] sm:$0x1] }
 0x153   : > { %4506 = vmatprep.subr.bf16.mxu1 %v4679_v31  ;;  %1447 = vst [vmem:[#allocation2 + $0xa0] sm:$0x1] %v1446_v54  ;;  %v1423_v50 = vsel %vm5085_vm5, %v1359_v38, %v1422_v40  ;;  %v1426_v53 = vsel %vm4962_vm2, %v1360_v39, %v1425_v52  ;;  %v1411_v55 = vsel %vm5085_vm5, %v1343_v41, %v1410_v34  ;;  %1441 = vst [vmem:[#allocation2 + $0x90] sm:$0x1] %v1440_v48  ;;  %v1442_v57 = vld [vmem:[#allocation2 + $0x98] sm:$0x1] }
 0x154   : > { %v1449_v56 = vsel %vm4962_vm2, 0, %v1448_v49  ;;  %1424 = vst [vmem:[#allocation2 + $0xc0] sm:$0xf] %v1423_v50  ;;  %1427 = vst [vmem:[#allocation2 + $0xc4] sm:$0x1] %v1426_v53  ;;  %v1414_v58 = vsel %vm4962_vm2, %v1344_v42, %v1413_v43  ;;  %v1362_v59 = vshrl.u32 %v3993_v45, 16 }
 0x155   : > { %1412 = vst [vmem:[#allocation2 + $0xb0] sm:$0xf] %v1411_v55  ;;  %v1365_v60 = vshll.u32 %v3993_v45, 16  ;;  %1450 = vst [vmem:[#allocation2 + $0xa8] sm:$0x1] %v1449_v56  ;;  %v1443_v61 = vsel %vm4962_vm2, 0, %v1442_v57 }
 0x156   : > { %1415 = vst [vmem:[#allocation2 + $0xb4] sm:$0x1] %v1414_v58  ;;  %v1346_v63 = vshrl.u32 %v3991_v46, 16  ;;  %v1349_v0 = vshll.u32 %v3991_v46, 16  ;;  %4514 = vmatpush3.bf16.msra.mxu1 %v4679_v31  ;;  %1444 = vst [vmem:[#allocation2 + $0x98] sm:$0x1] %v1443_v61 }
 0x157   : > { %v1364_v1 = vrot.slane %v1362_v59, 7  ;;  %4507 = vmatprep.subr.bf16.mxu1 %v5259_v47  ;;  %v4681_v39 = vld [vmem:[%s5562_s7 + $0x50] sm:$0xff]   ;;  %v4685_v56 = vld [vmem:[%s5562_s7 + $0x58] sm:$0xff]  }
 0x158   : > { %v1348_v5 = vrot.slane %v1346_v63, 7 }
 0x159   : > { %v1367_v7 = vor.u32 %v1365_v60, %v1364_v1  ;;  %v1368_v8 = vrot.slane %v1364_v1, 4  ;;  %v4279_v16 = vpop.f32.mrb[24].mxu1 }
 0x15a   : > { %v1351_v12 = vor.u32 %v1349_v0, %v1348_v5  ;;  %v1352_v13 = vrot.slane %v1348_v5, 4  ;;  %4515 = vmatpush3.bf16.msra.mxu1 %v5259_v47  ;;  %v1636_v22 = vmul.f32 %v4279_v16, %v5284_v10  ;;  %v1596_v29 = vpop.f32.mrb[25].mxu1 }
 0x15b   : > { %v1429_v14 = vsel %vm5085_vm5, %v1367_v7, %v1428_v2  ;;  %v1432_v15 = vsel %vm4962_vm2, %v1368_v8, %v1431_v4  ;;  %4508 = vmatprep.subr.bf16.mxu1 %v5279_v3  ;;  %v1457_v18 = vld [vmem:[#allocation2 + $0xc0] sm:$0x1]  ;;  %v3281_v30 = vld [vmem:[#allocation2 + $0xc4] sm:$0x1]  ;;  %v1634_v32 = vmul.f32 %v5284_v10, %v1596_v29  ;;  %v4280_v40 = vpop.f32.mrb[26].mxu1 }
 0x15c   : > { %v1451_v19 = vld [vmem:[#allocation2 + $0xb0] sm:$0x1]  ;;  %1430 = vst [vmem:[#allocation2 + $0xc8] sm:$0xf] %v1429_v14  ;;  %1433 = vst [vmem:[#allocation2 + $0xcc] sm:$0x1] %v1432_v15  ;;  %v1417_v20 = vsel %vm5085_vm5, %v1351_v12, %v1416_v6  ;;  %v1420_v21 = vsel %vm4962_vm2, %v1352_v13, %v1419_v9  ;;  %v1651_v28 = vadd.f32 %v5295_v17, %v1636_v22 }
 0x15d   : > { %v1458_v23 = vsel %vm4962_vm2, 0, %v1457_v18  ;;  %v1452_v11 = vsel %vm4962_vm2, 0, %v1451_v19  ;;  %1418 = vst [vmem:[#allocation2 + $0xb8] sm:$0xf] %v1417_v20  ;;  %1421 = vst [vmem:[#allocation2 + $0xbc] sm:$0x1] %v1420_v21  ;;  %v1637_v33 = vmul.f32 %v4280_v40, %v5284_v10  ;;  %v1649_v36 = vadd.f32 %v5295_v17, %v1634_v32 }
 0x15e   : > { %1459 = vst [vmem:[#allocation2 + $0xc0] sm:$0x1] %v1458_v23  ;;  %1453 = vst [vmem:[#allocation2 + $0xb0] sm:$0x1] %v1452_v11  ;;  %v4674_v24 = vld [vmem:[#allocation2 + $0x90] ss:$8 sps:$4 sm:$0xff]   ;;  %4516 = vmatpush3.bf16.msra.mxu1 %v5279_v3 }
 0x15f   : > { %v4676_v25 = vld [vmem:[#allocation2 + $0xa0] ss:$8 sps:$4 sm:$0xff]   ;;  %v3277_v27 = vld [vmem:[#allocation2 + $0xb4] sm:$0x1]  ;;  %4349 = vmatprep.mubr.bf16.mxu0 %v4674_v24  ;;  %v1659_v31 = vmax.f32 %v1651_v28, 0.0  ;;  %v1599_v52 = vpop.f32.mrb[27].mxu1 }
 0x160   : > { %4350 = vmatmul.mubr.bf16.vlgmr.msra.gmra.mrb[0].mxu0 %v4676_v25  ;;  %v3350_v34 = vshll.u32 %v3277_v27, 16  ;;  %v1635_v37 = vmul.f32 %v5284_v10, %v1599_v52  ;;  %v3378_v41 = vshll.u32 %v3281_v30, 16  ;;  %v1657_v53 = vmax.f32 %v1649_v36, 0.0  ;;  %v2256_v12 = vld [vmem:[#allocation2 + $0x48] sm:$0xf]  ;;  %v4687_v19 = vld [vmem:[%s5562_s7 + $0x60] sm:$0xff]  }
 0x161   : > { %4358 = vmatpush3.bf16.msra.mxu0 %v5059_v51  ;;  %v3996_v35 = vpack.c.bf16 %v1659_v31, %v1659_v31  ;;  %v4283_v42 = vpop.f32.mrb[28].mxu1  ;;  %v1652_v51 = vadd.f32 %v5295_v17, %v1637_v33  ;;  %v5336_v13 = vld [vmem:[#allocation2 + $0x50] sm:$0xf]  ;;  %v4688_v36 = vld [vmem:[%s5562_s7 + $0x68] sm:$0xff]  }
 0x162   : > { %4359 = vmatprep.subr.bf16.mxu0 %v4678_v26  ;;  %v1650_v44 = vadd.f32 %v5295_v17, %v1635_v37  ;;  %v1640_v45 = vmul.f32 %v4283_v42, %v5284_v10  ;;  %v5326_v49 = vrot.slane %v3350_v34, 5  ;;  %v5332_v59 = vrot.slane %v3378_v41, 5  ;;  %v1612_v60 = vpop.f32.mrb[29].mxu1 }
 0x163   : > { %v1460_v38 = vld [vmem:[#allocation2 + $0xc8] sm:$0x1]  ;;  %1700 = vst [vmem:[#allocation2 + $0xe8] sm:$0xf] %v3996_v35  ;;  %v5334_v61 = vld [vmem:[#allocation2 + $0xcc] sm:$0x1]  ;;  %v3994_v0 = vpack.c.bf16 %v1657_v53, %v1657_v53  ;;  %v1638_v18 = vmul.f32 %v5284_v10, %v1612_v60  ;;  %v3881_v30 = vcombine.low %v2256_v12, %v5336_v13 }
 0x164   : > { %v1461_v43 = vsel %vm4962_vm2, 0, %v1460_v38  ;;  %v1454_v54 = vld [vmem:[#allocation2 + $0xb8] sm:$0x1]  ;;  %v1655_v55 = vadd.f32 %v5295_v17, %v1640_v45  ;;  %v1660_v1 = vmax.f32 %v1652_v51, 0.0  ;;  %v1658_v2 = vmax.f32 %v1650_v44, 0.0  ;;  %v4284_v4 = vpop.f32.mrb[30].mxu1 }
 0x165   : > { %1462 = vst [vmem:[#allocation2 + $0xc8] sm:$0x1] %v1461_v43  ;;  %v1455_v46 = vsel %vm4962_vm2, 0, %v1454_v54  ;;  %4360 = vmatpush3.bf16.msra.mxu0 %v4678_v26  ;;  %v3276_v48 = vld [vmem:[#allocation2 + $0xb0] sm:$0xf]  ;;  %v1615_v9 = vpop.f32.mrb[31].mxu1  ;;  %v1641_v23 = vmul.f32 %v4284_v4, %v5284_v10  ;;  %v1653_v27 = vadd.f32 %v5295_v17, %v1638_v18 }
 0x166   : > { %1456 = vst [vmem:[#allocation2 + $0xb8] sm:$0x1] %v1455_v46  ;;  %v3280_v50 = vld [vmem:[#allocation2 + $0xc0] sm:$0xf]  ;;  %4361 = vmatprep.subr.bf16.mxu0 %v4681_v39  ;;  %v3341_v57 = vshrl.u32 %v3276_v48, 16  ;;  %v3344_v58 = vshll.u32 %v3276_v48, 16  ;;  %v3997_v15 = vpack.c.bf16 %v1660_v1, %v1660_v1  ;;  %v3995_v16 = vpack.c.bf16 %v1658_v2, %v1658_v2 }
 0x167   : > { %v3369_v62 = vshrl.u32 %v3280_v50, 16  ;;  %v3372_v63 = vshll.u32 %v3280_v50, 16  ;;  %v1663_v8 = vmax.f32 %v1655_v55, 0.0  ;;  %1698 = vst [vmem:[#allocation2 + $0xd8] sm:$0xf] %v3994_v0  ;;  %v3392_v21 = vshll.u32 %v5334_v61, 16 }
 0x168   : > { %v3343_v5 = vrot.slane %v3341_v57, 4  ;;  %v3346_v6 = vrot.slane %v3344_v58, 5  ;;  %v3279_v20 = vld [vmem:[#allocation2 + $0xbc] sm:$0x1]  ;;  %v1639_v11 = vmul.f32 %v5284_v10, %v1615_v9  ;;  %1701 = vst [vmem:[#allocation2 + $0xf0] sm:$0xf] %v3997_v15  ;;  %v1656_v32 = vadd.f32 %v5295_v17, %v1641_v23 }
 0x169   : > { %v3371_v7 = vrot.slane %v3369_v62, 4  ;;  %4362 = vmatpush3.bf16.msra.mxu0 %v4681_v39  ;;  %v3374_v14 = vrot.slane %v3372_v63, 5  ;;  %v4000_v22 = vpack.c.bf16 %v1663_v8, %v1663_v8  ;;  %1699 = vst [vmem:[#allocation2 + $0xe0] sm:$0xf] %v3995_v16  ;;  %v3364_v52 = vshll.u32 %v3279_v20, 16  ;;  %v4695_v9 = vld [vmem:[%s5562_s7 + $0x1c8] sm:$0xff]  }
 0x16a   : > { %4363 = vmatprep.subr.bf16.mxu0 %v4685_v56  ;;  %v3347_v28 = vor.u32 %v3346_v6, %v3343_v5  ;;  %v1654_v10 = vadd.f32 %v5295_v17, %v1639_v11  ;;  %v1661_v37 = vmax.f32 %v1653_v27, 0.0  ;;  %v1664_v38 = vmax.f32 %v1656_v32, 0.0  ;;  %v2258_v4 = vld [vmem:[#allocation2 + $0x58] sm:$0xf]  ;;  %v2261_v5 = vld [vmem:[#allocation2 + $0x70] sm:$0xf] }
 0x16b   : > { %v3375_v26 = vor.u32 %v3374_v14, %v3371_v7  ;;  %1704 = vst [vmem:[#allocation2 + $0x108] sm:$0xf] %v4000_v22  ;;  %v3366_v48 = vrot.slane %v3364_v52, 5  ;;  %v3394_v55 = vrot.slane %v3392_v21, 5  ;;  %v2259_v6 = vld [vmem:[#allocation2 + $0x60] sm:$0xf]  ;;  %v3893_v20 = vcombine.low %v5336_v13, %v2258_v4 }
 0x16c   : > { %v4682_v24 = vld [vmem:[#allocation2 + $0xc0] ss:$8 sps:$4 sm:$0xff]   ;;  %v3348_v39 = vrot.slane %v3347_v28, 4  ;;  %v3998_v44 = vpack.c.bf16 %v1661_v37, %v1661_v37  ;;  %v4001_v17 = vpack.c.bf16 %v1664_v38, %v1664_v38  ;;  %v1662_v50 = vmax.f32 %v1654_v10, 0.0  ;;  %v4697_v14 = vld [vmem:[%s5562_s7 + $0x1d0] sm:$0xff]   ;;  %v4703_v23 = vld [vmem:[%s5562_s7 + $0x1f8] sm:$0xff]  }
 0x16d   : > { %v3282_v25 = vld [vmem:[#allocation2 + $0xc8] sm:$0xf]  ;;  %v4680_v29 = vld [vmem:[#allocation2 + $0xb0] ss:$8 sps:$4 sm:$0xff]   ;;  %4364 = vmatpush3.bf16.msra.mxu0 %v4685_v56  ;;  %v3376_v43 = vrot.slane %v3375_v26, 4  ;;  %v3882_v7 = vcombine.low %v2258_v4, %v2259_v6  ;;  %v4700_v21 = vld [vmem:[%s5562_s7 + $0x1e0] sm:$0xff]  }
 0x16e   : > { %v3278_v31 = vld [vmem:[#allocation2 + $0xb8] sm:$0xf]  ;;  %4353 = vmatprep.mubr.bf16.mxu0 %v4680_v29  ;;  %4365 = vmatprep.subr.bf16.mxu0 %v4687_v19  ;;  %v3383_v34 = vshrl.u32 %v3282_v25, 16  ;;  %v3386_v35 = vshll.u32 %v3282_v25, 16  ;;  %v4689_v56 = vld [vmem:[%s5562_s7 + $0x70] sm:$0xff]   ;;  %v3353_v57 = vsel %vm5354_vm8, %v3348_v39, %v5326_v49  ;;  %v3999_v62 = vpack.c.bf16 %v1662_v50, %v1662_v50  ;;  %v4701_v22 = vld [vmem:[%s5562_s7 + $0x1e8] sm:$0xff]  }
 0x16f   : > { %v3355_v40 = vshrl.u32 %v3278_v31, 16  ;;  %v3358_v33 = vshll.u32 %v3278_v31, 16  ;;  %4354 = vmatmul.mubr.bf16.gmra.mrb[4].mxu0 %v4682_v24  ;;  %1702 = vst [vmem:[#allocation2 + $0xf8] sm:$0xf] %v3998_v44  ;;  %1705 = vst [vmem:[#allocation2 + $0x110] sm:$0xf] %v4001_v17  ;;  %v3381_v60 = vsel %vm5354_vm8, %v3376_v43, %v5332_v59 }
 0x170   : > { %4373 = vmatprep.mubr.bf16.mxu0 %v3881_v30  ;;  %v3385_v54 = vrot.slane %v3383_v34, 4  ;;  %v3388_v51 = vrot.slane %v3386_v35, 5  ;;  %1703 = vst [vmem:[#allocation2 + $0x100] sm:$0xf] %v3999_v62  ;;  %v4690_v49 = vld [vmem:[%s5562_s7 + $0x78] sm:$0xff]   ;;  %v4692_v59 = vld [vmem:[%s5562_s7 + $0x1c0] sm:$0xff]  }
 0x171   : > { %v3357_v41 = vrot.slane %v3355_v40, 4  ;;  %v3360_v42 = vrot.slane %v3358_v33, 5  ;;  %4366 = vmatpush3.bf16.msra.mxu0 %v4687_v19  ;;  %v2260_v8 = vld [vmem:[#allocation2 + $0x68] sm:$0xf]  ;;  %v2262_v15 = vld [vmem:[#allocation2 + $0x78] sm:$0xf] }
 0x172   : > { %v3389_v53 = vor.u32 %v3388_v51, %v3385_v54  ;;  %4367 = vmatprep.subr.bf16.mxu0 %v4688_v36  ;;  %v3883_v12 = vcombine.low %v2260_v8, %v2261_v5  ;;  %v2263_v16 = vld [vmem:[#allocation2 + $0x80] sm:$0xf]  ;;  %v4699_v19 = vld [vmem:[%s5562_s7 + $0x1d8] sm:$0xff]   ;;  %v4702_v13 = vld [vmem:[%s5562_s7 + $0x1f0] sm:$0xff]   ;;  %v3894_v24 = vcombine.low %v2259_v6, %v2260_v8  ;;  %v3895_v25 = vcombine.low %v2261_v5, %v2262_v15 }
 0x173   : > { %v3361_v46 = vor.u32 %v3360_v42, %v3357_v41  ;;  %v3884_v18 = vcombine.low %v2262_v15, %v2263_v16  ;;  %v4704_v11 = vld [vmem:[%s5562_s7 + $0x100] sm:$0xff]   ;;  %v4706_v28 = vld [vmem:[%s5562_s7 + $0x108] sm:$0xff]   ;;  %v4708_v26 = vld [vmem:[%s5562_s7 + $0x110] sm:$0xff]  }
 0x174   : > { %v3390_v61 = vrot.slane %v3389_v53, 4  ;;  %v2264_v27 = vld [vmem:[#allocation2 + $0x88] sm:$0xf]  ;;  %v4714_v29 = vld [vmem:[#allocation2 + $0xd8] ss:$8 sps:$4 sm:$0xff]   ;;  %v4712_v10 = vld [vmem:[%s5562_s7 + $0x130] sm:$0xff]  }
 0x175   : > { %v3362_v58 = vrot.slane %v3361_v46, 4  ;;  %4368 = vmatpush3.bf16.msra.mxu0 %v4688_v36  ;;  %v3896_v30 = vcombine.low %v2263_v16, %v2264_v27  ;;  %v4709_v31 = vld [vmem:[%s5562_s7 + $0x118] sm:$0xff]   ;;  %v4710_v32 = vld [vmem:[%s5562_s7 + $0x120] sm:$0xff]   ;;  %v4711_v40 = vld [vmem:[%s5562_s7 + $0x128] sm:$0xff]  }
 0x176   : > { %v3395_v1 = vsel %vm5354_vm8, %v3390_v61, %v3394_v55  ;;  %4369 = vmatprep.subr.bf16.mxu0 %v4689_v56  ;;  %v2790_v33 = vld [vmem:[#allocation2] sm:$0xf]  ;;  %v2792_v52 = vld [vmem:[#allocation2 + $0x8] sm:$0xf]  ;;  %v4713_v38 = vld [vmem:[%s5562_s7 + $0x138] sm:$0xff]  }
 0x177   : > { %v3367_v63 = vsel %vm5354_vm8, %v3362_v58, %v3366_v48  ;;  %v3944_v2 = vcombine.low %v3381_v60, %v3395_v1  ;;  %v2812_v34 = vshrl.u32 %v2790_v33, 16  ;;  %v2815_v35 = vshll.u32 %v2790_v33, 16  ;;  %v2791_v54 = vld [vmem:[#allocation2 + $0x4] sm:$0x1]  ;;  %v2793_v44 = vld [vmem:[#allocation2 + $0xc] sm:$0x1] }
 0x178   : > { %v3943_v0 = vcombine.low %v3353_v57, %v3367_v63  ;;  %v2826_v36 = vshrl.u32 %v2792_v52, 16  ;;  %v2829_v37 = vshll.u32 %v2792_v52, 16  ;;  %v4716_v51 = vld [vmem:[%s5562_s7 + $0x80] sm:$0xff]   ;;  %v2821_v46 = vshll.u32 %v2791_v54, 16  ;;  %v4715_v53 = vld [vmem:[#allocation2 + $0xe8] ss:$8 sps:$4 sm:$0xff]  }
 0x179   : > { %4370 = vmatpush3.bf16.msra.mxu0 %v4689_v56  ;;  %v2814_v39 = vrot.slane %v2812_v34, 4  ;;  %v2817_v41 = vrot.slane %v2815_v35, 5  ;;  %v4718_v50 = vld [vmem:[#allocation2 + $0xf8] ss:$8 sps:$4 sm:$0xff]   ;;  %v4717_v55 = vld [vmem:[%s5562_s7 + $0x88] sm:$0xff]   ;;  %v2835_v56 = vshll.u32 %v2793_v44, 16 }
 0x17a   : > { %4497 = vmatprep.mubr.bf16.mxu1 %v3943_v0  ;;  %4371 = vmatprep.subr.bf16.mxu0 %v4690_v49  ;;  %v2828_v42 = vrot.slane %v2826_v36, 4  ;;  %v2831_v43 = vrot.slane %v2829_v37, 5  ;;  %v2823_v58 = vrot.slane %v2821_v46, 5  ;;  %v4720_v60 = vld [vmem:[%s5562_s7 + $0x90] sm:$0xff]   ;;  %v2800_v4 = vld [vmem:[#allocation2 + $0x28] sm:$0xf] }
 0x17b   : > { %4498 = vmatmul.mubr.bf16.vlgmr.msra.gmra.mrb[40].mxu1 %v3944_v2  ;;  %v2818_v17 = vor.u32 %v2817_v41, %v2814_v39  ;;  %v2837_v61 = vrot.slane %v2835_v56, 5  ;;  %v4719_v63 = vld [vmem:[#allocation2 + $0x108] ss:$8 sps:$4 sm:$0xff]   ;;  %v4722_v5 = vld [vmem:[%s5562_s7 + $0xa0] sm:$0xff]   ;;  %v2796_v6 = vld [vmem:[#allocation2 + $0x18] sm:$0xf] }
 0x17c   : > { %v2832_v48 = vor.u32 %v2831_v43, %v2828_v42  ;;  %v2854_v15 = vshrl.u32 %v2796_v6, 16  ;;  %v2857_v16 = vshll.u32 %v2796_v6, 16  ;;  %v4724_v27 = vld [vmem:[%s5562_s7 + $0xb0] sm:$0xff]   ;;  %v2799_v39 = vld [vmem:[#allocation2 + $0x24] sm:$0x1]  ;;  %v4725_v41 = vld [vmem:[%s5562_s7 + $0xb8] sm:$0xff]  }
 0x17d   : > { %4372 = vmatpush3.bf16.msra.mxu0 %v4690_v49  ;;  %v2819_v57 = vrot.slane %v2818_v17, 4  ;;  %v4721_v49 = vld [vmem:[%s5562_s7 + $0x98] sm:$0xff]  }
 0x17e   : > { %4381 = vmatprep.subr.bf16.mxu0 %v4692_v59  ;;  %v2833_v62 = vrot.slane %v2832_v48, 4  ;;  %v2805_v56 = vld [vmem:[#allocation2 + $0x3c] sm:$0x1] }
 0x17f   : > { %v2824_v0 = vsel %vm5354_vm8, %v2819_v57, %v2823_v58 }
 0x180   : > { %4374 = vmatmul.mubr.bf16.vlgmr.msra.gmra.mrb[0].mxu0 %v3882_v7  ;;  %v5436_v1 = vsel %vm5354_vm8, %v2833_v62, %v2837_v61 }
 0x181   : > { %4377 = vmatprep.mubr.bf16.mxu0 %v3883_v12  ;;  %4382 = vmatpush3.bf16.msra.mxu0 %v4692_v59  ;;  %v3917_v2 = vcombine.low %v2824_v0, %v5436_v1  ;;  %v2794_v59 = vld [vmem:[#allocation2 + $0x10] sm:$0xf]  ;;  %v2882_v12 = vshrl.u32 %v2800_v4, 16 }
 0x182   : > { %4383 = vmatprep.subr.bf16.mxu0 %v4695_v9  ;;  %v2840_v7 = vshrl.u32 %v2794_v59, 16  ;;  %v2843_v8 = vshll.u32 %v2794_v59, 16  ;;  %v2919_v59 = vshll.u32 %v2805_v56, 16 }
 0x185   : > { %4384 = vmatpush3.bf16.msra.mxu0 %v4695_v9  ;;  %v2798_v9 = vld [vmem:[#allocation2 + $0x20] sm:$0xf] }
 0x186   : > { %4385 = vmatprep.subr.bf16.mxu0 %v4697_v14 }
 0x188   : > { %4378 = vmatmul.mubr.bf16.gmra.mrb[4].mxu0 %v3884_v18  ;;  %v4723_v18 = vld [vmem:[%s5562_s7 + $0xa8] sm:$0xff]  }
 0x189   : > { %4386 = vmatpush3.bf16.msra.mxu0 %v4697_v14  ;;  %4397 = vmatprep.mubr.bf16.mxu0 %v3893_v20  ;;  %v2885_v14 = vshll.u32 %v2800_v4, 16  ;;  %v2845_v20 = vrot.slane %v2843_v8, 5 }
 0x18a   : > { %4387 = vmatprep.subr.bf16.mxu0 %v4699_v19 }
 0x18d   : > { %4388 = vmatpush3.bf16.msra.mxu0 %v4699_v19  ;;  %v2842_v19 = vrot.slane %v2840_v7, 4 }
 0x18e   : > { %4389 = vmatprep.subr.bf16.mxu0 %v4700_v21 }
 0x191   : > { %4390 = vmatpush3.bf16.msra.mxu0 %v4700_v21  ;;  %v2868_v21 = vshrl.u32 %v2798_v9, 16 }
 0x192   : > { %4391 = vmatprep.subr.bf16.mxu0 %v4701_v22 }
 0x195   : > { %4392 = vmatpush3.bf16.msra.mxu0 %v4701_v22  ;;  %v2871_v22 = vshll.u32 %v2798_v9, 16  ;;  %v4727_v9 = vld [vmem:[%s5562_s7 + $0x208] sm:$0xff]  }
 0x196   : > { %4393 = vmatprep.subr.bf16.mxu0 %v4702_v13 }
 0x199   : > { %4394 = vmatpush3.bf16.msra.mxu0 %v4702_v13  ;;  %v2884_v13 = vrot.slane %v2882_v12, 4 }
 0x19a   : > { %4395 = vmatprep.subr.bf16.mxu0 %v4703_v23 }
 0x19d   : > { %4396 = vmatpush3.bf16.msra.mxu0 %v4703_v23  ;;  %v2887_v23 = vrot.slane %v2885_v14, 5 }
 0x19e   : > { %4405 = vmatprep.subr.bf16.mxu0 %v4704_v11 }
 0x19f   : > { %v2888_v35 = vor.u32 %v2887_v23, %v2884_v13  ;;  %v4729_v13 = vld [vmem:[%s5562_s7 + $0x218] sm:$0xff]  }
 0x1a0   : > { %4398 = vmatmul.mubr.bf16.vlgmr.msra.gmra.mrb[0].mxu0 %v3894_v24  ;;  %v2804_v24 = vld [vmem:[#allocation2 + $0x38] sm:$0xf] }
 0x1a1   : > { %4401 = vmatprep.mubr.bf16.mxu0 %v3895_v25  ;;  %4406 = vmatpush3.bf16.msra.mxu0 %v4704_v11  ;;  %v2802_v11 = vld [vmem:[#allocation2 + $0x30] sm:$0xf]  ;;  %v2859_v25 = vrot.slane %v2857_v16, 5  ;;  %v2913_v34 = vshll.u32 %v2804_v24, 16 }
 0x1a2   : > { %4407 = vmatprep.subr.bf16.mxu0 %v4706_v28  ;;  %v2896_v33 = vshrl.u32 %v2802_v11, 16  ;;  %v2899_v52 = vshll.u32 %v2802_v11, 16  ;;  %v4730_v11 = vld [vmem:[%s5562_s7 + $0x220] sm:$0xff]  }
 0x1a3   : > { %v2915_v48 = vrot.slane %v2913_v34, 5  ;;  %v2807_v34 = vld [vmem:[#allocation2 + $0x44] sm:$0x1] }
 0x1a4   : > { %v2898_v44 = vrot.slane %v2896_v33, 4  ;;  %v2901_v17 = vrot.slane %v2899_v52, 5 }
 0x1a5   : > { %4408 = vmatpush3.bf16.msra.mxu0 %v4706_v28  ;;  %v2856_v28 = vrot.slane %v2854_v15, 4 }
 0x1a6   : > { %4409 = vmatprep.subr.bf16.mxu0 %v4708_v26 }
 0x1a8   : > { %4402 = vmatmul.mubr.bf16.gmra.mrb[4].mxu0 %v3896_v30  ;;  %v2846_v30 = vor.u32 %v2845_v20, %v2842_v19  ;;  %v4728_v19 = vld [vmem:[%s5562_s7 + $0x210] sm:$0xff]  }
 0x1a9   : > { %4410 = vmatpush3.bf16.msra.mxu0 %v4708_v26  ;;  %4421 = vmatprep.mubr.bf16.mxu0 %v4714_v29  ;;  %v2801_v26 = vld [vmem:[#allocation2 + $0x2c] sm:$0x1]  ;;  %v2795_v29 = vld [vmem:[#allocation2 + $0x14] sm:$0x1] }
 0x1aa   : > { %4411 = vmatprep.subr.bf16.mxu0 %v4709_v31  ;;  %v2891_v36 = vshll.u32 %v2801_v26, 16  ;;  %v2849_v37 = vshll.u32 %v2795_v29, 16  ;;  %v2847_v42 = vrot.slane %v2846_v30, 4  ;;  %v3268_v29 = vld [vmem:[#allocation2 + $0x90] sm:$0xf] }
 0x1ab   : > { %v3288_v33 = vshll.u32 %v3268_v29, 16 }
 0x1ac   : > { %v2851_v57 = vrot.slane %v2849_v37, 5 }
 0x1ad   : > { %4412 = vmatpush3.bf16.msra.mxu0 %v4709_v31  ;;  %v2870_v31 = vrot.slane %v2868_v21, 4 }
 0x1ae   : > { %4413 = vmatprep.subr.bf16.mxu0 %v4710_v32  ;;  %v2852_v0 = vsel %vm5354_vm8, %v2847_v42, %v2851_v57  ;;  %v3271_v42 = vld [vmem:[#allocation2 + $0x9c] sm:$0x1]  ;;  %v4735_v57 = vld [vmem:[%s5562_s7 + $0x148] sm:$0xff]  }
 0x1af   : > { %v3929_v23 = vcombine.low %v5436_v1, %v2852_v0  ;;  %v4732_v1 = vld [vmem:[%s5562_s7 + $0x230] sm:$0xff]  }
 0x1b1   : > { %4414 = vmatpush3.bf16.msra.mxu0 %v4710_v32  ;;  %v2873_v32 = vrot.slane %v2871_v22, 5 }
 0x1b2   : > { %4415 = vmatprep.subr.bf16.mxu0 %v4711_v40 }
 0x1b3   : > { %v2874_v54 = vor.u32 %v2873_v32, %v2870_v31  ;;  %v4733_v32 = vld [vmem:[%s5562_s7 + $0x238] sm:$0xff]  }
 0x1b5   : > { %4416 = vmatpush3.bf16.msra.mxu0 %v4711_v40  ;;  %v2797_v40 = vld [vmem:[#allocation2 + $0x1c] sm:$0x1]  ;;  %v2875_v61 = vrot.slane %v2874_v54, 4  ;;  %v3269_v54 = vld [vmem:[#allocation2 + $0x94] sm:$0x1] }
 0x1b6   : > { %4417 = vmatprep.subr.bf16.mxu0 %v4712_v10  ;;  %v2863_v43 = vshll.u32 %v2797_v40, 16  ;;  %v3285_v40 = vshrl.u32 %v3268_v29, 16 }
 0x1b8   : > { %v2865_v62 = vrot.slane %v2863_v43, 5  ;;  %v3287_v37 = vrot.slane %v3285_v40, 4 }
 0x1b9   : > { %4418 = vmatpush3.bf16.msra.mxu0 %v4712_v10  ;;  %v2910_v10 = vshrl.u32 %v2804_v24, 16  ;;  %v4731_v24 = vld [vmem:[%s5562_s7 + $0x228] sm:$0xff]  }
 0x1ba   : > { %4419 = vmatprep.subr.bf16.mxu0 %v4713_v38 }
 0x1bb   : > { %v2912_v46 = vrot.slane %v2910_v10, 4 }
 0x1bd   : > { %4420 = vmatpush3.bf16.msra.mxu0 %v4713_v38  ;;  %v2860_v38 = vor.u32 %v2859_v25, %v2856_v28  ;;  %v2806_v28 = vld [vmem:[#allocation2 + $0x40] sm:$0xf]  ;;  %v3270_v25 = vld [vmem:[#allocation2 + $0x98] sm:$0xf] }
 0x1be   : > { %4429 = vmatprep.subr.bf16.mxu0 %v4716_v51  ;;  %v2924_v26 = vshrl.u32 %v2806_v28, 16  ;;  %v3299_v30 = vshrl.u32 %v3270_v25, 16  ;;  %v3302_v31 = vshll.u32 %v3270_v25, 16 }
 0x1bf   : > { %v2861_v58 = vrot.slane %v2860_v38, 4  ;;  %v3290_v38 = vrot.slane %v3288_v33, 5 }
 0x1c0   : > { %4422 = vmatmul.mubr.bf16.vlgmr.msra.gmra.mrb[0].mxu0 %v4715_v53  ;;  %v2889_v53 = vrot.slane %v2888_v35, 4  ;;  %v2926_v52 = vrot.slane %v2924_v26, 4  ;;  %v3301_v35 = vrot.slane %v3299_v30, 4 }
 0x1c1   : > { %4430 = vmatpush3.bf16.msra.mxu0 %v4716_v51  ;;  %4425 = vmatprep.mubr.bf16.mxu0 %v4718_v50  ;;  %v2803_v51 = vld [vmem:[#allocation2 + $0x34] sm:$0x1]  ;;  %v2877_v50 = vshll.u32 %v2799_v39, 16  ;;  %v5465_v6 = vsel %vm5354_vm8, %v2861_v58, %v2865_v62 }
 0x1c2   : > { %4431 = vmatprep.subr.bf16.mxu0 %v4717_v55  ;;  %v3918_v7 = vcombine.low %v2852_v0, %v5465_v6 }
 0x1c3   : > { %v2879_v4 = vrot.slane %v2877_v50, 5 }
 0x1c5   : > { %4432 = vmatpush3.bf16.msra.mxu0 %v4717_v55  ;;  %v2893_v55 = vrot.slane %v2891_v36, 5  ;;  %v5470_v8 = vsel %vm5354_vm8, %v2875_v61, %v2879_v4  ;;  %v3304_v36 = vrot.slane %v3302_v31, 5  ;;  %v3274_v4 = vld [vmem:[#allocation2 + $0xa8] sm:$0xf] }
 0x1c6   : > { %4433 = vmatprep.subr.bf16.mxu0 %v4720_v60 }
 0x1c7   : > { %v3305_v43 = vor.u32 %v3304_v36, %v3301_v35 }
 0x1c8   : > { %4426 = vmatmul.mubr.bf16.gmra.mrb[4].mxu0 %v4719_v63  ;;  %v2905_v63 = vshll.u32 %v2803_v51, 16  ;;  %v3930_v51 = vcombine.low %v5465_v6, %v5470_v8  ;;  %v3272_v6 = vld [vmem:[#allocation2 + $0xa0] sm:$0xf] }
 0x1c9   : > { %4434 = vmatpush3.bf16.msra.mxu0 %v4720_v60  ;;  %4445 = vmatprep.mubr.bf16.mxu0 %v3917_v2  ;;  %v4726_v60 = vld [vmem:[%s5562_s7 + $0x200] sm:$0xff]   ;;  %v2916_v2 = vor.u32 %v2915_v48, %v2912_v46  ;;  %v3308_v46 = vshll.u32 %v3271_v42, 16  ;;  %v3306_v56 = vrot.slane %v3305_v43, 4 }
 0x1ca   : > { %4435 = vmatprep.subr.bf16.mxu0 %v4721_v49  ;;  %v2907_v12 = vrot.slane %v2905_v63, 5  ;;  %v3953_v43 = vld [vmem:[%s5563_s8] ss:$0 sm:$0xff] }
 0x1cb   : > { %v2917_v16 = vrot.slane %v2916_v2, 4  ;;  %v3310_v62 = vrot.slane %v3308_v46, 5 }
 0x1cd   : > { %4436 = vmatpush3.bf16.msra.mxu0 %v4721_v49  ;;  %v2902_v49 = vor.u32 %v2901_v17, %v2898_v44  ;;  %v4734_v44 = vld [vmem:[%s5562_s7 + $0x140] sm:$0xff]   ;;  %v3291_v17 = vor.u32 %v3290_v38, %v3287_v37  ;;  %v3311_v63 = vsel %vm5354_vm8, %v3306_v56, %v3310_v62 }
 0x1ce   : > { %4437 = vmatprep.subr.bf16.mxu0 %v4722_v5 }
 0x1cf   : > { %v2903_v15 = vrot.slane %v2902_v49, 4  ;;  %v3292_v58 = vrot.slane %v3291_v17, 4  ;;  %v4736_v49 = vld [vmem:[%s5562_s7 + $0x150] sm:$0xff]   ;;  %v3954_v17 = vld [vmem:[%s5564_s9] ss:$0 sm:$0xff] }
 0x1d1   : > { %4438 = vmatpush3.bf16.msra.mxu0 %v4722_v5  ;;  %v5461_v5 = vsel %vm5354_vm8, %v2889_v53, %v2893_v55  ;;  %v2908_v20 = vsel %vm5354_vm8, %v2903_v15, %v2907_v12  ;;  %v3294_v55 = vshll.u32 %v3269_v54, 16  ;;  %v3316_v12 = vshll.u32 %v3272_v6, 16 }
 0x1d2   : > { %4439 = vmatprep.subr.bf16.mxu0 %v4723_v18  ;;  %v3919_v14 = vcombine.low %v5470_v8, %v5461_v5  ;;  %v3931_v48 = vcombine.low %v5461_v5, %v2908_v20  ;;  %v4737_v5 = vld [vmem:[%s5562_s7 + $0x158] sm:$0xff]   ;;  %v3330_v8 = vshll.u32 %v3274_v4, 16 }
 0x1d3   : > { %v3296_v61 = vrot.slane %v3294_v55, 5 }
 0x1d5   : > { %4440 = vmatpush3.bf16.msra.mxu0 %v4723_v18  ;;  %v2921_v18 = vrot.slane %v2919_v59, 5  ;;  %v3297_v2 = vsel %vm5354_vm8, %v3292_v58, %v3296_v61 }
 0x1d6   : > { %4441 = vmatprep.subr.bf16.mxu0 %v4724_v27  ;;  %v3941_v59 = vcombine.low %v3297_v2, %v3311_v63 }
 0x1d7   : > { %v5484_v21 = vsel %vm5354_vm8, %v2917_v16, %v2921_v18  ;;  %v3332_v16 = vrot.slane %v3330_v8, 5 }
 0x1d8   : > { %v3920_v22 = vcombine.low %v2908_v20, %v5484_v21  ;;  %v4739_v20 = vld [vmem:[%s5562_s7 + $0x168] sm:$0xff]  }
 0x1d9   : > { %4442 = vmatpush3.bf16.msra.mxu0 %v4724_v27  ;;  %v2927_v27 = vshll.u32 %v2806_v28, 16 }
 0x1da   : > { %4443 = vmatprep.subr.bf16.mxu0 %v4725_v41 }
 0x1db   : > { %v2929_v10 = vrot.slane %v2927_v27, 5 }
 0x1dd   : > { %4444 = vmatpush3.bf16.msra.mxu0 %v4725_v41  ;;  %v2930_v39 = vor.u32 %v2929_v10, %v2926_v52  ;;  %v2933_v41 = vshll.u32 %v2807_v34, 16 }
 0x1de   : > { %4453 = vmatprep.subr.bf16.mxu0 %v4726_v60 }
 0x1df   : > { %v2931_v50 = vrot.slane %v2930_v39, 4  ;;  %v2935_v53 = vrot.slane %v2933_v41, 5 }
 0x1e0   : > { %4446 = vmatmul.mubr.bf16.vlgmr.msra.gmra.mrb[0].mxu0 %v3918_v7  ;;  %v3327_v7 = vshrl.u32 %v3274_v4, 16 }
 0x1e1   : > { %4449 = vmatprep.mubr.bf16.mxu0 %v3919_v14  ;;  %4454 = vmatpush3.bf16.msra.mxu0 %v4726_v60  ;;  %v2936_v60 = vsel %vm5354_vm8, %v2931_v50, %v2935_v53  ;;  %v4738_v14 = vld [vmem:[%s5562_s7 + $0x160] sm:$0xff]  }
 0x1e2   : > { %4455 = vmatprep.subr.bf16.mxu0 %v4727_v9  ;;  %v3932_v0 = vcombine.low %v5484_v21, %v2936_v60  ;;  %v3329_v15 = vrot.slane %v3327_v7, 4  ;;  %v3275_v21 = vld [vmem:[#allocation2 + $0xac] sm:$0x1] }
 0x1e3   : > { %v3336_v25 = vshll.u32 %v3275_v21, 16 }
 0x1e5   : > { %4456 = vmatpush3.bf16.msra.mxu0 %v4727_v9  ;;  %v3313_v9 = vshrl.u32 %v3272_v6, 16  ;;  %v3338_v30 = vrot.slane %v3336_v25, 5 }
 0x1e6   : > { %4457 = vmatprep.subr.bf16.mxu0 %v4728_v19 }
 0x1e7   : > { %v3315_v18 = vrot.slane %v3313_v9, 4 }
 0x1e8   : > { %4450 = vmatmul.mubr.bf16.gmra.mrb[4].mxu0 %v3920_v22 }
 0x1e9   : > { %4458 = vmatpush3.bf16.msra.mxu0 %v4728_v19  ;;  %4469 = vmatprep.mubr.bf16.mxu0 %v3929_v23  ;;  %v3318_v19 = vrot.slane %v3316_v12, 5 }
 0x1ea   : > { %4459 = vmatprep.subr.bf16.mxu0 %v4729_v13 }
 0x1eb   : > { %v3319_v28 = vor.u32 %v3318_v19, %v3315_v18 }
 0x1ed   : > { %4460 = vmatpush3.bf16.msra.mxu0 %v4729_v13  ;;  %v3333_v13 = vor.u32 %v3332_v16, %v3329_v15  ;;  %v3320_v29 = vrot.slane %v3319_v28, 4 }
 0x1ee   : > { %4461 = vmatprep.subr.bf16.mxu0 %v4730_v11 }
 0x1ef   : > { %v3334_v27 = vrot.slane %v3333_v13, 4 }
 0x1f1   : > { %4462 = vmatpush3.bf16.msra.mxu0 %v4730_v11  ;;  %v3273_v11 = vld [vmem:[#allocation2 + $0xa4] sm:$0x1]  ;;  %v3339_v40 = vsel %vm5354_vm8, %v3334_v27, %v3338_v30 }
 0x1f2   : > { %4463 = vmatprep.subr.bf16.mxu0 %v4731_v24  ;;  %v3322_v26 = vshll.u32 %v3273_v11, 16 }
 0x1f5   : > { %4464 = vmatpush3.bf16.msra.mxu0 %v4731_v24 }
 0x1f6   : > { %4465 = vmatprep.subr.bf16.mxu0 %v4732_v1 }
 0x1f9   : > { %4466 = vmatpush3.bf16.msra.mxu0 %v4732_v1 }
 0x1fa   : > { %4467 = vmatprep.subr.bf16.mxu0 %v4733_v32 }
 0x1fd   : > { %4468 = vmatpush3.bf16.msra.mxu0 %v4733_v32  ;;  %v3324_v32 = vrot.slane %v3322_v26, 5 }
 0x1fe   : > { %4477 = vmatprep.subr.bf16.mxu0 %v4734_v44 }
 0x1ff   : > { %v3325_v10 = vsel %vm5354_vm8, %v3320_v29, %v3324_v32 }
 0x200   : > { %4470 = vmatmul.mubr.bf16.vlgmr.msra.gmra.mrb[0].mxu0 %v3930_v51  ;;  %v3942_v35 = vcombine.low %v3325_v10, %v3339_v40 }
 0x201   : > { %4473 = vmatprep.mubr.bf16.mxu0 %v3931_v48  ;;  %4478 = vmatpush3.bf16.msra.mxu0 %v4734_v44 }
 0x202   : > { %4479 = vmatprep.subr.bf16.mxu0 %v4735_v57 }
 0x205   : > { %4480 = vmatpush3.bf16.msra.mxu0 %v4735_v57 }
 0x206   : > { %4481 = vmatprep.subr.bf16.mxu0 %v4736_v49 }
 0x208   : > { %4474 = vmatmul.mubr.bf16.gmra.mrb[4].mxu0 %v3932_v0 }
 0x209   : > { %4482 = vmatpush3.bf16.msra.mxu0 %v4736_v49  ;;  %4493 = vmatprep.mubr.bf16.mxu0 %v3941_v59 }
 0x20a   : > { %4483 = vmatprep.subr.bf16.mxu0 %v4737_v5 }
 0x20d   : > { %4484 = vmatpush3.bf16.msra.mxu0 %v4737_v5 }
 0x20e   : > { %4485 = vmatprep.subr.bf16.mxu0 %v4738_v14 }
 0x211   : > { %4486 = vmatpush3.bf16.msra.mxu0 %v4738_v14 }
 0x212   : > { %4487 = vmatprep.subr.bf16.mxu0 %v4739_v20 }
 0x214   : > { %v4327_v22 = vpop.f32.mrb[32].mxu1 }
 0x215   : > { %v2016_v23 = vpop.f32.mrb[33].mxu1  ;;  %4488 = vmatpush3.bf16.msra.mxu0 %v4739_v20 }
 0x216   : > { %v5531_v24 = vpop.f32.mrb[34].mxu1  ;;  %4489 = vmatprep.subr.bf16.mxu0 %v5259_v47 }
 0x217   : > { %v2019_v1 = vpop.f32.mrb[35].mxu1 }
 0x219   : > { %4490 = vmatpush3.bf16.msra.mxu0 %v5259_v47 }
 0x21a   : > { %4491 = vmatprep.subr.bf16.mxu0 %v5279_v3 }
 0x21c   : > { %v4331_v31 = vpop.f32.mrb[36].mxu1 }
 0x21d   : > { %v2032_v33 = vpop.f32.mrb[37].mxu1  ;;  %4492 = vmatpush3.bf16.msra.mxu0 %v5279_v3 }
 0x21e   : > { %v4332_v52 = vpop.f32.mrb[38].mxu1 }
 0x21f   : > { %v2035_v34 = vpop.f32.mrb[39].mxu1 }
 0x220   : > { %4494 = vmatmul.mubr.bf16.vlgmr.msra.gmra.mrb[0].mxu0 %v3942_v35 }
 0x24e   : > { %v4499_v47 = vpop.f32.mrb[40].mxu1 }
 0x24f   : > { %v3526_v36 = vpop.f32.mrb[41].mxu1 }
 0x250   : > { %v4500_v37 = vpop.f32.mrb[42].mxu1 }
 0x251   : > { %v3529_v38 = vpop.f32.mrb[43].mxu1 }
 0x2db   : > { %v4475_v39 = vpop.f32.mrb[4].mxu0 }
 0x2dc   : > { %v4521_v41 = vadd.f32 %v4475_v39, %v4331_v31  ;;  %v3229_v42 = vpop.f32.mrb[5].mxu0 }
 0x2dd   : > { %v4523_v54 = vadd.f32 %v3229_v42, %v2032_v33  ;;  %v4476_v51 = vpop.f32.mrb[6].mxu0 }
 0x2de   : > { %v4522_v3 = vadd.f32 %v4521_v41, %v4499_v47  ;;  %v4525_v44 = vadd.f32 %v4476_v51, %v4332_v52  ;;  %v3232_v45 = vpop.f32.mrb[7].mxu0 }
 0x2df   : > { %v4524_v46 = vadd.f32 %v4523_v54, %v3526_v36  ;;  %v4527_v48 = vadd.f32 %v3232_v45, %v2035_v34 }
 0x2e0   : > { %v3586_v50 = vmul.f32 %v4522_v3, %v3953_v43  ;;  %v4526_v53 = vadd.f32 %v4525_v44, %v4500_v37 }
 0x2e1   : > { %v3584_v55 = vmul.f32 %v4524_v46, %v3953_v43  ;;  %v4528_v56 = vadd.f32 %v4527_v48, %v3529_v38 }
 0x2e2   : > { %v3601_v57 = vadd.f32 %v3954_v17, %v3586_v50  ;;  %v3587_v58 = vmul.f32 %v4526_v53, %v3953_v43 }
 0x2e3   : > { %v3599_v62 = vadd.f32 %v3954_v17, %v3584_v55  ;;  %v3585_v60 = vmul.f32 %v4528_v56, %v3953_v43 }
 0x2e4   : > { %v3602_v61 = vadd.f32 %v3954_v17, %v3587_v58  ;;  %v3609_v0 = vmax.f32 %v3601_v57, 0.0 }
 0x2e5   : > { %v3600_v63 = vadd.f32 %v3954_v17, %v3585_v60  ;;  %v3607_v2 = vmax.f32 %v3599_v62, 0.0 }
 0x2e6   : > { %v3610_v49 = vmax.f32 %v3602_v61, 0.0 }
 0x2e7   : > { %v3608_v59 = vmax.f32 %v3600_v63, 0.0 }
 0x2e8   : > { %v4028_v4 = vpack.c.bf16 %v3610_v49, %v3609_v0 }
 0x2e9   : > { %v4023_v5 = vpack.c.bf16 %v3608_v59, %v3607_v2 }
 0x2ea   : > { %4032 = vst [vmem:[%s419_s24 + $0x18] sm:$0xff] %v4028_v4  }
 0x2eb   : > { %4031 = vst [vmem:[%s419_s24 + $0x10] sm:$0xff] %v4023_v5  }
 0x2f3   : > { %v4495_v6 = vpop.f32.mrb[0].mxu0 }
 0x2f4   : > { %v4517_v7 = vadd.f32 %v4495_v6, %v4327_v22  ;;  %v3510_v8 = vpop.f32.mrb[1].mxu0 }
 0x2f5   : > { %v4518_v9 = vadd.f32 %v3510_v8, %v2016_v23  ;;  %v4496_v12 = vpop.f32.mrb[2].mxu0 }
 0x2f6   : > { %v3582_v14 = vmul.f32 %v4517_v7, %v3953_v43  ;;  %v4519_v15 = vadd.f32 %v4496_v12, %v5531_v24  ;;  %v3513_v16 = vpop.f32.mrb[3].mxu0 }
 0x2f7   : > { %v3580_v18 = vmul.f32 %v4518_v9, %v3953_v43  ;;  %v4520_v19 = vadd.f32 %v3513_v16, %v2019_v1 }
 0x2f8   : > { %v3597_v20 = vadd.f32 %v3954_v17, %v3582_v14  ;;  %v3583_v21 = vmul.f32 %v4519_v15, %v3953_v43 }
 0x2f9   : > { %v3595_v13 = vadd.f32 %v3954_v17, %v3580_v18  ;;  %v3581_v11 = vmul.f32 %v4520_v19, %v3953_v43 }
 0x2fa   : > { %v3598_v28 = vadd.f32 %v3954_v17, %v3583_v21  ;;  %v3605_v26 = vmax.f32 %v3597_v20, 0.0 }
 0x2fb   : > { %v3596_v25 = vadd.f32 %v3954_v17, %v3581_v11  ;;  %v3603_v29 = vmax.f32 %v3595_v13, 0.0 }
 0x2fc   : > { %v3606_v27 = vmax.f32 %v3598_v28, 0.0 }
 0x2fd   : > { %v3604_v30 = vmax.f32 %v3596_v25, 0.0 }
 0x2fe   : > { %v4018_v22 = vpack.c.bf16 %v3606_v27, %v3605_v26 }
 0x2ff   : > { %v4013_v31 = vpack.c.bf16 %v3604_v30, %v3603_v29 }
 0x300   : > { %4030 = vst [vmem:[%s419_s24 + $0x8] sm:$0xff] %v4018_v22  }
 0x301   : > { %4014 = vst [vmem:[%s419_s24] sm:$0xff] %v4013_v31  }
 0x302 PF: > { %s20_s13 = sadd.s32 1, %s4746_s13  }
 0x303   : > { %p17_p4 = scmp.ge.s32.totalorder %s20_s13, 4  }
 0x305   :  { %19 = sbr.rel (!%p17_p4) target bundleno = 1 (0x1), region = 106 }

</bundles_post_ra>
